<compile_context>
chip_gen: v6e
topology: v6e:2x2x1
jax: 0.10.0
libtpu: 0.0.40
codegen_flags: <defaults>
</compile_context>

<pallas_src>
import functools
import math

import jax
import jax.numpy as jnp
from jax.experimental import pallas as pl
from jax.experimental.pallas import tpu as pltpu

EPS = 1e-6
NEG_INF = -1e9


# ----------------------- helpers traced inside kernels ----------------------

def _norm_rows(x, alpha, beta):
    """alpha * (x - mean) / (std + eps) + beta, unbiased std (torch Norm semantics)."""
    d = x.shape[-1]
    mean = jnp.mean(x, axis=-1, keepdims=True)
    diff = x - mean
    var = jnp.sum(diff * diff, axis=-1, keepdims=True) / (d - 1)
    return alpha * diff / (jnp.sqrt(var) + EPS) + beta


def _rope_rh(x, cos_t, sin_t, dk):
    """Rotate-half RoPE on one head slice (rows, dk).

    The projection rows were permuted so the head layout is [even comps | odd
    comps]; cos_t = [cos|cos], sin_t = [-sin|sin] (both (rows, dk)), so
    y = x*cos_t + rotate_half(x)*sin_t reproduces interleaved-pair RoPE exactly.
    """
    half = dk // 2
    rot = jnp.concatenate([x[:, half:], x[:, :half]], axis=-1)
    return x * cos_t + rot * sin_t


def _attn_tile(q_sc, k_sc, v_sc, mask, wo_ref, bo_ref, resid, row0, tq, heads, dk):
    """One query tile of multi-head attention + fused out-projection + residual.

    q_sc: (S, D) bf16 rope'd+scaled Q; k_sc/v_sc: (Sk, D) bf16; mask: (1, Sk) i32.
    Per head: contract only the dk-wide lane slice (no H x FLOP waste).
    """
    q_rows = q_sc[pl.ds(row0, tq), :]                 # (tq, D) bf16
    kk = k_sc[...]                                    # (Sk, D) bf16
    vv = v_sc[...]
    outs = []
    for h in range(heads):
        lo = h * dk
        qh = q_rows[:, lo:lo + dk]
        kh = kk[:, lo:lo + dk]
        vh = vv[:, lo:lo + dk]
        s = jax.lax.dot_general(qh, kh, (((1,), (1,)), ((), ())),
                                preferred_element_type=jnp.float32)   # (tq, Sk)
        s = jnp.where(mask == 0, NEG_INF, s)
        s = s - jnp.max(s, axis=-1, keepdims=True)
        p = jnp.exp(s)
        p = p * pl.reciprocal(jnp.sum(p, axis=-1, keepdims=True), approx=True)
        outs.append(jnp.dot(p.astype(jnp.bfloat16), vh,
                            preferred_element_type=jnp.float32))      # (tq, dk)
    concat = jnp.concatenate(outs, axis=-1).astype(jnp.bfloat16)      # (tq, D)
    out = jax.lax.dot_general(concat, wo_ref[...], (((1,), (1,)), ((), ())),
                              preferred_element_type=jnp.float32) + bo_ref[...]
    return resid + out


# ------------------------------ Pallas kernels -------------------------------

def _mha_self_kernel(x_ref, xt_ref, a_ref, g_ref, cos_ref, sin_ref,
                     wqkv_ref, bqkv_ref, wo_ref, bo_ref, m_ref,
                     o_ref, q_sc, k_sc, v_sc, *, heads, dk, tq):
    # Fused: pre-norm -> fused QKV proj -> RoPE(q,k) -> attention -> out-proj
    #        -> residual add.  Grid = (B, query tiles).  K/V/Q built at qt == 0.
    qt = pl.program_id(1)
    D = heads * dk

    @pl.when(qt == 0)
    def _():
        x2 = _norm_rows(x_ref[0], a_ref[...], g_ref[...])             # (S, D) f32
        qkv = jax.lax.dot_general(x2.astype(jnp.bfloat16), wqkv_ref[...],
                                  (((1,), (1,)), ((), ())),
                                  preferred_element_type=jnp.float32) + bqkv_ref[...]
        cos_t, sin_t = cos_ref[...], sin_ref[...]                     # (S, dk)
        q_parts, k_parts = [], []
        for h in range(heads):
            lo = h * dk
            q_parts.append(_rope_rh(qkv[:, lo:lo + dk], cos_t, sin_t, dk))
            k_parts.append(_rope_rh(qkv[:, D + lo:D + lo + dk], cos_t, sin_t, dk))
        q_sc[...] = jnp.concatenate(q_parts, axis=-1).astype(jnp.bfloat16)
        k_sc[...] = jnp.concatenate(k_parts, axis=-1).astype(jnp.bfloat16)
        v_sc[...] = qkv[:, 2 * D:].astype(jnp.bfloat16)

    row0 = pl.multiple_of(qt * tq, tq)
    o_ref[0] = _attn_tile(q_sc, k_sc, v_sc, m_ref[0], wo_ref, bo_ref,
                          xt_ref[0], row0, tq, heads, dk)


def _mha_cross_kernel(x_ref, xt_ref, e_ref, a_ref, g_ref,
                      cosq_ref, sinq_ref, cosk_ref, sink_ref,
                      wq_ref, bq_ref, wkv_ref, bkv_ref, wo_ref, bo_ref, m_ref,
                      o_ref, q_sc, k_sc, v_sc, *, heads, dk, tq):
    # Fused cross-attention: Q from norm(x), K/V from encoder outputs (fused KV).
    qt = pl.program_id(1)
    D = heads * dk

    @pl.when(qt == 0)
    def _():
        x2 = _norm_rows(x_ref[0], a_ref[...], g_ref[...])             # (S, D) f32
        q = jax.lax.dot_general(x2.astype(jnp.bfloat16), wq_ref[...],
                                (((1,), (1,)), ((), ())),
                                preferred_element_type=jnp.float32) + bq_ref[...]
        kv = jax.lax.dot_general(e_ref[0].astype(jnp.bfloat16), wkv_ref[...],
                                 (((1,), (1,)), ((), ())),
                                 preferred_element_type=jnp.float32) + bkv_ref[...]
        cq, sq = cosq_ref[...], sinq_ref[...]                         # (S, dk)
        ck, sk = cosk_ref[...], sink_ref[...]                         # (Sk, dk)
        q_parts, k_parts = [], []
        for h in range(heads):
            lo = h * dk
            q_parts.append(_rope_rh(q[:, lo:lo + dk], cq, sq, dk))
            k_parts.append(_rope_rh(kv[:, lo:lo + dk], ck, sk, dk))
        q_sc[...] = jnp.concatenate(q_parts, axis=-1).astype(jnp.bfloat16)
        k_sc[...] = jnp.concatenate(k_parts, axis=-1).astype(jnp.bfloat16)
        v_sc[...] = kv[:, D:].astype(jnp.bfloat16)

    row0 = pl.multiple_of(qt * tq, tq)
    o_ref[0] = _attn_tile(q_sc, k_sc, v_sc, m_ref[0], wo_ref, bo_ref,
                          xt_ref[0], row0, tq, heads, dk)


def _ffn_resident_kernel(x_ref, a_ref, g_ref, w1_ref, b1_ref, w2_ref, b2_ref,
                         o_ref):
    # Fused: pre-norm -> linear1 -> ReLU -> linear2 -> + b2 + residual.
    # Both weights resident in VMEM across all M tiles (constant index maps).
    x = x_ref[...]
    x2 = _norm_rows(x, a_ref[...], g_ref[...]).astype(jnp.bfloat16)
    h = jax.lax.dot_general(x2, w1_ref[...], (((1,), (1,)), ((), ())),
                            preferred_element_type=jnp.float32) + b1_ref[...]
    h = jnp.maximum(h, 0.0).astype(jnp.bfloat16)
    y = jax.lax.dot_general(h, w2_ref[...], (((1,), (1,)), ((), ())),
                            preferred_element_type=jnp.float32)
    o_ref[...] = x + y + b2_ref[...]


def _ffn_kernel(x_ref, a_ref, g_ref, w1_ref, b1_ref, w2_ref, b2_ref,
                o_ref, x2_sc):
    # Tiled fallback (large d_ff): d_ff streamed in chunks, f32 accumulator
    # resident across the "arbitrary" d_ff axis.
    kk = pl.program_id(1)

    @pl.when(kk == 0)
    def _():
        x2 = _norm_rows(x_ref[...], a_ref[...], g_ref[...])
        x2_sc[...] = x2.astype(jnp.bfloat16)
        o_ref[...] = jnp.zeros_like(o_ref)

    h = jax.lax.dot_general(x2_sc[...], w1_ref[...], (((1,), (1,)), ((), ())),
                            preferred_element_type=jnp.float32) + b1_ref[...]
    h = jnp.maximum(h, 0.0).astype(jnp.bfloat16)
    o_ref[...] += jax.lax.dot_general(h, w2_ref[...], (((1,), (1,)), ((), ())),
                                      preferred_element_type=jnp.float32)

    @pl.when(kk == pl.num_programs(1) - 1)
    def _():
        o_ref[...] += b2_ref[...] + x_ref[...]


# ------------------------------ call wrappers --------------------------------

def _pick_row_tile(m, target=512):
    if m <= target:
        return m
    t = (target // 8) * 8
    while t >= 8:
        if m % t == 0:
            return t
        t -= 8
    return m


def _pick_ff_tile(d_ff, target=1024):
    if d_ff <= target:
        return d_ff
    t = (target // 128) * 128
    while t >= 128:
        if d_ff % t == 0:
            return t
        t -= 128
    return d_ff


def _pick_q_tile(s, q_tile=None, target=256):
    if q_tile is not None:
        assert s % q_tile == 0 and (q_tile % 8 == 0 or q_tile == s)
        return q_tile
    if s <= target:
        return s
    t = (target // 8) * 8
    while t >= 8:
        if s % t == 0:
            return t
        t -= 8
    return s


def mha_self(x, mask, p, alpha, beta, cos_t, sin_t, heads, q_tile=None):
    B, S, D = x.shape
    dk = D // heads
    tq = _pick_q_tile(S, q_tile)
    nq = S // tq
    kernel = functools.partial(_mha_self_kernel, heads=heads, dk=dk, tq=tq)
    c00 = lambda b, q: (0, 0)
    return pl.pallas_call(
        kernel,
        out_shape=jax.ShapeDtypeStruct((B, S, D), jnp.float32),
        grid=(B, nq),
        in_specs=[
            pl.BlockSpec((1, S, D), lambda b, q: (b, 0, 0)),   # x full (QKV source)
            pl.BlockSpec((1, tq, D), lambda b, q: (b, q, 0)),  # x tile (residual)
            pl.BlockSpec((1, D), c00), pl.BlockSpec((1, D), c00),    # alpha, beta
            pl.BlockSpec((S, dk), c00), pl.BlockSpec((S, dk), c00),  # cos, sin
            pl.BlockSpec((3 * D, D), c00), pl.BlockSpec((1, 3 * D), c00),  # wqkv,bqkv
            pl.BlockSpec((D, D), c00), pl.BlockSpec((1, D), c00),    # wo, bo
            pl.BlockSpec((1, 1, S), lambda b, q: (b, 0, 0)),         # mask
        ],
        out_specs=pl.BlockSpec((1, tq, D), lambda b, q: (b, q, 0)),
        scratch_shapes=[pltpu.VMEM((S, D), jnp.bfloat16),
                        pltpu.VMEM((S, D), jnp.bfloat16),
                        pltpu.VMEM((S, D), jnp.bfloat16)],
        compiler_params=pltpu.CompilerParams(
            dimension_semantics=("parallel", "arbitrary")),
    )(x, x, alpha, beta, cos_t, sin_t,
      p["wqkv"], p["bqkv"], p["wo"], p["bo"], mask)


def mha_cross(x, e, mask, p, alpha, beta, cos_q, sin_q, cos_k, sin_k,
              heads, q_tile=None):
    B, S, D = x.shape
    Sk = e.shape[1]
    dk = D // heads
    tq = _pick_q_tile(S, q_tile)
    nq = S // tq
    kernel = functools.partial(_mha_cross_kernel, heads=heads, dk=dk, tq=tq)
    c00 = lambda b, q: (0, 0)
    return pl.pallas_call(
        kernel,
        out_shape=jax.ShapeDtypeStruct((B, S, D), jnp.float32),
        grid=(B, nq),
        in_specs=[
            pl.BlockSpec((1, S, D), lambda b, q: (b, 0, 0)),   # x full (Q source)
            pl.BlockSpec((1, tq, D), lambda b, q: (b, q, 0)),  # x tile (residual)
            pl.BlockSpec((1, Sk, D), lambda b, q: (b, 0, 0)),  # encoder outputs
            pl.BlockSpec((1, D), c00), pl.BlockSpec((1, D), c00),      # alpha, beta
            pl.BlockSpec((S, dk), c00), pl.BlockSpec((S, dk), c00),    # cos_q, sin_q
            pl.BlockSpec((Sk, dk), c00), pl.BlockSpec((Sk, dk), c00),  # cos_k, sin_k
            pl.BlockSpec((D, D), c00), pl.BlockSpec((1, D), c00),      # wq, bq
            pl.BlockSpec((2 * D, D), c00), pl.BlockSpec((1, 2 * D), c00),  # wkv, bkv
            pl.BlockSpec((D, D), c00), pl.BlockSpec((1, D), c00),      # wo, bo
            pl.BlockSpec((1, 1, Sk), lambda b, q: (b, 0, 0)),          # mask
        ],
        out_specs=pl.BlockSpec((1, tq, D), lambda b, q: (b, q, 0)),
        scratch_shapes=[pltpu.VMEM((S, D), jnp.bfloat16),
                        pltpu.VMEM((Sk, D), jnp.bfloat16),
                        pltpu.VMEM((Sk, D), jnp.bfloat16)],
        compiler_params=pltpu.CompilerParams(
            dimension_semantics=("parallel", "arbitrary")),
    )(x, x, e, alpha, beta, cos_q, sin_q, cos_k, sin_k,
      p["wq"], p["bq"], p["wkv"], p["bkv"], p["wo"], p["bo"], mask)


def ffn_residual(x2d, alpha, beta, w1, b1, w2, b2):
    M, D = x2d.shape
    d_ff = w1.shape[0]
    # Resident-weight path: both bf16 FFN weights stay in VMEM across all M tiles.
    weight_vmem = 2 * (d_ff * D * 2) * 2          # w1 + w2, bf16, double-buffered
    if weight_vmem <= 8 * 1024 * 1024:
        tm = _pick_row_tile(M, target=512)
        return pl.pallas_call(
            _ffn_resident_kernel,
            out_shape=jax.ShapeDtypeStruct((M, D), jnp.float32),
            grid=(M // tm,),
            in_specs=[
                pl.BlockSpec((tm, D), lambda i: (i, 0)),     # x (norm in + residual)
                pl.BlockSpec((1, D), lambda i: (0, 0)),      # alpha
                pl.BlockSpec((1, D), lambda i: (0, 0)),      # beta
                pl.BlockSpec((d_ff, D), lambda i: (0, 0)),   # w1 (resident)
                pl.BlockSpec((1, d_ff), lambda i: (0, 0)),   # b1
                pl.BlockSpec((D, d_ff), lambda i: (0, 0)),   # w2 (resident)
                pl.BlockSpec((1, D), lambda i: (0, 0)),      # b2
            ],
            out_specs=pl.BlockSpec((tm, D), lambda i: (i, 0)),
            compiler_params=pltpu.CompilerParams(
                dimension_semantics=("parallel",)),
        )(x2d, alpha, beta, w1, b1, w2, b2)

    # Tiled fallback: d_ff streamed in chunks with an f32 accumulator.
    tm = _pick_row_tile(M, target=512)
    tk = _pick_ff_tile(d_ff, target=1024)
    grid = (M // tm, d_ff // tk)
    return pl.pallas_call(
        _ffn_kernel,
        out_shape=jax.ShapeDtypeStruct((M, D), jnp.float32),
        grid=grid,
        in_specs=[
            pl.BlockSpec((tm, D), lambda i, k: (i, 0)),
            pl.BlockSpec((1, D), lambda i, k: (0, 0)),
            pl.BlockSpec((1, D), lambda i, k: (0, 0)),
            pl.BlockSpec((tk, D), lambda i, k: (k, 0)),
            pl.BlockSpec((1, tk), lambda i, k: (0, k)),
            pl.BlockSpec((D, tk), lambda i, k: (0, k)),
            pl.BlockSpec((1, D), lambda i, k: (0, 0)),
        ],
        out_specs=pl.BlockSpec((tm, D), lambda i, k: (i, 0)),
        scratch_shapes=[pltpu.VMEM((tm, D), jnp.bfloat16)],
        compiler_params=pltpu.CompilerParams(
            dimension_semantics=("parallel", "arbitrary")),
    )(x2d, alpha, beta, w1, b1, w2, b2)


# ------------------------------ parameter prep -------------------------------

def _rotate_half_perm(D, heads):
    """Per-head output-row permutation: interleaved pairs -> rotate-half layout."""
    dk = D // heads
    half = dk // 2
    j = jnp.arange(dk)
    old = jnp.where(j < half, 2 * j, 2 * (j - half) + 1)
    return (jnp.arange(heads)[:, None] * dk + old[None, :]).reshape(-1)


def prepare_params(params, heads):
    """One-time prep: permute Q/K projection rows to rotate-half layout, fold
    1/sqrt(dk) into wq/bq, fuse QKV (self) / KV (cross) weights, cast matmul
    weights to bf16; biases/norm params stay f32 reshaped to (1, N)."""
    D = params["ff_w1"].shape[1]
    dk = D // heads
    scale = 1.0 / math.sqrt(dk)
    perm = _rotate_half_perm(D, heads)

    def prep_mha(p):
        wq = p["wq"][perm, :] * scale
        bq = p["bq"][perm] * scale
        wk = p["wk"][perm, :]
        bk = p["bk"][perm]
        return dict(
            wqkv=jnp.concatenate([wq, wk, p["wv"]], axis=0).astype(jnp.bfloat16),
            bqkv=jnp.concatenate([bq, bk, p["bv"]]).reshape(1, -1),
            wq=wq.astype(jnp.bfloat16), bq=bq.reshape(1, -1),
            wkv=jnp.concatenate([wk, p["wv"]], axis=0).astype(jnp.bfloat16),
            bkv=jnp.concatenate([bk, p["bv"]]).reshape(1, -1),
            wo=p["wo"].astype(jnp.bfloat16), bo=p["bo"].reshape(1, -1),
        )

    return dict(
        norm1_a=params["norm1_a"].reshape(1, -1), norm1_b=params["norm1_b"].reshape(1, -1),
        norm2_a=params["norm2_a"].reshape(1, -1), norm2_b=params["norm2_b"].reshape(1, -1),
        norm3_a=params["norm3_a"].reshape(1, -1), norm3_b=params["norm3_b"].reshape(1, -1),
        attn1=prep_mha(params["attn1"]),
        attn2=prep_mha(params["attn2"]),
        ff_w1=params["ff_w1"].astype(jnp.bfloat16), ff_b1=params["ff_b1"].reshape(1, -1),
        ff_w2=params["ff_w2"].astype(jnp.bfloat16), ff_b2=params["ff_b2"].reshape(1, -1),
    )


def prepare_rope(cos, sin):
    """Compact rotate-half RoPE tables (L, dk): cos_t = [cos|cos], sin_t = [-sin|sin]."""
    cos_t = jnp.concatenate([cos, cos], axis=-1)
    sin_t = jnp.concatenate([-sin, sin], axis=-1)
    return cos_t, sin_t


# ------------------------------- decoder layer -------------------------------

def decoder_layer(dp, x, e_outputs, src_mask, trg_mask, rope_t, *, heads,
                  q_tile=None):
    cos_t, sin_t = rope_t
    B, S, D = x.shape
    Sk = e_outputs.shape[1]
    x = mha_self(x, trg_mask, dp["attn1"], dp["norm1_a"], dp["norm1_b"],
                 cos_t[:S], sin_t[:S], heads, q_tile)
    x = mha_cross(x, e_outputs, src_mask, dp["attn2"], dp["norm2_a"], dp["norm2_b"],
                  cos_t[:S], sin_t[:S], cos_t[:Sk], sin_t[:Sk], heads, q_tile)
    y = ffn_residual(x.reshape(B * S, D), dp["norm3_a"], dp["norm3_b"],
                     dp["ff_w1"], dp["ff_b1"], dp["ff_w2"], dp["ff_b2"])
    return y.reshape(B, S, D)


# ---------------------------- pure-JAX f32 reference --------------------------

def _ref_norm(x, a, b):
    mean = jnp.mean(x, axis=-1, keepdims=True)
    std = jnp.std(x, axis=-1, ddof=1, keepdims=True)
    return a * (x - mean) / (std + EPS) + b


def _ref_rope(x, cos, sin):
    B, S, H, Dk = x.shape
    c = cos[:S][None, :, None, :]
    s = sin[:S][None, :, None, :]
    x0 = x[..., 0::2]
    x1 = x[..., 1::2]
    y0 = x0 * c - x1 * s
    y1 = x1 * c + x0 * s
    return jnp.stack([y0, y1], axis=-1).reshape(B, S, H, Dk)


def _ref_mha(p, qi, ki, vi, mask, cos, sin, heads):
    B, S, D = qi.shape
    Sk = ki.shape[1]
    dk = D // heads
    q = (qi @ p["wq"].T + p["bq"]).reshape(B, S, heads, dk)
    k = (ki @ p["wk"].T + p["bk"]).reshape(B, Sk, heads, dk)
    v = (vi @ p["wv"].T + p["bv"]).reshape(B, Sk, heads, dk)
    q = _ref_rope(q, cos, sin)
    k = _ref_rope(k, cos, sin)
    q = q.transpose(0, 2, 1, 3)
    k = k.transpose(0, 2, 1, 3)
    v = v.transpose(0, 2, 1, 3)
    scores = jnp.einsum("bhqd,bhkd->bhqk", q, k) / math.sqrt(dk)
    m = mask[:, None, :, :]
    scores = jnp.where(m == 0, -1e9, scores)
    pa = jax.nn.softmax(scores, axis=-1)
    o = jnp.einsum("bhqk,bhkd->bhqd", pa, v)
    concat = o.transpose(0, 2, 1, 3).reshape(B, S, D)
    return concat @ p["wo"].T + p["bo"]


def _ref_decoder(params, x, e_outputs, src_mask, trg_mask, heads, cos, sin):
    x2 = _ref_norm(x, params["norm1_a"], params["norm1_b"])
    x = x + _ref_mha(params["attn1"], x2, x2, x2, trg_mask, cos, sin, heads)
    x2 = _ref_norm(x, params["norm2_a"], params["norm2_b"])
    x = x + _ref_mha(params["attn2"], x2, e_outputs, e_outputs, src_mask, cos, sin, heads)
    x2 = _ref_norm(x, params["norm3_a"], params["norm3_b"])
    h = jnp.maximum(x2 @ params["ff_w1"].T + params["ff_b1"], 0.0)
    x = x + (h @ params["ff_w2"].T + params["ff_b2"])
    return x


# ----------------------------------- main -------------------------------------

def _init_linear(key, out_dim, in_dim, scale=0.05):
    k1, k2 = jax.random.split(key)
    w = jax.random.normal(k1, (out_dim, in_dim), jnp.float32) * scale
    b = jax.random.normal(k2, (out_dim,), jnp.float32) * scale
    return w, b


def _init_mha(key, d_model):
    ks = jax.random.split(key, 4)
    wq, bq = _init_linear(ks[0], d_model, d_model)
    wk, bk = _init_linear(ks[1], d_model, d_model)
    wv, bv = _init_linear(ks[2], d_model, d_model)
    wo, bo = _init_linear(ks[3], d_model, d_model)
    return dict(wq=wq, bq=bq, wk=wk, bk=bk, wv=wv, bv=bv, wo=wo, bo=bo)


if __name__ == "__main__":
    B, S, D, H = 2, 16, 32, 4
    d_ff = 2048                      # FeedForward default
    dk = D // H
    MAX_LEN = 32

    key = jax.random.PRNGKey(0)
    ks = jax.random.split(key, 8)

    x = jax.random.normal(ks[0], (B, S, D), jnp.float32)
    e_outputs = jax.random.normal(ks[1], (B, S, D), jnp.float32)

    # masks: (B, 1, S), int32; 0 -> masked out
    pos = jnp.arange(S)
    trg_lens = jnp.array([16, 11])
    src_lens = jnp.array([13, 16])
    trg_mask = (pos[None, :] < trg_lens[:, None]).astype(jnp.int32)[:, None, :]
    src_mask = (pos[None, :] < src_lens[:, None]).astype(jnp.int32)[:, None, :]

    ff_w1, ff_b1 = _init_linear(ks[2], d_ff, D)
    ff_w2, ff_b2 = _init_linear(ks[3], D, d_ff)
    params = dict(
        norm1_a=jnp.ones((D,), jnp.float32), norm1_b=jnp.zeros((D,), jnp.float32),
        norm2_a=jnp.ones((D,), jnp.float32), norm2_b=jnp.zeros((D,), jnp.float32),
        norm3_a=jnp.ones((D,), jnp.float32), norm3_b=jnp.zeros((D,), jnp.float32),
        attn1=_init_mha(ks[4], D),
        attn2=_init_mha(ks[5], D),
        ff_w1=ff_w1, ff_b1=ff_b1, ff_w2=ff_w2, ff_b2=ff_b2,
    )

    # RoPE cache (matches RotaryEmbedding.build_rope_cache with base=10000)
    theta = 1.0 / (10000.0 ** (jnp.arange(0, dk, 2, dtype=jnp.float32) / dk))
    idx_theta = jnp.arange(MAX_LEN, dtype=jnp.float32)[:, None] * theta[None, :]
    cos, sin = jnp.cos(idx_theta), jnp.sin(idx_theta)

    dev_params = prepare_params(params, H)          # permuted / fused bf16 weights
    rope_t = prepare_rope(cos, sin)                 # compact (L, dk) tables

    # q_tile=8 forces the multi-query-tile path to be exercised at S=16.
    run = jax.jit(functools.partial(decoder_layer, heads=H, q_tile=8))
    out = run(dev_params, x, e_outputs, src_mask, trg_mask, rope_t)
    out = jax.block_until_ready(out)

    with jax.default_matmul_precision("float32"):
        ref = _ref_decoder(params, x, e_outputs, src_mask, trg_mask, H, cos, sin)

    assert out.shape == (B, S, D)
    err = float(jnp.max(jnp.abs(out - ref)))
    assert jnp.allclose(out, ref, rtol=4e-2, atol=4e-2), f"max err {err}"

    print("KERNEL_OK")
</pallas_src>

<mosaic_0001>
module attributes {stable_mosaic.version = 11 : i64} {
  func.func @_mha_self_kernel(%arg0: i32, %arg1: i32, %arg2: memref<1x16x32xf32, #tpu.memory_space<vmem>>, %arg3: memref<1x8x32xf32, #tpu.memory_space<vmem>>, %arg4: memref<1x32xf32, #tpu.memory_space<vmem>>, %arg5: memref<1x32xf32, #tpu.memory_space<vmem>>, %arg6: memref<16x8xf32, #tpu.memory_space<vmem>>, %arg7: memref<16x8xf32, #tpu.memory_space<vmem>>, %arg8: memref<96x32xbf16, #tpu.memory_space<vmem>>, %arg9: memref<1x96xf32, #tpu.memory_space<vmem>>, %arg10: memref<32x32xbf16, #tpu.memory_space<vmem>>, %arg11: memref<1x32xf32, #tpu.memory_space<vmem>>, %arg12: memref<1x1x16xi32, #tpu.memory_space<vmem>>, %arg13: memref<1x8x32xf32, #tpu.memory_space<vmem>>, %arg14: memref<16x32xbf16, #tpu.memory_space<vmem>>, %arg15: memref<16x32xbf16, #tpu.memory_space<vmem>>, %arg16: memref<16x32xbf16, #tpu.memory_space<vmem>>) attributes {dimension_semantics = [#tpu.dimension_semantics<parallel>, #tpu.dimension_semantics<arbitrary>], iteration_bounds = array<i64: 2, 2>, scalar_prefetch = 0 : i64, scratch_operands = 3 : i64, tpu.core_type = #tpu.core_type<tc>, window_params = [{transform_indices = @transform_0, window_bounds = array<i64: 1, 16, 32>}, {transform_indices = @transform_1, window_bounds = array<i64: 1, 8, 32>}, {pipeline_mode = #tpu.pipeline_mode<synchronous>, transform_indices = @transform_2, window_bounds = array<i64: 1, 32>}, {pipeline_mode = #tpu.pipeline_mode<synchronous>, transform_indices = @transform_3, window_bounds = array<i64: 1, 32>}, {pipeline_mode = #tpu.pipeline_mode<synchronous>, transform_indices = @transform_4, window_bounds = array<i64: 16, 8>}, {pipeline_mode = #tpu.pipeline_mode<synchronous>, transform_indices = @transform_5, window_bounds = array<i64: 16, 8>}, {pipeline_mode = #tpu.pipeline_mode<synchronous>, transform_indices = @transform_6, window_bounds = array<i64: 96, 32>}, {pipeline_mode = #tpu.pipeline_mode<synchronous>, transform_indices = @transform_7, window_bounds = array<i64: 1, 96>}, {pipeline_mode = #tpu.pipeline_mode<synchronous>, transform_indices = @transform_8, window_bounds = array<i64: 32, 32>}, {pipeline_mode = #tpu.pipeline_mode<synchronous>, transform_indices = @transform_9, window_bounds = array<i64: 1, 32>}, {transform_indices = @transform_10, window_bounds = array<i64: 1, 1, 16>}, {transform_indices = @transform_11, window_bounds = array<i64: 1, 8, 32>}]} {
    %c0_i32 = arith.constant 0 : i32
    %0 = arith.cmpi eq, %arg1, %c0_i32 : i32
    %1 = arith.extui %0 : i1 to i32
    %c0_i32_0 = arith.constant 0 : i32
    %2 = arith.cmpi ne, %1, %c0_i32_0 : i32
    scf.if %2 {
      %c0_42 = arith.constant 0 : index
      %c0_43 = arith.constant 0 : index
      %c0_44 = arith.constant 0 : index
      %112 = vector.load %arg2[%c0_42, %c0_43, %c0_44] : memref<1x16x32xf32, #tpu.memory_space<vmem>>, vector<1x16x32xf32>
      %113 = vector.shape_cast %112 : vector<1x16x32xf32> to vector<16x32xf32>
      %c0_45 = arith.constant 0 : index
      %c0_46 = arith.constant 0 : index
      %114 = vector.load %arg4[%c0_45, %c0_46] : memref<1x32xf32, #tpu.memory_space<vmem>>, vector<1x32xf32>
      %c0_47 = arith.constant 0 : index
      %c0_48 = arith.constant 0 : index
      %115 = vector.load %arg5[%c0_47, %c0_48] : memref<1x32xf32, #tpu.memory_space<vmem>>, vector<1x32xf32>
      %cst_49 = arith.constant dense<0.000000e+00> : vector<16xf32>
      %116 = vector.multi_reduction <add>, %113, %cst_49 [1] : vector<16x32xf32> to vector<16xf32>
      %117 = vector.shape_cast %116 : vector<16xf32> to vector<16x1xf32>
      %cst_50 = arith.constant 3.200000e+01 : f32
      %118 = vector.broadcast %cst_50 : f32 to vector<16x1xf32>
      %119 = arith.divf %117, %118 : vector<16x1xf32>
      %120 = vector.broadcast %119 : vector<16x1xf32> to vector<16x32xf32>
      %121 = arith.subf %113, %120 : vector<16x32xf32>
      %122 = arith.mulf %121, %121 : vector<16x32xf32>
      %cst_51 = arith.constant dense<0.000000e+00> : vector<16xf32>
      %123 = vector.multi_reduction <add>, %122, %cst_51 [1] : vector<16x32xf32> to vector<16xf32>
      %124 = vector.shape_cast %123 : vector<16xf32> to vector<16x1xf32>
      %cst_52 = arith.constant 3.100000e+01 : f32
      %125 = vector.broadcast %cst_52 : f32 to vector<16x1xf32>
      %126 = arith.divf %124, %125 : vector<16x1xf32>
      %127 = vector.broadcast %114 : vector<1x32xf32> to vector<16x32xf32>
      %128 = arith.mulf %127, %121 : vector<16x32xf32>
      %129 = math.sqrt %126 : vector<16x1xf32>
      %cst_53 = arith.constant 9.99999997E-7 : f32
      %130 = vector.broadcast %cst_53 : f32 to vector<16x1xf32>
      %131 = arith.addf %129, %130 : vector<16x1xf32>
      %132 = vector.broadcast %131 : vector<16x1xf32> to vector<16x32xf32>
      %133 = arith.divf %128, %132 : vector<16x32xf32>
      %134 = vector.broadcast %115 : vector<1x32xf32> to vector<16x32xf32>
      %135 = arith.addf %133, %134 : vector<16x32xf32>
      %136 = arith.truncf %135 : vector<16x32xf32> to vector<16x32xbf16>
      %c0_54 = arith.constant 0 : index
      %c0_55 = arith.constant 0 : index
      %137 = vector.load %arg8[%c0_54, %c0_55] : memref<96x32xbf16, #tpu.memory_space<vmem>>, vector<96x32xbf16>
      %cst_56 = arith.constant dense<0.000000e+00> : vector<16x96xf32>
      %138 = tpu.matmul %136, %137, %cst_56 {dimension_numbers = #tpu.dot_dimension_numbers<[1], [1], [0], [0], [0, 0, 1, 0], [], []>} : vector<16x32xbf16>, vector<96x32xbf16>, vector<16x96xf32> -> vector<16x96xf32>
      %c0_57 = arith.constant 0 : index
      %c0_58 = arith.constant 0 : index
      %139 = vector.load %arg9[%c0_57, %c0_58] : memref<1x96xf32, #tpu.memory_space<vmem>>, vector<1x96xf32>
      %140 = vector.broadcast %139 : vector<1x96xf32> to vector<16x96xf32>
      %141 = arith.addf %138, %140 : vector<16x96xf32>
      %c0_59 = arith.constant 0 : index
      %c0_60 = arith.constant 0 : index
      %142 = vector.load %arg6[%c0_59, %c0_60] : memref<16x8xf32, #tpu.memory_space<vmem>>, vector<16x8xf32>
      %c0_61 = arith.constant 0 : index
      %c0_62 = arith.constant 0 : index
      %143 = vector.load %arg7[%c0_61, %c0_62] : memref<16x8xf32, #tpu.memory_space<vmem>>, vector<16x8xf32>
      %144 = vector.extract_strided_slice %141 {offsets = [0, 0], sizes = [16, 8], strides = [1, 1]} : vector<16x96xf32> to vector<16x8xf32>
      %145 = vector.extract_strided_slice %144 {offsets = [0, 4], sizes = [16, 4], strides = [1, 1]} : vector<16x8xf32> to vector<16x4xf32>
      %146 = vector.extract_strided_slice %144 {offsets = [0, 0], sizes = [16, 4], strides = [1, 1]} : vector<16x8xf32> to vector<16x4xf32>
      %147 = tpu.concatenate %145, %146 in 1 : vector<16x4xf32>, vector<16x4xf32> -> vector<16x8xf32>
      %148 = arith.mulf %144, %142 : vector<16x8xf32>
      %149 = arith.mulf %147, %143 : vector<16x8xf32>
      %150 = arith.addf %148, %149 : vector<16x8xf32>
      %151 = vector.extract_strided_slice %141 {offsets = [0, 32], sizes = [16, 8], strides = [1, 1]} : vector<16x96xf32> to vector<16x8xf32>
      %152 = vector.extract_strided_slice %151 {offsets = [0, 4], sizes = [16, 4], strides = [1, 1]} : vector<16x8xf32> to vector<16x4xf32>
      %153 = vector.extract_strided_slice %151 {offsets = [0, 0], sizes = [16, 4], strides = [1, 1]} : vector<16x8xf32> to vector<16x4xf32>
      %154 = tpu.concatenate %152, %153 in 1 : vector<16x4xf32>, vector<16x4xf32> -> vector<16x8xf32>
      %155 = arith.mulf %151, %142 : vector<16x8xf32>
      %156 = arith.mulf %154, %143 : vector<16x8xf32>
      %157 = arith.addf %155, %156 : vector<16x8xf32>
      %158 = vector.extract_strided_slice %141 {offsets = [0, 8], sizes = [16, 8], strides = [1, 1]} : vector<16x96xf32> to vector<16x8xf32>
      %159 = vector.extract_strided_slice %158 {offsets = [0, 4], sizes = [16, 4], strides = [1, 1]} : vector<16x8xf32> to vector<16x4xf32>
      %160 = vector.extract_strided_slice %158 {offsets = [0, 0], sizes = [16, 4], strides = [1, 1]} : vector<16x8xf32> to vector<16x4xf32>
      %161 = tpu.concatenate %159, %160 in 1 : vector<16x4xf32>, vector<16x4xf32> -> vector<16x8xf32>
      %162 = arith.mulf %158, %142 : vector<16x8xf32>
      %163 = arith.mulf %161, %143 : vector<16x8xf32>
      %164 = arith.addf %162, %163 : vector<16x8xf32>
      %165 = vector.extract_strided_slice %141 {offsets = [0, 40], sizes = [16, 8], strides = [1, 1]} : vector<16x96xf32> to vector<16x8xf32>
      %166 = vector.extract_strided_slice %165 {offsets = [0, 4], sizes = [16, 4], strides = [1, 1]} : vector<16x8xf32> to vector<16x4xf32>
      %167 = vector.extract_strided_slice %165 {offsets = [0, 0], sizes = [16, 4], strides = [1, 1]} : vector<16x8xf32> to vector<16x4xf32>
      %168 = tpu.concatenate %166, %167 in 1 : vector<16x4xf32>, vector<16x4xf32> -> vector<16x8xf32>
      %169 = arith.mulf %165, %142 : vector<16x8xf32>
      %170 = arith.mulf %168, %143 : vector<16x8xf32>
      %171 = arith.addf %169, %170 : vector<16x8xf32>
      %172 = vector.extract_strided_slice %141 {offsets = [0, 16], sizes = [16, 8], strides = [1, 1]} : vector<16x96xf32> to vector<16x8xf32>
      %173 = vector.extract_strided_slice %172 {offsets = [0, 4], sizes = [16, 4], strides = [1, 1]} : vector<16x8xf32> to vector<16x4xf32>
      %174 = vector.extract_strided_slice %172 {offsets = [0, 0], sizes = [16, 4], strides = [1, 1]} : vector<16x8xf32> to vector<16x4xf32>
      %175 = tpu.concatenate %173, %174 in 1 : vector<16x4xf32>, vector<16x4xf32> -> vector<16x8xf32>
      %176 = arith.mulf %172, %142 : vector<16x8xf32>
      %177 = arith.mulf %175, %143 : vector<16x8xf32>
      %178 = arith.addf %176, %177 : vector<16x8xf32>
      %179 = vector.extract_strided_slice %141 {offsets = [0, 48], sizes = [16, 8], strides = [1, 1]} : vector<16x96xf32> to vector<16x8xf32>
      %180 = vector.extract_strided_slice %179 {offsets = [0, 4], sizes = [16, 4], strides = [1, 1]} : vector<16x8xf32> to vector<16x4xf32>
      %181 = vector.extract_strided_slice %179 {offsets = [0, 0], sizes = [16, 4], strides = [1, 1]} : vector<16x8xf32> to vector<16x4xf32>
      %182 = tpu.concatenate %180, %181 in 1 : vector<16x4xf32>, vector<16x4xf32> -> vector<16x8xf32>
      %183 = arith.mulf %179, %142 : vector<16x8xf32>
      %184 = arith.mulf %182, %143 : vector<16x8xf32>
      %185 = arith.addf %183, %184 : vector<16x8xf32>
      %186 = vector.extract_strided_slice %141 {offsets = [0, 24], sizes = [16, 8], strides = [1, 1]} : vector<16x96xf32> to vector<16x8xf32>
      %187 = vector.extract_strided_slice %186 {offsets = [0, 4], sizes = [16, 4], strides = [1, 1]} : vector<16x8xf32> to vector<16x4xf32>
      %188 = vector.extract_strided_slice %186 {offsets = [0, 0], sizes = [16, 4], strides = [1, 1]} : vector<16x8xf32> to vector<16x4xf32>
      %189 = tpu.concatenate %187, %188 in 1 : vector<16x4xf32>, vector<16x4xf32> -> vector<16x8xf32>
      %190 = arith.mulf %186, %142 : vector<16x8xf32>
      %191 = arith.mulf %189, %143 : vector<16x8xf32>
      %192 = arith.addf %190, %191 : vector<16x8xf32>
      %193 = vector.extract_strided_slice %141 {offsets = [0, 56], sizes = [16, 8], strides = [1, 1]} : vector<16x96xf32> to vector<16x8xf32>
      %194 = vector.extract_strided_slice %193 {offsets = [0, 4], sizes = [16, 4], strides = [1, 1]} : vector<16x8xf32> to vector<16x4xf32>
      %195 = vector.extract_strided_slice %193 {offsets = [0, 0], sizes = [16, 4], strides = [1, 1]} : vector<16x8xf32> to vector<16x4xf32>
      %196 = tpu.concatenate %194, %195 in 1 : vector<16x4xf32>, vector<16x4xf32> -> vector<16x8xf32>
      %197 = arith.mulf %193, %142 : vector<16x8xf32>
      %198 = arith.mulf %196, %143 : vector<16x8xf32>
      %199 = arith.addf %197, %198 : vector<16x8xf32>
      %200 = tpu.concatenate %150, %164, %178, %192 in 1 : vector<16x8xf32>, vector<16x8xf32>, vector<16x8xf32>, vector<16x8xf32> -> vector<16x32xf32>
      %201 = arith.truncf %200 : vector<16x32xf32> to vector<16x32xbf16>
      %c0_63 = arith.constant 0 : index
      %c0_64 = arith.constant 0 : index
      %202 = vector.load %arg14[%c0_63, %c0_64] : memref<16x32xbf16, #tpu.memory_space<vmem>>, vector<16x32xbf16>
      tpu.vector_store %arg14[%c0_63, %c0_64], %201 {strides = array<i32>} : memref<16x32xbf16, #tpu.memory_space<vmem>>, vector<16x32xbf16>,
      %203 = tpu.concatenate %157, %171, %185, %199 in 1 : vector<16x8xf32>, vector<16x8xf32>, vector<16x8xf32>, vector<16x8xf32> -> vector<16x32xf32>
      %204 = arith.truncf %203 : vector<16x32xf32> to vector<16x32xbf16>
      %c0_65 = arith.constant 0 : index
      %c0_66 = arith.constant 0 : index
      %205 = vector.load %arg15[%c0_65, %c0_66] : memref<16x32xbf16, #tpu.memory_space<vmem>>, vector<16x32xbf16>
      tpu.vector_store %arg15[%c0_65, %c0_66], %204 {strides = array<i32>} : memref<16x32xbf16, #tpu.memory_space<vmem>>, vector<16x32xbf16>,
      %206 = vector.extract_strided_slice %141 {offsets = [0, 64], sizes = [16, 32], strides = [1, 1]} : vector<16x96xf32> to vector<16x32xf32>
      %207 = arith.truncf %206 : vector<16x32xf32> to vector<16x32xbf16>
      %c0_67 = arith.constant 0 : index
      %c0_68 = arith.constant 0 : index
      %208 = vector.load %arg16[%c0_67, %c0_68] : memref<16x32xbf16, #tpu.memory_space<vmem>>, vector<16x32xbf16>
      tpu.vector_store %arg16[%c0_67, %c0_68], %207 {strides = array<i32>} : memref<16x32xbf16, #tpu.memory_space<vmem>>, vector<16x32xbf16>,
    } else {
    }
    %c8_i32 = arith.constant 8 : i32
    %3 = arith.muli %arg1, %c8_i32 : i32
    %4 = tpu.assume_multiple %3, 8 : i32
    %c0 = arith.constant 0 : index
    %c0_1 = arith.constant 0 : index
    %c0_2 = arith.constant 0 : index
    %5 = vector.load %arg12[%c0, %c0_1, %c0_2] : memref<1x1x16xi32, #tpu.memory_space<vmem>>, vector<1x1x16xi32>
    %6 = vector.shape_cast %5 : vector<1x1x16xi32> to vector<1x16xi32>
    %c0_3 = arith.constant 0 : index
    %c0_4 = arith.constant 0 : index
    %c0_5 = arith.constant 0 : index
    %7 = vector.load %arg3[%c0_3, %c0_4, %c0_5] : memref<1x8x32xf32, #tpu.memory_space<vmem>>, vector<1x8x32xf32>
    %8 = vector.shape_cast %7 : vector<1x8x32xf32> to vector<8x32xf32>
    %9 = arith.index_cast %4 : i32 to index
    %c0_6 = arith.constant 0 : index
    %10 = vector.load %arg14[%9, %c0_6] : memref<16x32xbf16, #tpu.memory_space<vmem>>, vector<8x32xbf16>
    %c0_7 = arith.constant 0 : index
    %c0_8 = arith.constant 0 : index
    %11 = vector.load %arg15[%c0_7, %c0_8] : memref<16x32xbf16, #tpu.memory_space<vmem>>, vector<16x32xbf16>
    %c0_9 = arith.constant 0 : index
    %c0_10 = arith.constant 0 : index
    %12 = vector.load %arg16[%c0_9, %c0_10] : memref<16x32xbf16, #tpu.memory_space<vmem>>, vector<16x32xbf16>
    %13 = vector.extract_strided_slice %10 {offsets = [0, 0], sizes = [8, 8], strides = [1, 1]} : vector<8x32xbf16> to vector<8x8xbf16>
    %14 = vector.extract_strided_slice %11 {offsets = [0, 0], sizes = [16, 8], strides = [1, 1]} : vector<16x32xbf16> to vector<16x8xbf16>
    %15 = vector.extract_strided_slice %12 {offsets = [0, 0], sizes = [16, 8], strides = [1, 1]} : vector<16x32xbf16> to vector<16x8xbf16>
    %cst = arith.constant dense<0.000000e+00> : vector<8x16xf32>
    %16 = tpu.matmul %13, %14, %cst {dimension_numbers = #tpu.dot_dimension_numbers<[1], [1], [0], [0], [0, 0, 1, 0], [], []>} : vector<8x8xbf16>, vector<16x8xbf16>, vector<8x16xf32> -> vector<8x16xf32>
    %c0_i32_11 = arith.constant 0 : i32
    %17 = vector.broadcast %c0_i32_11 : i32 to vector<1x16xi32>
    %18 = arith.cmpi eq, %6, %17 : vector<1x16xi32>
    %cst_12 = arith.constant -1.000000e+09 : f32
    %19 = vector.shape_cast %18 : vector<1x16xi1> to vector<1x16xi1>
    %20 = vector.broadcast %19 : vector<1x16xi1> to vector<8x16xi1>
    %21 = vector.broadcast %cst_12 : f32 to vector<8x16xf32>
    %22 = arith.select %20, %21, %16 : vector<8x16xi1>, vector<8x16xf32>
    %cst_13 = arith.constant dense<0xFF800000> : vector<8xf32>
    %23 = vector.multi_reduction <maximumf>, %22, %cst_13 [1] : vector<8x16xf32> to vector<8xf32>
    %24 = vector.shape_cast %23 : vector<8xf32> to vector<8x1xf32>
    %25 = vector.broadcast %24 : vector<8x1xf32> to vector<8x16xf32>
    %26 = arith.subf %22, %25 : vector<8x16xf32>
    %27 = math.exp %26 : vector<8x16xf32>
    %cst_14 = arith.constant dense<0.000000e+00> : vector<8xf32>
    %28 = vector.multi_reduction <add>, %27, %cst_14 [1] : vector<8x16xf32> to vector<8xf32>
    %29 = vector.shape_cast %28 : vector<8xf32> to vector<8x1xf32>
    %30 = tpu.reciprocal %29 {approx = true} : vector<8x1xf32> -> vector<8x1xf32>
    %31 = vector.broadcast %30 : vector<8x1xf32> to vector<8x16xf32>
    %32 = arith.mulf %27, %31 : vector<8x16xf32>
    %33 = arith.truncf %32 : vector<8x16xf32> to vector<8x16xbf16>
    %cst_15 = arith.constant dense<0.000000e+00> : vector<8x8xf32>
    %34 = tpu.matmul %33, %15, %cst_15 {dimension_numbers = #tpu.dot_dimension_numbers<[1], [0], [0], [1], [0, 0, 1, 1], [], []>} : vector<8x16xbf16>, vector<16x8xbf16>, vector<8x8xf32> -> vector<8x8xf32>
    %35 = vector.extract_strided_slice %10 {offsets = [0, 8], sizes = [8, 8], strides = [1, 1]} : vector<8x32xbf16> to vector<8x8xbf16>
    %36 = vector.extract_strided_slice %11 {offsets = [0, 8], sizes = [16, 8], strides = [1, 1]} : vector<16x32xbf16> to vector<16x8xbf16>
    %37 = vector.extract_strided_slice %12 {offsets = [0, 8], sizes = [16, 8], strides = [1, 1]} : vector<16x32xbf16> to vector<16x8xbf16>
    %cst_16 = arith.constant dense<0.000000e+00> : vector<8x16xf32>
    %38 = tpu.matmul %35, %36, %cst_16 {dimension_numbers = #tpu.dot_dimension_numbers<[1], [1], [0], [0], [0, 0, 1, 0], [], []>} : vector<8x8xbf16>, vector<16x8xbf16>, vector<8x16xf32> -> vector<8x16xf32>
    %c0_i32_17 = arith.constant 0 : i32
    %39 = vector.broadcast %c0_i32_17 : i32 to vector<1x16xi32>
    %40 = arith.cmpi eq, %6, %39 : vector<1x16xi32>
    %cst_18 = arith.constant -1.000000e+09 : f32
    %41 = vector.shape_cast %40 : vector<1x16xi1> to vector<1x16xi1>
    %42 = vector.broadcast %41 : vector<1x16xi1> to vector<8x16xi1>
    %43 = vector.broadcast %cst_18 : f32 to vector<8x16xf32>
    %44 = arith.select %42, %43, %38 : vector<8x16xi1>, vector<8x16xf32>
    %cst_19 = arith.constant dense<0xFF800000> : vector<8xf32>
    %45 = vector.multi_reduction <maximumf>, %44, %cst_19 [1] : vector<8x16xf32> to vector<8xf32>
    %46 = vector.shape_cast %45 : vector<8xf32> to vector<8x1xf32>
    %47 = vector.broadcast %46 : vector<8x1xf32> to vector<8x16xf32>
    %48 = arith.subf %44, %47 : vector<8x16xf32>
    %49 = math.exp %48 : vector<8x16xf32>
    %cst_20 = arith.constant dense<0.000000e+00> : vector<8xf32>
    %50 = vector.multi_reduction <add>, %49, %cst_20 [1] : vector<8x16xf32> to vector<8xf32>
    %51 = vector.shape_cast %50 : vector<8xf32> to vector<8x1xf32>
    %52 = tpu.reciprocal %51 {approx = true} : vector<8x1xf32> -> vector<8x1xf32>
    %53 = vector.broadcast %52 : vector<8x1xf32> to vector<8x16xf32>
    %54 = arith.mulf %49, %53 : vector<8x16xf32>
    %55 = arith.truncf %54 : vector<8x16xf32> to vector<8x16xbf16>
    %cst_21 = arith.constant dense<0.000000e+00> : vector<8x8xf32>
    %56 = tpu.matmul %55, %37, %cst_21 {dimension_numbers = #tpu.dot_dimension_numbers<[1], [0], [0], [1], [0, 0, 1, 1], [], []>} : vector<8x16xbf16>, vector<16x8xbf16>, vector<8x8xf32> -> vector<8x8xf32>
    %57 = vector.extract_strided_slice %10 {offsets = [0, 16], sizes = [8, 8], strides = [1, 1]} : vector<8x32xbf16> to vector<8x8xbf16>
    %58 = vector.extract_strided_slice %11 {offsets = [0, 16], sizes = [16, 8], strides = [1, 1]} : vector<16x32xbf16> to vector<16x8xbf16>
    %59 = vector.extract_strided_slice %12 {offsets = [0, 16], sizes = [16, 8], strides = [1, 1]} : vector<16x32xbf16> to vector<16x8xbf16>
    %cst_22 = arith.constant dense<0.000000e+00> : vector<8x16xf32>
    %60 = tpu.matmul %57, %58, %cst_22 {dimension_numbers = #tpu.dot_dimension_numbers<[1], [1], [0], [0], [0, 0, 1, 0], [], []>} : vector<8x8xbf16>, vector<16x8xbf16>, vector<8x16xf32> -> vector<8x16xf32>
    %c0_i32_23 = arith.constant 0 : i32
    %61 = vector.broadcast %c0_i32_23 : i32 to vector<1x16xi32>
    %62 = arith.cmpi eq, %6, %61 : vector<1x16xi32>
    %cst_24 = arith.constant -1.000000e+09 : f32
    %63 = vector.shape_cast %62 : vector<1x16xi1> to vector<1x16xi1>
    %64 = vector.broadcast %63 : vector<1x16xi1> to vector<8x16xi1>
    %65 = vector.broadcast %cst_24 : f32 to vector<8x16xf32>
    %66 = arith.select %64, %65, %60 : vector<8x16xi1>, vector<8x16xf32>
    %cst_25 = arith.constant dense<0xFF800000> : vector<8xf32>
    %67 = vector.multi_reduction <maximumf>, %66, %cst_25 [1] : vector<8x16xf32> to vector<8xf32>
    %68 = vector.shape_cast %67 : vector<8xf32> to vector<8x1xf32>
    %69 = vector.broadcast %68 : vector<8x1xf32> to vector<8x16xf32>
    %70 = arith.subf %66, %69 : vector<8x16xf32>
    %71 = math.exp %70 : vector<8x16xf32>
    %cst_26 = arith.constant dense<0.000000e+00> : vector<8xf32>
    %72 = vector.multi_reduction <add>, %71, %cst_26 [1] : vector<8x16xf32> to vector<8xf32>
    %73 = vector.shape_cast %72 : vector<8xf32> to vector<8x1xf32>
    %74 = tpu.reciprocal %73 {approx = true} : vector<8x1xf32> -> vector<8x1xf32>
    %75 = vector.broadcast %74 : vector<8x1xf32> to vector<8x16xf32>
    %76 = arith.mulf %71, %75 : vector<8x16xf32>
    %77 = arith.truncf %76 : vector<8x16xf32> to vector<8x16xbf16>
    %cst_27 = arith.constant dense<0.000000e+00> : vector<8x8xf32>
    %78 = tpu.matmul %77, %59, %cst_27 {dimension_numbers = #tpu.dot_dimension_numbers<[1], [0], [0], [1], [0, 0, 1, 1], [], []>} : vector<8x16xbf16>, vector<16x8xbf16>, vector<8x8xf32> -> vector<8x8xf32>
    %79 = vector.extract_strided_slice %10 {offsets = [0, 24], sizes = [8, 8], strides = [1, 1]} : vector<8x32xbf16> to vector<8x8xbf16>
    %80 = vector.extract_strided_slice %11 {offsets = [0, 24], sizes = [16, 8], strides = [1, 1]} : vector<16x32xbf16> to vector<16x8xbf16>
    %81 = vector.extract_strided_slice %12 {offsets = [0, 24], sizes = [16, 8], strides = [1, 1]} : vector<16x32xbf16> to vector<16x8xbf16>
    %cst_28 = arith.constant dense<0.000000e+00> : vector<8x16xf32>
    %82 = tpu.matmul %79, %80, %cst_28 {dimension_numbers = #tpu.dot_dimension_numbers<[1], [1], [0], [0], [0, 0, 1, 0], [], []>} : vector<8x8xbf16>, vector<16x8xbf16>, vector<8x16xf32> -> vector<8x16xf32>
    %c0_i32_29 = arith.constant 0 : i32
    %83 = vector.broadcast %c0_i32_29 : i32 to vector<1x16xi32>
    %84 = arith.cmpi eq, %6, %83 : vector<1x16xi32>
    %cst_30 = arith.constant -1.000000e+09 : f32
    %85 = vector.shape_cast %84 : vector<1x16xi1> to vector<1x16xi1>
    %86 = vector.broadcast %85 : vector<1x16xi1> to vector<8x16xi1>
    %87 = vector.broadcast %cst_30 : f32 to vector<8x16xf32>
    %88 = arith.select %86, %87, %82 : vector<8x16xi1>, vector<8x16xf32>
    %cst_31 = arith.constant dense<0xFF800000> : vector<8xf32>
    %89 = vector.multi_reduction <maximumf>, %88, %cst_31 [1] : vector<8x16xf32> to vector<8xf32>
    %90 = vector.shape_cast %89 : vector<8xf32> to vector<8x1xf32>
    %91 = vector.broadcast %90 : vector<8x1xf32> to vector<8x16xf32>
    %92 = arith.subf %88, %91 : vector<8x16xf32>
    %93 = math.exp %92 : vector<8x16xf32>
    %cst_32 = arith.constant dense<0.000000e+00> : vector<8xf32>
    %94 = vector.multi_reduction <add>, %93, %cst_32 [1] : vector<8x16xf32> to vector<8xf32>
    %95 = vector.shape_cast %94 : vector<8xf32> to vector<8x1xf32>
    %96 = tpu.reciprocal %95 {approx = true} : vector<8x1xf32> -> vector<8x1xf32>
    %97 = vector.broadcast %96 : vector<8x1xf32> to vector<8x16xf32>
    %98 = arith.mulf %93, %97 : vector<8x16xf32>
    %99 = arith.truncf %98 : vector<8x16xf32> to vector<8x16xbf16>
    %cst_33 = arith.constant dense<0.000000e+00> : vector<8x8xf32>
    %100 = tpu.matmul %99, %81, %cst_33 {dimension_numbers = #tpu.dot_dimension_numbers<[1], [0], [0], [1], [0, 0, 1, 1], [], []>} : vector<8x16xbf16>, vector<16x8xbf16>, vector<8x8xf32> -> vector<8x8xf32>
    %101 = tpu.concatenate %34, %56, %78, %100 in 1 : vector<8x8xf32>, vector<8x8xf32>, vector<8x8xf32>, vector<8x8xf32> -> vector<8x32xf32>
    %102 = arith.truncf %101 : vector<8x32xf32> to vector<8x32xbf16>
    %c0_34 = arith.constant 0 : index
    %c0_35 = arith.constant 0 : index
    %103 = vector.load %arg10[%c0_34, %c0_35] : memref<32x32xbf16, #tpu.memory_space<vmem>>, vector<32x32xbf16>
    %cst_36 = arith.constant dense<0.000000e+00> : vector<8x32xf32>
    %104 = tpu.matmul %102, %103, %cst_36 {dimension_numbers = #tpu.dot_dimension_numbers<[1], [1], [0], [0], [0, 0, 1, 0], [], []>} : vector<8x32xbf16>, vector<32x32xbf16>, vector<8x32xf32> -> vector<8x32xf32>
    %c0_37 = arith.constant 0 : index
    %c0_38 = arith.constant 0 : index
    %105 = vector.load %arg11[%c0_37, %c0_38] : memref<1x32xf32, #tpu.memory_space<vmem>>, vector<1x32xf32>
    %106 = vector.broadcast %105 : vector<1x32xf32> to vector<8x32xf32>
    %107 = arith.addf %104, %106 : vector<8x32xf32>
    %108 = arith.addf %8, %107 : vector<8x32xf32>
    %c0_39 = arith.constant 0 : index
    %c0_40 = arith.constant 0 : index
    %c0_41 = arith.constant 0 : index
    %109 = vector.load %arg13[%c0_39, %c0_40, %c0_41] : memref<1x8x32xf32, #tpu.memory_space<vmem>>, vector<1x8x32xf32>
    %110 = vector.shape_cast %109 : vector<1x8x32xf32> to vector<8x32xf32>
    %111 = vector.shape_cast %108 : vector<8x32xf32> to vector<1x8x32xf32>
    tpu.vector_store %arg13[%c0_39, %c0_40, %c0_41], %111 {strides = array<i32>} : memref<1x8x32xf32, #tpu.memory_space<vmem>>, vector<1x8x32xf32>,
    return
  }
  func.func @transform_0(%arg0: i32, %arg1: i32) -> (i32, i32, i32) {
    %c0_i32 = arith.constant 0 : i32
    %c0_i32_0 = arith.constant 0 : i32
    %c0_i32_1 = arith.constant 0 : i32
    return %arg0, %c0_i32, %c0_i32_0 : i32, i32, i32
  }
  func.func @transform_1(%arg0: i32, %arg1: i32) -> (i32, i32, i32) {
    %c0_i32 = arith.constant 0 : i32
    %c0_i32_0 = arith.constant 0 : i32
    return %arg0, %arg1, %c0_i32 : i32, i32, i32
  }
  func.func @transform_2(%arg0: i32, %arg1: i32) -> (i32, i32) {
    %c0_i32 = arith.constant 0 : i32
    %c0_i32_0 = arith.constant 0 : i32
    %c0_i32_1 = arith.constant 0 : i32
    return %c0_i32, %c0_i32_0 : i32, i32
  }
  func.func @transform_3(%arg0: i32, %arg1: i32) -> (i32, i32) {
    %c0_i32 = arith.constant 0 : i32
    %c0_i32_0 = arith.constant 0 : i32
    %c0_i32_1 = arith.constant 0 : i32
    return %c0_i32, %c0_i32_0 : i32, i32
  }
  func.func @transform_4(%arg0: i32, %arg1: i32) -> (i32, i32) {
    %c0_i32 = arith.constant 0 : i32
    %c0_i32_0 = arith.constant 0 : i32
    %c0_i32_1 = arith.constant 0 : i32
    return %c0_i32, %c0_i32_0 : i32, i32
  }
  func.func @transform_5(%arg0: i32, %arg1: i32) -> (i32, i32) {
    %c0_i32 = arith.constant 0 : i32
    %c0_i32_0 = arith.constant 0 : i32
    %c0_i32_1 = arith.constant 0 : i32
    return %c0_i32, %c0_i32_0 : i32, i32
  }
  func.func @transform_6(%arg0: i32, %arg1: i32) -> (i32, i32) {
    %c0_i32 = arith.constant 0 : i32
    %c0_i32_0 = arith.constant 0 : i32
    %c0_i32_1 = arith.constant 0 : i32
    return %c0_i32, %c0_i32_0 : i32, i32
  }
  func.func @transform_7(%arg0: i32, %arg1: i32) -> (i32, i32) {
    %c0_i32 = arith.constant 0 : i32
    %c0_i32_0 = arith.constant 0 : i32
    %c0_i32_1 = arith.constant 0 : i32
    return %c0_i32, %c0_i32_0 : i32, i32
  }
  func.func @transform_8(%arg0: i32, %arg1: i32) -> (i32, i32) {
    %c0_i32 = arith.constant 0 : i32
    %c0_i32_0 = arith.constant 0 : i32
    %c0_i32_1 = arith.constant 0 : i32
    return %c0_i32, %c0_i32_0 : i32, i32
  }
  func.func @transform_9(%arg0: i32, %arg1: i32) -> (i32, i32) {
    %c0_i32 = arith.constant 0 : i32
    %c0_i32_0 = arith.constant 0 : i32
    %c0_i32_1 = arith.constant 0 : i32
    return %c0_i32, %c0_i32_0 : i32, i32
  }
  func.func @transform_10(%arg0: i32, %arg1: i32) -> (i32, i32, i32) {
    %c0_i32 = arith.constant 0 : i32
    %c0_i32_0 = arith.constant 0 : i32
    %c0_i32_1 = arith.constant 0 : i32
    return %arg0, %c0_i32, %c0_i32_0 : i32, i32, i32
  }
  func.func @transform_11(%arg0: i32, %arg1: i32) -> (i32, i32, i32) {
    %c0_i32 = arith.constant 0 : i32
    %c0_i32_0 = arith.constant 0 : i32
    return %arg0, %arg1, %c0_i32 : i32, i32, i32
  }
}

module attributes {stable_mosaic.version = 11 : i64} {
  func.func @_ffn_resident_kernel(%arg0: i32, %arg1: memref<32x32xf32, #tpu.memory_space<vmem>>, %arg2: memref<1x32xf32, #tpu.memory_space<vmem>>, %arg3: memref<1x32xf32, #tpu.memory_space<vmem>>, %arg4: memref<2048x32xbf16, #tpu.memory_space<vmem>>, %arg5: memref<1x2048xf32, #tpu.memory_space<vmem>>, %arg6: memref<32x2048xbf16, #tpu.memory_space<vmem>>, %arg7: memref<1x32xf32, #tpu.memory_space<vmem>>, %arg8: memref<32x32xf32, #tpu.memory_space<vmem>>) attributes {dimension_semantics = [#tpu.dimension_semantics<parallel>], iteration_bounds = array<i64: 1>, scalar_prefetch = 0 : i64, scratch_operands = 0 : i64, tpu.core_type = #tpu.core_type<tc>, window_params = [{transform_indices = @transform_0, window_bounds = array<i64: 32, 32>}, {pipeline_mode = #tpu.pipeline_mode<synchronous>, transform_indices = @transform_1, window_bounds = array<i64: 1, 32>}, {pipeline_mode = #tpu.pipeline_mode<synchronous>, transform_indices = @transform_2, window_bounds = array<i64: 1, 32>}, {pipeline_mode = #tpu.pipeline_mode<synchronous>, transform_indices = @transform_3, window_bounds = array<i64: 2048, 32>}, {pipeline_mode = #tpu.pipeline_mode<synchronous>, transform_indices = @transform_4, window_bounds = array<i64: 1, 2048>}, {pipeline_mode = #tpu.pipeline_mode<synchronous>, transform_indices = @transform_5, window_bounds = array<i64: 32, 2048>}, {pipeline_mode = #tpu.pipeline_mode<synchronous>, transform_indices = @transform_6, window_bounds = array<i64: 1, 32>}, {transform_indices = @transform_7, window_bounds = array<i64: 32, 32>}]} {
    %c0 = arith.constant 0 : index
    %c0_0 = arith.constant 0 : index
    %0 = vector.load %arg1[%c0, %c0_0] : memref<32x32xf32, #tpu.memory_space<vmem>>, vector<32x32xf32>
    %c0_1 = arith.constant 0 : index
    %c0_2 = arith.constant 0 : index
    %1 = vector.load %arg2[%c0_1, %c0_2] : memref<1x32xf32, #tpu.memory_space<vmem>>, vector<1x32xf32>
    %c0_3 = arith.constant 0 : index
    %c0_4 = arith.constant 0 : index
    %2 = vector.load %arg3[%c0_3, %c0_4] : memref<1x32xf32, #tpu.memory_space<vmem>>, vector<1x32xf32>
    %cst = arith.constant dense<0.000000e+00> : vector<32xf32>
    %3 = vector.multi_reduction <add>, %0, %cst [1] : vector<32x32xf32> to vector<32xf32>
    %4 = vector.shape_cast %3 : vector<32xf32> to vector<32x1xf32>
    %cst_5 = arith.constant 3.200000e+01 : f32
    %5 = vector.broadcast %cst_5 : f32 to vector<32x1xf32>
    %6 = arith.divf %4, %5 : vector<32x1xf32>
    %7 = vector.broadcast %6 : vector<32x1xf32> to vector<32x32xf32>
    %8 = arith.subf %0, %7 : vector<32x32xf32>
    %9 = arith.mulf %8, %8 : vector<32x32xf32>
    %cst_6 = arith.constant dense<0.000000e+00> : vector<32xf32>
    %10 = vector.multi_reduction <add>, %9, %cst_6 [1] : vector<32x32xf32> to vector<32xf32>
    %11 = vector.shape_cast %10 : vector<32xf32> to vector<32x1xf32>
    %cst_7 = arith.constant 3.100000e+01 : f32
    %12 = vector.broadcast %cst_7 : f32 to vector<32x1xf32>
    %13 = arith.divf %11, %12 : vector<32x1xf32>
    %14 = vector.broadcast %1 : vector<1x32xf32> to vector<32x32xf32>
    %15 = arith.mulf %14, %8 : vector<32x32xf32>
    %16 = math.sqrt %13 : vector<32x1xf32>
    %cst_8 = arith.constant 9.99999997E-7 : f32
    %17 = vector.broadcast %cst_8 : f32 to vector<32x1xf32>
    %18 = arith.addf %16, %17 : vector<32x1xf32>
    %19 = vector.broadcast %18 : vector<32x1xf32> to vector<32x32xf32>
    %20 = arith.divf %15, %19 : vector<32x32xf32>
    %21 = vector.broadcast %2 : vector<1x32xf32> to vector<32x32xf32>
    %22 = arith.addf %20, %21 : vector<32x32xf32>
    %23 = arith.truncf %22 : vector<32x32xf32> to vector<32x32xbf16>
    %c0_9 = arith.constant 0 : index
    %c0_10 = arith.constant 0 : index
    %24 = vector.load %arg4[%c0_9, %c0_10] : memref<2048x32xbf16, #tpu.memory_space<vmem>>, vector<2048x32xbf16>
    %cst_11 = arith.constant dense<0.000000e+00> : vector<32x2048xf32>
    %25 = tpu.matmul %23, %24, %cst_11 {dimension_numbers = #tpu.dot_dimension_numbers<[1], [1], [0], [0], [0, 0, 1, 0], [], []>} : vector<32x32xbf16>, vector<2048x32xbf16>, vector<32x2048xf32> -> vector<32x2048xf32>
    %c0_12 = arith.constant 0 : index
    %c0_13 = arith.constant 0 : index
    %26 = vector.load %arg5[%c0_12, %c0_13] : memref<1x2048xf32, #tpu.memory_space<vmem>>, vector<1x2048xf32>
    %27 = vector.broadcast %26 : vector<1x2048xf32> to vector<32x2048xf32>
    %28 = arith.addf %25, %27 : vector<32x2048xf32>
    %cst_14 = arith.constant 0.000000e+00 : f32
    %29 = vector.broadcast %cst_14 : f32 to vector<32x2048xf32>
    %30 = arith.maximumf %28, %29 : vector<32x2048xf32>
    %31 = arith.truncf %30 : vector<32x2048xf32> to vector<32x2048xbf16>
    %c0_15 = arith.constant 0 : index
    %c0_16 = arith.constant 0 : index
    %32 = vector.load %arg6[%c0_15, %c0_16] : memref<32x2048xbf16, #tpu.memory_space<vmem>>, vector<32x2048xbf16>
    %cst_17 = arith.constant dense<0.000000e+00> : vector<32x32xf32>
    %33 = tpu.matmul %31, %32, %cst_17 {dimension_numbers = #tpu.dot_dimension_numbers<[1], [1], [0], [0], [0, 0, 1, 0], [], []>} : vector<32x2048xbf16>, vector<32x2048xbf16>, vector<32x32xf32> -> vector<32x32xf32>
    %34 = arith.addf %0, %33 : vector<32x32xf32>
    %c0_18 = arith.constant 0 : index
    %c0_19 = arith.constant 0 : index
    %35 = vector.load %arg7[%c0_18, %c0_19] : memref<1x32xf32, #tpu.memory_space<vmem>>, vector<1x32xf32>
    %36 = vector.broadcast %35 : vector<1x32xf32> to vector<32x32xf32>
    %37 = arith.addf %34, %36 : vector<32x32xf32>
    %c0_20 = arith.constant 0 : index
    %c0_21 = arith.constant 0 : index
    %38 = vector.load %arg8[%c0_20, %c0_21] : memref<32x32xf32, #tpu.memory_space<vmem>>, vector<32x32xf32>
    tpu.vector_store %arg8[%c0_20, %c0_21], %37 {strides = array<i32>} : memref<32x32xf32, #tpu.memory_space<vmem>>, vector<32x32xf32>,
    return
  }
  func.func @transform_0(%arg0: i32) -> (i32, i32) {
    %c0_i32 = arith.constant 0 : i32
    %c0_i32_0 = arith.constant 0 : i32
    return %arg0, %c0_i32 : i32, i32
  }
  func.func @transform_1(%arg0: i32) -> (i32, i32) {
    %c0_i32 = arith.constant 0 : i32
    %c0_i32_0 = arith.constant 0 : i32
    %c0_i32_1 = arith.constant 0 : i32
    return %c0_i32, %c0_i32_0 : i32, i32
  }
  func.func @transform_2(%arg0: i32) -> (i32, i32) {
    %c0_i32 = arith.constant 0 : i32
    %c0_i32_0 = arith.constant 0 : i32
    %c0_i32_1 = arith.constant 0 : i32
    return %c0_i32, %c0_i32_0 : i32, i32
  }
  func.func @transform_3(%arg0: i32) -> (i32, i32) {
    %c0_i32 = arith.constant 0 : i32
    %c0_i32_0 = arith.constant 0 : i32
    %c0_i32_1 = arith.constant 0 : i32
    return %c0_i32, %c0_i32_0 : i32, i32
  }
  func.func @transform_4(%arg0: i32) -> (i32, i32) {
    %c0_i32 = arith.constant 0 : i32
    %c0_i32_0 = arith.constant 0 : i32
    %c0_i32_1 = arith.constant 0 : i32
    return %c0_i32, %c0_i32_0 : i32, i32
  }
  func.func @transform_5(%arg0: i32) -> (i32, i32) {
    %c0_i32 = arith.constant 0 : i32
    %c0_i32_0 = arith.constant 0 : i32
    %c0_i32_1 = arith.constant 0 : i32
    return %c0_i32, %c0_i32_0 : i32, i32
  }
  func.func @transform_6(%arg0: i32) -> (i32, i32) {
    %c0_i32 = arith.constant 0 : i32
    %c0_i32_0 = arith.constant 0 : i32
    %c0_i32_1 = arith.constant 0 : i32
    return %c0_i32, %c0_i32_0 : i32, i32
  }
  func.func @transform_7(%arg0: i32) -> (i32, i32) {
    %c0_i32 = arith.constant 0 : i32
    %c0_i32_0 = arith.constant 0 : i32
    return %arg0, %c0_i32 : i32, i32
  }
}

module attributes {stable_mosaic.version = 11 : i64} {
  func.func @_mha_cross_kernel(%arg0: i32, %arg1: i32, %arg2: memref<1x16x32xf32, #tpu.memory_space<vmem>>, %arg3: memref<1x8x32xf32, #tpu.memory_space<vmem>>, %arg4: memref<1x16x32xf32, #tpu.memory_space<vmem>>, %arg5: memref<1x32xf32, #tpu.memory_space<vmem>>, %arg6: memref<1x32xf32, #tpu.memory_space<vmem>>, %arg7: memref<16x8xf32, #tpu.memory_space<vmem>>, %arg8: memref<16x8xf32, #tpu.memory_space<vmem>>, %arg9: memref<16x8xf32, #tpu.memory_space<vmem>>, %arg10: memref<16x8xf32, #tpu.memory_space<vmem>>, %arg11: memref<32x32xbf16, #tpu.memory_space<vmem>>, %arg12: memref<1x32xf32, #tpu.memory_space<vmem>>, %arg13: memref<64x32xbf16, #tpu.memory_space<vmem>>, %arg14: memref<1x64xf32, #tpu.memory_space<vmem>>, %arg15: memref<32x32xbf16, #tpu.memory_space<vmem>>, %arg16: memref<1x32xf32, #tpu.memory_space<vmem>>, %arg17: memref<1x1x16xi32, #tpu.memory_space<vmem>>, %arg18: memref<1x8x32xf32, #tpu.memory_space<vmem>>, %arg19: memref<16x32xbf16, #tpu.memory_space<vmem>>, %arg20: memref<16x32xbf16, #tpu.memory_space<vmem>>, %arg21: memref<16x32xbf16, #tpu.memory_space<vmem>>) attributes {dimension_semantics = [#tpu.dimension_semantics<parallel>, #tpu.dimension_semantics<arbitrary>], iteration_bounds = array<i64: 2, 2>, scalar_prefetch = 0 : i64, scratch_operands = 3 : i64, tpu.core_type = #tpu.core_type<tc>, window_params = [{transform_indices = @transform_0, window_bounds = array<i64: 1, 16, 32>}, {transform_indices = @transform_1, window_bounds = array<i64: 1, 8, 32>}, {transform_indices = @transform_2, window_bounds = array<i64: 1, 16, 32>}, {pipeline_mode = #tpu.pipeline_mode<synchronous>, transform_indices = @transform_3, window_bounds = array<i64: 1, 32>}, {pipeline_mode = #tpu.pipeline_mode<synchronous>, transform_indices = @transform_4, window_bounds = array<i64: 1, 32>}, {pipeline_mode = #tpu.pipeline_mode<synchronous>, transform_indices = @transform_5, window_bounds = array<i64: 16, 8>}, {pipeline_mode = #tpu.pipeline_mode<synchronous>, transform_indices = @transform_6, window_bounds = array<i64: 16, 8>}, {pipeline_mode = #tpu.pipeline_mode<synchronous>, transform_indices = @transform_7, window_bounds = array<i64: 16, 8>}, {pipeline_mode = #tpu.pipeline_mode<synchronous>, transform_indices = @transform_8, window_bounds = array<i64: 16, 8>}, {pipeline_mode = #tpu.pipeline_mode<synchronous>, transform_indices = @transform_9, window_bounds = array<i64: 32, 32>}, {pipeline_mode = #tpu.pipeline_mode<synchronous>, transform_indices = @transform_10, window_bounds = array<i64: 1, 32>}, {pipeline_mode = #tpu.pipeline_mode<synchronous>, transform_indices = @transform_11, window_bounds = array<i64: 64, 32>}, {pipeline_mode = #tpu.pipeline_mode<synchronous>, transform_indices = @transform_12, window_bounds = array<i64: 1, 64>}, {pipeline_mode = #tpu.pipeline_mode<synchronous>, transform_indices = @transform_13, window_bounds = array<i64: 32, 32>}, {pipeline_mode = #tpu.pipeline_mode<synchronous>, transform_indices = @transform_14, window_bounds = array<i64: 1, 32>}, {transform_indices = @transform_15, window_bounds = array<i64: 1, 1, 16>}, {transform_indices = @transform_16, window_bounds = array<i64: 1, 8, 32>}]} {
    %c0_i32 = arith.constant 0 : i32
    %0 = arith.cmpi eq, %arg1, %c0_i32 : i32
    %1 = arith.extui %0 : i1 to i32
    %c0_i32_0 = arith.constant 0 : i32
    %2 = arith.cmpi ne, %1, %c0_i32_0 : i32
    scf.if %2 {
      %c0_42 = arith.constant 0 : index
      %c0_43 = arith.constant 0 : index
      %c0_44 = arith.constant 0 : index
      %112 = vector.load %arg2[%c0_42, %c0_43, %c0_44] : memref<1x16x32xf32, #tpu.memory_space<vmem>>, vector<1x16x32xf32>
      %113 = vector.shape_cast %112 : vector<1x16x32xf32> to vector<16x32xf32>
      %c0_45 = arith.constant 0 : index
      %c0_46 = arith.constant 0 : index
      %114 = vector.load %arg5[%c0_45, %c0_46] : memref<1x32xf32, #tpu.memory_space<vmem>>, vector<1x32xf32>
      %c0_47 = arith.constant 0 : index
      %c0_48 = arith.constant 0 : index
      %115 = vector.load %arg6[%c0_47, %c0_48] : memref<1x32xf32, #tpu.memory_space<vmem>>, vector<1x32xf32>
      %cst_49 = arith.constant dense<0.000000e+00> : vector<16xf32>
      %116 = vector.multi_reduction <add>, %113, %cst_49 [1] : vector<16x32xf32> to vector<16xf32>
      %117 = vector.shape_cast %116 : vector<16xf32> to vector<16x1xf32>
      %cst_50 = arith.constant 3.200000e+01 : f32
      %118 = vector.broadcast %cst_50 : f32 to vector<16x1xf32>
      %119 = arith.divf %117, %118 : vector<16x1xf32>
      %120 = vector.broadcast %119 : vector<16x1xf32> to vector<16x32xf32>
      %121 = arith.subf %113, %120 : vector<16x32xf32>
      %122 = arith.mulf %121, %121 : vector<16x32xf32>
      %cst_51 = arith.constant dense<0.000000e+00> : vector<16xf32>
      %123 = vector.multi_reduction <add>, %122, %cst_51 [1] : vector<16x32xf32> to vector<16xf32>
      %124 = vector.shape_cast %123 : vector<16xf32> to vector<16x1xf32>
      %cst_52 = arith.constant 3.100000e+01 : f32
      %125 = vector.broadcast %cst_52 : f32 to vector<16x1xf32>
      %126 = arith.divf %124, %125 : vector<16x1xf32>
      %127 = vector.broadcast %114 : vector<1x32xf32> to vector<16x32xf32>
      %128 = arith.mulf %127, %121 : vector<16x32xf32>
      %129 = math.sqrt %126 : vector<16x1xf32>
      %cst_53 = arith.constant 9.99999997E-7 : f32
      %130 = vector.broadcast %cst_53 : f32 to vector<16x1xf32>
      %131 = arith.addf %129, %130 : vector<16x1xf32>
      %132 = vector.broadcast %131 : vector<16x1xf32> to vector<16x32xf32>
      %133 = arith.divf %128, %132 : vector<16x32xf32>
      %134 = vector.broadcast %115 : vector<1x32xf32> to vector<16x32xf32>
      %135 = arith.addf %133, %134 : vector<16x32xf32>
      %136 = arith.truncf %135 : vector<16x32xf32> to vector<16x32xbf16>
      %c0_54 = arith.constant 0 : index
      %c0_55 = arith.constant 0 : index
      %137 = vector.load %arg11[%c0_54, %c0_55] : memref<32x32xbf16, #tpu.memory_space<vmem>>, vector<32x32xbf16>
      %cst_56 = arith.constant dense<0.000000e+00> : vector<16x32xf32>
      %138 = tpu.matmul %136, %137, %cst_56 {dimension_numbers = #tpu.dot_dimension_numbers<[1], [1], [0], [0], [0, 0, 1, 0], [], []>} : vector<16x32xbf16>, vector<32x32xbf16>, vector<16x32xf32> -> vector<16x32xf32>
      %c0_57 = arith.constant 0 : index
      %c0_58 = arith.constant 0 : index
      %139 = vector.load %arg12[%c0_57, %c0_58] : memref<1x32xf32, #tpu.memory_space<vmem>>, vector<1x32xf32>
      %140 = vector.broadcast %139 : vector<1x32xf32> to vector<16x32xf32>
      %141 = arith.addf %138, %140 : vector<16x32xf32>
      %c0_59 = arith.constant 0 : index
      %c0_60 = arith.constant 0 : index
      %c0_61 = arith.constant 0 : index
      %142 = vector.load %arg4[%c0_59, %c0_60, %c0_61] : memref<1x16x32xf32, #tpu.memory_space<vmem>>, vector<1x16x32xf32>
      %143 = vector.shape_cast %142 : vector<1x16x32xf32> to vector<16x32xf32>
      %144 = arith.truncf %143 : vector<16x32xf32> to vector<16x32xbf16>
      %c0_62 = arith.constant 0 : index
      %c0_63 = arith.constant 0 : index
      %145 = vector.load %arg13[%c0_62, %c0_63] : memref<64x32xbf16, #tpu.memory_space<vmem>>, vector<64x32xbf16>
      %cst_64 = arith.constant dense<0.000000e+00> : vector<16x64xf32>
      %146 = tpu.matmul %144, %145, %cst_64 {dimension_numbers = #tpu.dot_dimension_numbers<[1], [1], [0], [0], [0, 0, 1, 0], [], []>} : vector<16x32xbf16>, vector<64x32xbf16>, vector<16x64xf32> -> vector<16x64xf32>
      %c0_65 = arith.constant 0 : index
      %c0_66 = arith.constant 0 : index
      %147 = vector.load %arg14[%c0_65, %c0_66] : memref<1x64xf32, #tpu.memory_space<vmem>>, vector<1x64xf32>
      %148 = vector.broadcast %147 : vector<1x64xf32> to vector<16x64xf32>
      %149 = arith.addf %146, %148 : vector<16x64xf32>
      %c0_67 = arith.constant 0 : index
      %c0_68 = arith.constant 0 : index
      %150 = vector.load %arg7[%c0_67, %c0_68] : memref<16x8xf32, #tpu.memory_space<vmem>>, vector<16x8xf32>
      %c0_69 = arith.constant 0 : index
      %c0_70 = arith.constant 0 : index
      %151 = vector.load %arg8[%c0_69, %c0_70] : memref<16x8xf32, #tpu.memory_space<vmem>>, vector<16x8xf32>
      %c0_71 = arith.constant 0 : index
      %c0_72 = arith.constant 0 : index
      %152 = vector.load %arg9[%c0_71, %c0_72] : memref<16x8xf32, #tpu.memory_space<vmem>>, vector<16x8xf32>
      %c0_73 = arith.constant 0 : index
      %c0_74 = arith.constant 0 : index
      %153 = vector.load %arg10[%c0_73, %c0_74] : memref<16x8xf32, #tpu.memory_space<vmem>>, vector<16x8xf32>
      %154 = vector.extract_strided_slice %141 {offsets = [0, 0], sizes = [16, 8], strides = [1, 1]} : vector<16x32xf32> to vector<16x8xf32>
      %155 = vector.extract_strided_slice %154 {offsets = [0, 4], sizes = [16, 4], strides = [1, 1]} : vector<16x8xf32> to vector<16x4xf32>
      %156 = vector.extract_strided_slice %154 {offsets = [0, 0], sizes = [16, 4], strides = [1, 1]} : vector<16x8xf32> to vector<16x4xf32>
      %157 = tpu.concatenate %155, %156 in 1 : vector<16x4xf32>, vector<16x4xf32> -> vector<16x8xf32>
      %158 = arith.mulf %154, %150 : vector<16x8xf32>
      %159 = arith.mulf %157, %151 : vector<16x8xf32>
      %160 = arith.addf %158, %159 : vector<16x8xf32>
      %161 = vector.extract_strided_slice %149 {offsets = [0, 0], sizes = [16, 8], strides = [1, 1]} : vector<16x64xf32> to vector<16x8xf32>
      %162 = vector.extract_strided_slice %161 {offsets = [0, 4], sizes = [16, 4], strides = [1, 1]} : vector<16x8xf32> to vector<16x4xf32>
      %163 = vector.extract_strided_slice %161 {offsets = [0, 0], sizes = [16, 4], strides = [1, 1]} : vector<16x8xf32> to vector<16x4xf32>
      %164 = tpu.concatenate %162, %163 in 1 : vector<16x4xf32>, vector<16x4xf32> -> vector<16x8xf32>
      %165 = arith.mulf %161, %152 : vector<16x8xf32>
      %166 = arith.mulf %164, %153 : vector<16x8xf32>
      %167 = arith.addf %165, %166 : vector<16x8xf32>
      %168 = vector.extract_strided_slice %141 {offsets = [0, 8], sizes = [16, 8], strides = [1, 1]} : vector<16x32xf32> to vector<16x8xf32>
      %169 = vector.extract_strided_slice %168 {offsets = [0, 4], sizes = [16, 4], strides = [1, 1]} : vector<16x8xf32> to vector<16x4xf32>
      %170 = vector.extract_strided_slice %168 {offsets = [0, 0], sizes = [16, 4], strides = [1, 1]} : vector<16x8xf32> to vector<16x4xf32>
      %171 = tpu.concatenate %169, %170 in 1 : vector<16x4xf32>, vector<16x4xf32> -> vector<16x8xf32>
      %172 = arith.mulf %168, %150 : vector<16x8xf32>
      %173 = arith.mulf %171, %151 : vector<16x8xf32>
      %174 = arith.addf %172, %173 : vector<16x8xf32>
      %175 = vector.extract_strided_slice %149 {offsets = [0, 8], sizes = [16, 8], strides = [1, 1]} : vector<16x64xf32> to vector<16x8xf32>
      %176 = vector.extract_strided_slice %175 {offsets = [0, 4], sizes = [16, 4], strides = [1, 1]} : vector<16x8xf32> to vector<16x4xf32>
      %177 = vector.extract_strided_slice %175 {offsets = [0, 0], sizes = [16, 4], strides = [1, 1]} : vector<16x8xf32> to vector<16x4xf32>
      %178 = tpu.concatenate %176, %177 in 1 : vector<16x4xf32>, vector<16x4xf32> -> vector<16x8xf32>
      %179 = arith.mulf %175, %152 : vector<16x8xf32>
      %180 = arith.mulf %178, %153 : vector<16x8xf32>
      %181 = arith.addf %179, %180 : vector<16x8xf32>
      %182 = vector.extract_strided_slice %141 {offsets = [0, 16], sizes = [16, 8], strides = [1, 1]} : vector<16x32xf32> to vector<16x8xf32>
      %183 = vector.extract_strided_slice %182 {offsets = [0, 4], sizes = [16, 4], strides = [1, 1]} : vector<16x8xf32> to vector<16x4xf32>
      %184 = vector.extract_strided_slice %182 {offsets = [0, 0], sizes = [16, 4], strides = [1, 1]} : vector<16x8xf32> to vector<16x4xf32>
      %185 = tpu.concatenate %183, %184 in 1 : vector<16x4xf32>, vector<16x4xf32> -> vector<16x8xf32>
      %186 = arith.mulf %182, %150 : vector<16x8xf32>
      %187 = arith.mulf %185, %151 : vector<16x8xf32>
      %188 = arith.addf %186, %187 : vector<16x8xf32>
      %189 = vector.extract_strided_slice %149 {offsets = [0, 16], sizes = [16, 8], strides = [1, 1]} : vector<16x64xf32> to vector<16x8xf32>
      %190 = vector.extract_strided_slice %189 {offsets = [0, 4], sizes = [16, 4], strides = [1, 1]} : vector<16x8xf32> to vector<16x4xf32>
      %191 = vector.extract_strided_slice %189 {offsets = [0, 0], sizes = [16, 4], strides = [1, 1]} : vector<16x8xf32> to vector<16x4xf32>
      %192 = tpu.concatenate %190, %191 in 1 : vector<16x4xf32>, vector<16x4xf32> -> vector<16x8xf32>
      %193 = arith.mulf %189, %152 : vector<16x8xf32>
      %194 = arith.mulf %192, %153 : vector<16x8xf32>
      %195 = arith.addf %193, %194 : vector<16x8xf32>
      %196 = vector.extract_strided_slice %141 {offsets = [0, 24], sizes = [16, 8], strides = [1, 1]} : vector<16x32xf32> to vector<16x8xf32>
      %197 = vector.extract_strided_slice %196 {offsets = [0, 4], sizes = [16, 4], strides = [1, 1]} : vector<16x8xf32> to vector<16x4xf32>
      %198 = vector.extract_strided_slice %196 {offsets = [0, 0], sizes = [16, 4], strides = [1, 1]} : vector<16x8xf32> to vector<16x4xf32>
      %199 = tpu.concatenate %197, %198 in 1 : vector<16x4xf32>, vector<16x4xf32> -> vector<16x8xf32>
      %200 = arith.mulf %196, %150 : vector<16x8xf32>
      %201 = arith.mulf %199, %151 : vector<16x8xf32>
      %202 = arith.addf %200, %201 : vector<16x8xf32>
      %203 = vector.extract_strided_slice %149 {offsets = [0, 24], sizes = [16, 8], strides = [1, 1]} : vector<16x64xf32> to vector<16x8xf32>
      %204 = vector.extract_strided_slice %203 {offsets = [0, 4], sizes = [16, 4], strides = [1, 1]} : vector<16x8xf32> to vector<16x4xf32>
      %205 = vector.extract_strided_slice %203 {offsets = [0, 0], sizes = [16, 4], strides = [1, 1]} : vector<16x8xf32> to vector<16x4xf32>
      %206 = tpu.concatenate %204, %205 in 1 : vector<16x4xf32>, vector<16x4xf32> -> vector<16x8xf32>
      %207 = arith.mulf %203, %152 : vector<16x8xf32>
      %208 = arith.mulf %206, %153 : vector<16x8xf32>
      %209 = arith.addf %207, %208 : vector<16x8xf32>
      %210 = tpu.concatenate %160, %174, %188, %202 in 1 : vector<16x8xf32>, vector<16x8xf32>, vector<16x8xf32>, vector<16x8xf32> -> vector<16x32xf32>
      %211 = arith.truncf %210 : vector<16x32xf32> to vector<16x32xbf16>
      %c0_75 = arith.constant 0 : index
      %c0_76 = arith.constant 0 : index
      %212 = vector.load %arg19[%c0_75, %c0_76] : memref<16x32xbf16, #tpu.memory_space<vmem>>, vector<16x32xbf16>
      tpu.vector_store %arg19[%c0_75, %c0_76], %211 {strides = array<i32>} : memref<16x32xbf16, #tpu.memory_space<vmem>>, vector<16x32xbf16>,
      %213 = tpu.concatenate %167, %181, %195, %209 in 1 : vector<16x8xf32>, vector<16x8xf32>, vector<16x8xf32>, vector<16x8xf32> -> vector<16x32xf32>
      %214 = arith.truncf %213 : vector<16x32xf32> to vector<16x32xbf16>
      %c0_77 = arith.constant 0 : index
      %c0_78 = arith.constant 0 : index
      %215 = vector.load %arg20[%c0_77, %c0_78] : memref<16x32xbf16, #tpu.memory_space<vmem>>, vector<16x32xbf16>
      tpu.vector_store %arg20[%c0_77, %c0_78], %214 {strides = array<i32>} : memref<16x32xbf16, #tpu.memory_space<vmem>>, vector<16x32xbf16>,
      %216 = vector.extract_strided_slice %149 {offsets = [0, 32], sizes = [16, 32], strides = [1, 1]} : vector<16x64xf32> to vector<16x32xf32>
      %217 = arith.truncf %216 : vector<16x32xf32> to vector<16x32xbf16>
      %c0_79 = arith.constant 0 : index
      %c0_80 = arith.constant 0 : index
      %218 = vector.load %arg21[%c0_79, %c0_80] : memref<16x32xbf16, #tpu.memory_space<vmem>>, vector<16x32xbf16>
      tpu.vector_store %arg21[%c0_79, %c0_80], %217 {strides = array<i32>} : memref<16x32xbf16, #tpu.memory_space<vmem>>, vector<16x32xbf16>,
    } else {
    }
    %c8_i32 = arith.constant 8 : i32
    %3 = arith.muli %arg1, %c8_i32 : i32
    %4 = tpu.assume_multiple %3, 8 : i32
    %c0 = arith.constant 0 : index
    %c0_1 = arith.constant 0 : index
    %c0_2 = arith.constant 0 : index
    %5 = vector.load %arg17[%c0, %c0_1, %c0_2] : memref<1x1x16xi32, #tpu.memory_space<vmem>>, vector<1x1x16xi32>
    %6 = vector.shape_cast %5 : vector<1x1x16xi32> to vector<1x16xi32>
    %c0_3 = arith.constant 0 : index
    %c0_4 = arith.constant 0 : index
    %c0_5 = arith.constant 0 : index
    %7 = vector.load %arg3[%c0_3, %c0_4, %c0_5] : memref<1x8x32xf32, #tpu.memory_space<vmem>>, vector<1x8x32xf32>
    %8 = vector.shape_cast %7 : vector<1x8x32xf32> to vector<8x32xf32>
    %9 = arith.index_cast %4 : i32 to index
    %c0_6 = arith.constant 0 : index
    %10 = vector.load %arg19[%9, %c0_6] : memref<16x32xbf16, #tpu.memory_space<vmem>>, vector<8x32xbf16>
    %c0_7 = arith.constant 0 : index
    %c0_8 = arith.constant 0 : index
    %11 = vector.load %arg20[%c0_7, %c0_8] : memref<16x32xbf16, #tpu.memory_space<vmem>>, vector<16x32xbf16>
    %c0_9 = arith.constant 0 : index
    %c0_10 = arith.constant 0 : index
    %12 = vector.load %arg21[%c0_9, %c0_10] : memref<16x32xbf16, #tpu.memory_space<vmem>>, vector<16x32xbf16>
    %13 = vector.extract_strided_slice %10 {offsets = [0, 0], sizes = [8, 8], strides = [1, 1]} : vector<8x32xbf16> to vector<8x8xbf16>
    %14 = vector.extract_strided_slice %11 {offsets = [0, 0], sizes = [16, 8], strides = [1, 1]} : vector<16x32xbf16> to vector<16x8xbf16>
    %15 = vector.extract_strided_slice %12 {offsets = [0, 0], sizes = [16, 8], strides = [1, 1]} : vector<16x32xbf16> to vector<16x8xbf16>
    %cst = arith.constant dense<0.000000e+00> : vector<8x16xf32>
    %16 = tpu.matmul %13, %14, %cst {dimension_numbers = #tpu.dot_dimension_numbers<[1], [1], [0], [0], [0, 0, 1, 0], [], []>} : vector<8x8xbf16>, vector<16x8xbf16>, vector<8x16xf32> -> vector<8x16xf32>
    %c0_i32_11 = arith.constant 0 : i32
    %17 = vector.broadcast %c0_i32_11 : i32 to vector<1x16xi32>
    %18 = arith.cmpi eq, %6, %17 : vector<1x16xi32>
    %cst_12 = arith.constant -1.000000e+09 : f32
    %19 = vector.shape_cast %18 : vector<1x16xi1> to vector<1x16xi1>
    %20 = vector.broadcast %19 : vector<1x16xi1> to vector<8x16xi1>
    %21 = vector.broadcast %cst_12 : f32 to vector<8x16xf32>
    %22 = arith.select %20, %21, %16 : vector<8x16xi1>, vector<8x16xf32>
    %cst_13 = arith.constant dense<0xFF800000> : vector<8xf32>
    %23 = vector.multi_reduction <maximumf>, %22, %cst_13 [1] : vector<8x16xf32> to vector<8xf32>
    %24 = vector.shape_cast %23 : vector<8xf32> to vector<8x1xf32>
    %25 = vector.broadcast %24 : vector<8x1xf32> to vector<8x16xf32>
    %26 = arith.subf %22, %25 : vector<8x16xf32>
    %27 = math.exp %26 : vector<8x16xf32>
    %cst_14 = arith.constant dense<0.000000e+00> : vector<8xf32>
    %28 = vector.multi_reduction <add>, %27, %cst_14 [1] : vector<8x16xf32> to vector<8xf32>
    %29 = vector.shape_cast %28 : vector<8xf32> to vector<8x1xf32>
    %30 = tpu.reciprocal %29 {approx = true} : vector<8x1xf32> -> vector<8x1xf32>
    %31 = vector.broadcast %30 : vector<8x1xf32> to vector<8x16xf32>
    %32 = arith.mulf %27, %31 : vector<8x16xf32>
    %33 = arith.truncf %32 : vector<8x16xf32> to vector<8x16xbf16>
    %cst_15 = arith.constant dense<0.000000e+00> : vector<8x8xf32>
    %34 = tpu.matmul %33, %15, %cst_15 {dimension_numbers = #tpu.dot_dimension_numbers<[1], [0], [0], [1], [0, 0, 1, 1], [], []>} : vector<8x16xbf16>, vector<16x8xbf16>, vector<8x8xf32> -> vector<8x8xf32>
    %35 = vector.extract_strided_slice %10 {offsets = [0, 8], sizes = [8, 8], strides = [1, 1]} : vector<8x32xbf16> to vector<8x8xbf16>
    %36 = vector.extract_strided_slice %11 {offsets = [0, 8], sizes = [16, 8], strides = [1, 1]} : vector<16x32xbf16> to vector<16x8xbf16>
    %37 = vector.extract_strided_slice %12 {offsets = [0, 8], sizes = [16, 8], strides = [1, 1]} : vector<16x32xbf16> to vector<16x8xbf16>
    %cst_16 = arith.constant dense<0.000000e+00> : vector<8x16xf32>
    %38 = tpu.matmul %35, %36, %cst_16 {dimension_numbers = #tpu.dot_dimension_numbers<[1], [1], [0], [0], [0, 0, 1, 0], [], []>} : vector<8x8xbf16>, vector<16x8xbf16>, vector<8x16xf32> -> vector<8x16xf32>
    %c0_i32_17 = arith.constant 0 : i32
    %39 = vector.broadcast %c0_i32_17 : i32 to vector<1x16xi32>
    %40 = arith.cmpi eq, %6, %39 : vector<1x16xi32>
    %cst_18 = arith.constant -1.000000e+09 : f32
    %41 = vector.shape_cast %40 : vector<1x16xi1> to vector<1x16xi1>
    %42 = vector.broadcast %41 : vector<1x16xi1> to vector<8x16xi1>
    %43 = vector.broadcast %cst_18 : f32 to vector<8x16xf32>
    %44 = arith.select %42, %43, %38 : vector<8x16xi1>, vector<8x16xf32>
    %cst_19 = arith.constant dense<0xFF800000> : vector<8xf32>
    %45 = vector.multi_reduction <maximumf>, %44, %cst_19 [1] : vector<8x16xf32> to vector<8xf32>
    %46 = vector.shape_cast %45 : vector<8xf32> to vector<8x1xf32>
    %47 = vector.broadcast %46 : vector<8x1xf32> to vector<8x16xf32>
    %48 = arith.subf %44, %47 : vector<8x16xf32>
    %49 = math.exp %48 : vector<8x16xf32>
    %cst_20 = arith.constant dense<0.000000e+00> : vector<8xf32>
    %50 = vector.multi_reduction <add>, %49, %cst_20 [1] : vector<8x16xf32> to vector<8xf32>
    %51 = vector.shape_cast %50 : vector<8xf32> to vector<8x1xf32>
    %52 = tpu.reciprocal %51 {approx = true} : vector<8x1xf32> -> vector<8x1xf32>
    %53 = vector.broadcast %52 : vector<8x1xf32> to vector<8x16xf32>
    %54 = arith.mulf %49, %53 : vector<8x16xf32>
    %55 = arith.truncf %54 : vector<8x16xf32> to vector<8x16xbf16>
    %cst_21 = arith.constant dense<0.000000e+00> : vector<8x8xf32>
    %56 = tpu.matmul %55, %37, %cst_21 {dimension_numbers = #tpu.dot_dimension_numbers<[1], [0], [0], [1], [0, 0, 1, 1], [], []>} : vector<8x16xbf16>, vector<16x8xbf16>, vector<8x8xf32> -> vector<8x8xf32>
    %57 = vector.extract_strided_slice %10 {offsets = [0, 16], sizes = [8, 8], strides = [1, 1]} : vector<8x32xbf16> to vector<8x8xbf16>
    %58 = vector.extract_strided_slice %11 {offsets = [0, 16], sizes = [16, 8], strides = [1, 1]} : vector<16x32xbf16> to vector<16x8xbf16>
    %59 = vector.extract_strided_slice %12 {offsets = [0, 16], sizes = [16, 8], strides = [1, 1]} : vector<16x32xbf16> to vector<16x8xbf16>
    %cst_22 = arith.constant dense<0.000000e+00> : vector<8x16xf32>
    %60 = tpu.matmul %57, %58, %cst_22 {dimension_numbers = #tpu.dot_dimension_numbers<[1], [1], [0], [0], [0, 0, 1, 0], [], []>} : vector<8x8xbf16>, vector<16x8xbf16>, vector<8x16xf32> -> vector<8x16xf32>
    %c0_i32_23 = arith.constant 0 : i32
    %61 = vector.broadcast %c0_i32_23 : i32 to vector<1x16xi32>
    %62 = arith.cmpi eq, %6, %61 : vector<1x16xi32>
    %cst_24 = arith.constant -1.000000e+09 : f32
    %63 = vector.shape_cast %62 : vector<1x16xi1> to vector<1x16xi1>
    %64 = vector.broadcast %63 : vector<1x16xi1> to vector<8x16xi1>
    %65 = vector.broadcast %cst_24 : f32 to vector<8x16xf32>
    %66 = arith.select %64, %65, %60 : vector<8x16xi1>, vector<8x16xf32>
    %cst_25 = arith.constant dense<0xFF800000> : vector<8xf32>
    %67 = vector.multi_reduction <maximumf>, %66, %cst_25 [1] : vector<8x16xf32> to vector<8xf32>
    %68 = vector.shape_cast %67 : vector<8xf32> to vector<8x1xf32>
    %69 = vector.broadcast %68 : vector<8x1xf32> to vector<8x16xf32>
    %70 = arith.subf %66, %69 : vector<8x16xf32>
    %71 = math.exp %70 : vector<8x16xf32>
    %cst_26 = arith.constant dense<0.000000e+00> : vector<8xf32>
    %72 = vector.multi_reduction <add>, %71, %cst_26 [1] : vector<8x16xf32> to vector<8xf32>
    %73 = vector.shape_cast %72 : vector<8xf32> to vector<8x1xf32>
    %74 = tpu.reciprocal %73 {approx = true} : vector<8x1xf32> -> vector<8x1xf32>
    %75 = vector.broadcast %74 : vector<8x1xf32> to vector<8x16xf32>
    %76 = arith.mulf %71, %75 : vector<8x16xf32>
    %77 = arith.truncf %76 : vector<8x16xf32> to vector<8x16xbf16>
    %cst_27 = arith.constant dense<0.000000e+00> : vector<8x8xf32>
    %78 = tpu.matmul %77, %59, %cst_27 {dimension_numbers = #tpu.dot_dimension_numbers<[1], [0], [0], [1], [0, 0, 1, 1], [], []>} : vector<8x16xbf16>, vector<16x8xbf16>, vector<8x8xf32> -> vector<8x8xf32>
    %79 = vector.extract_strided_slice %10 {offsets = [0, 24], sizes = [8, 8], strides = [1, 1]} : vector<8x32xbf16> to vector<8x8xbf16>
    %80 = vector.extract_strided_slice %11 {offsets = [0, 24], sizes = [16, 8], strides = [1, 1]} : vector<16x32xbf16> to vector<16x8xbf16>
    %81 = vector.extract_strided_slice %12 {offsets = [0, 24], sizes = [16, 8], strides = [1, 1]} : vector<16x32xbf16> to vector<16x8xbf16>
    %cst_28 = arith.constant dense<0.000000e+00> : vector<8x16xf32>
    %82 = tpu.matmul %79, %80, %cst_28 {dimension_numbers = #tpu.dot_dimension_numbers<[1], [1], [0], [0], [0, 0, 1, 0], [], []>} : vector<8x8xbf16>, vector<16x8xbf16>, vector<8x16xf32> -> vector<8x16xf32>
    %c0_i32_29 = arith.constant 0 : i32
    %83 = vector.broadcast %c0_i32_29 : i32 to vector<1x16xi32>
    %84 = arith.cmpi eq, %6, %83 : vector<1x16xi32>
    %cst_30 = arith.constant -1.000000e+09 : f32
    %85 = vector.shape_cast %84 : vector<1x16xi1> to vector<1x16xi1>
    %86 = vector.broadcast %85 : vector<1x16xi1> to vector<8x16xi1>
    %87 = vector.broadcast %cst_30 : f32 to vector<8x16xf32>
    %88 = arith.select %86, %87, %82 : vector<8x16xi1>, vector<8x16xf32>
    %cst_31 = arith.constant dense<0xFF800000> : vector<8xf32>
    %89 = vector.multi_reduction <maximumf>, %88, %cst_31 [1] : vector<8x16xf32> to vector<8xf32>
    %90 = vector.shape_cast %89 : vector<8xf32> to vector<8x1xf32>
    %91 = vector.broadcast %90 : vector<8x1xf32> to vector<8x16xf32>
    %92 = arith.subf %88, %91 : vector<8x16xf32>
    %93 = math.exp %92 : vector<8x16xf32>
    %cst_32 = arith.constant dense<0.000000e+00> : vector<8xf32>
    %94 = vector.multi_reduction <add>, %93, %cst_32 [1] : vector<8x16xf32> to vector<8xf32>
    %95 = vector.shape_cast %94 : vector<8xf32> to vector<8x1xf32>
    %96 = tpu.reciprocal %95 {approx = true} : vector<8x1xf32> -> vector<8x1xf32>
    %97 = vector.broadcast %96 : vector<8x1xf32> to vector<8x16xf32>
    %98 = arith.mulf %93, %97 : vector<8x16xf32>
    %99 = arith.truncf %98 : vector<8x16xf32> to vector<8x16xbf16>
    %cst_33 = arith.constant dense<0.000000e+00> : vector<8x8xf32>
    %100 = tpu.matmul %99, %81, %cst_33 {dimension_numbers = #tpu.dot_dimension_numbers<[1], [0], [0], [1], [0, 0, 1, 1], [], []>} : vector<8x16xbf16>, vector<16x8xbf16>, vector<8x8xf32> -> vector<8x8xf32>
    %101 = tpu.concatenate %34, %56, %78, %100 in 1 : vector<8x8xf32>, vector<8x8xf32>, vector<8x8xf32>, vector<8x8xf32> -> vector<8x32xf32>
    %102 = arith.truncf %101 : vector<8x32xf32> to vector<8x32xbf16>
    %c0_34 = arith.constant 0 : index
    %c0_35 = arith.constant 0 : index
    %103 = vector.load %arg15[%c0_34, %c0_35] : memref<32x32xbf16, #tpu.memory_space<vmem>>, vector<32x32xbf16>
    %cst_36 = arith.constant dense<0.000000e+00> : vector<8x32xf32>
    %104 = tpu.matmul %102, %103, %cst_36 {dimension_numbers = #tpu.dot_dimension_numbers<[1], [1], [0], [0], [0, 0, 1, 0], [], []>} : vector<8x32xbf16>, vector<32x32xbf16>, vector<8x32xf32> -> vector<8x32xf32>
    %c0_37 = arith.constant 0 : index
    %c0_38 = arith.constant 0 : index
    %105 = vector.load %arg16[%c0_37, %c0_38] : memref<1x32xf32, #tpu.memory_space<vmem>>, vector<1x32xf32>
    %106 = vector.broadcast %105 : vector<1x32xf32> to vector<8x32xf32>
    %107 = arith.addf %104, %106 : vector<8x32xf32>
    %108 = arith.addf %8, %107 : vector<8x32xf32>
    %c0_39 = arith.constant 0 : index
    %c0_40 = arith.constant 0 : index
    %c0_41 = arith.constant 0 : index
    %109 = vector.load %arg18[%c0_39, %c0_40, %c0_41] : memref<1x8x32xf32, #tpu.memory_space<vmem>>, vector<1x8x32xf32>
    %110 = vector.shape_cast %109 : vector<1x8x32xf32> to vector<8x32xf32>
    %111 = vector.shape_cast %108 : vector<8x32xf32> to vector<1x8x32xf32>
    tpu.vector_store %arg18[%c0_39, %c0_40, %c0_41], %111 {strides = array<i32>} : memref<1x8x32xf32, #tpu.memory_space<vmem>>, vector<1x8x32xf32>,
    return
  }
  func.func @transform_0(%arg0: i32, %arg1: i32) -> (i32, i32, i32) {
    %c0_i32 = arith.constant 0 : i32
    %c0_i32_0 = arith.constant 0 : i32
    %c0_i32_1 = arith.constant 0 : i32
    return %arg0, %c0_i32, %c0_i32_0 : i32, i32, i32
  }
  func.func @transform_1(%arg0: i32, %arg1: i32) -> (i32, i32, i32) {
    %c0_i32 = arith.constant 0 : i32
    %c0_i32_0 = arith.constant 0 : i32
    return %arg0, %arg1, %c0_i32 : i32, i32, i32
  }
  func.func @transform_2(%arg0: i32, %arg1: i32) -> (i32, i32, i32) {
    %c0_i32 = arith.constant 0 : i32
    %c0_i32_0 = arith.constant 0 : i32
    %c0_i32_1 = arith.constant 0 : i32
    return %arg0, %c0_i32, %c0_i32_0 : i32, i32, i32
  }
  func.func @transform_3(%arg0: i32, %arg1: i32) -> (i32, i32) {
    %c0_i32 = arith.constant 0 : i32
    %c0_i32_0 = arith.constant 0 : i32
    %c0_i32_1 = arith.constant 0 : i32
    return %c0_i32, %c0_i32_0 : i32, i32
  }
  func.func @transform_4(%arg0: i32, %arg1: i32) -> (i32, i32) {
    %c0_i32 = arith.constant 0 : i32
    %c0_i32_0 = arith.constant 0 : i32
    %c0_i32_1 = arith.constant 0 : i32
    return %c0_i32, %c0_i32_0 : i32, i32
  }
  func.func @transform_5(%arg0: i32, %arg1: i32) -> (i32, i32) {
    %c0_i32 = arith.constant 0 : i32
    %c0_i32_0 = arith.constant 0 : i32
    %c0_i32_1 = arith.constant 0 : i32
    return %c0_i32, %c0_i32_0 : i32, i32
  }
  func.func @transform_6(%arg0: i32, %arg1: i32) -> (i32, i32) {
    %c0_i32 = arith.constant 0 : i32
    %c0_i32_0 = arith.constant 0 : i32
    %c0_i32_1 = arith.constant 0 : i32
    return %c0_i32, %c0_i32_0 : i32, i32
  }
  func.func @transform_7(%arg0: i32, %arg1: i32) -> (i32, i32) {
    %c0_i32 = arith.constant 0 : i32
    %c0_i32_0 = arith.constant 0 : i32
    %c0_i32_1 = arith.constant 0 : i32
    return %c0_i32, %c0_i32_0 : i32, i32
  }
  func.func @transform_8(%arg0: i32, %arg1: i32) -> (i32, i32) {
    %c0_i32 = arith.constant 0 : i32
    %c0_i32_0 = arith.constant 0 : i32
    %c0_i32_1 = arith.constant 0 : i32
    return %c0_i32, %c0_i32_0 : i32, i32
  }
  func.func @transform_9(%arg0: i32, %arg1: i32) -> (i32, i32) {
    %c0_i32 = arith.constant 0 : i32
    %c0_i32_0 = arith.constant 0 : i32
    %c0_i32_1 = arith.constant 0 : i32
    return %c0_i32, %c0_i32_0 : i32, i32
  }
  func.func @transform_10(%arg0: i32, %arg1: i32) -> (i32, i32) {
    %c0_i32 = arith.constant 0 : i32
    %c0_i32_0 = arith.constant 0 : i32
    %c0_i32_1 = arith.constant 0 : i32
    return %c0_i32, %c0_i32_0 : i32, i32
  }
  func.func @transform_11(%arg0: i32, %arg1: i32) -> (i32, i32) {
    %c0_i32 = arith.constant 0 : i32
    %c0_i32_0 = arith.constant 0 : i32
    %c0_i32_1 = arith.constant 0 : i32
    return %c0_i32, %c0_i32_0 : i32, i32
  }
  func.func @transform_12(%arg0: i32, %arg1: i32) -> (i32, i32) {
    %c0_i32 = arith.constant 0 : i32
    %c0_i32_0 = arith.constant 0 : i32
    %c0_i32_1 = arith.constant 0 : i32
    return %c0_i32, %c0_i32_0 : i32, i32
  }
  func.func @transform_13(%arg0: i32, %arg1: i32) -> (i32, i32) {
    %c0_i32 = arith.constant 0 : i32
    %c0_i32_0 = arith.constant 0 : i32
    %c0_i32_1 = arith.constant 0 : i32
    return %c0_i32, %c0_i32_0 : i32, i32
  }
  func.func @transform_14(%arg0: i32, %arg1: i32) -> (i32, i32) {
    %c0_i32 = arith.constant 0 : i32
    %c0_i32_0 = arith.constant 0 : i32
    %c0_i32_1 = arith.constant 0 : i32
    return %c0_i32, %c0_i32_0 : i32, i32
  }
  func.func @transform_15(%arg0: i32, %arg1: i32) -> (i32, i32, i32) {
    %c0_i32 = arith.constant 0 : i32
    %c0_i32_0 = arith.constant 0 : i32
    %c0_i32_1 = arith.constant 0 : i32
    return %arg0, %c0_i32, %c0_i32_0 : i32, i32, i32
  }
  func.func @transform_16(%arg0: i32, %arg1: i32) -> (i32, i32, i32) {
    %c0_i32 = arith.constant 0 : i32
    %c0_i32_0 = arith.constant 0 : i32
    return %arg0, %arg1, %c0_i32 : i32, i32, i32
  }
}

</mosaic_0001>

<bundles_post_ra>
// kernel: decoder_layer.3
= control target key start
LH: loop header
LB: loop body
LE: loop exit
PB: predicated region body
PF: predicated region fallthrough
CT: control target
= control target key end

     0   :  { %s2007_s17 = smov 0   ;;  %s2009_s18 = smov 0   ;;  %s2356_s0 = inlined_call_operand.vmem [shape: f32[2,16,32], index: 0, kind: input, shape index: {}, may-alias: {0,1}]   ;;  %s2357_s1 = inlined_call_operand.vmem [shape: f32[2,16,32], index: 1, kind: input, shape index: {}, may-alias: {0,1}]   ;;  %s2358_s2 = inlined_call_operand.vmem [shape: f32[1,32], index: 2, kind: input, shape index: {}]   ;;  %s2359_s3 = inlined_call_operand.vmem [shape: f32[1,32], index: 3, kind: input, shape index: {}]   ;;  %s2360_s4 = inlined_call_operand.vmem [shape: f32[16,8], index: 4, kind: input, shape index: {}]   ;;  %s2361_s5 = inlined_call_operand.vmem [shape: f32[16,8], index: 5, kind: input, shape index: {}]   ;;  %s2362_s6 = inlined_call_operand.vmem [shape: bf16[96,32], index: 6, kind: input, shape index: {}]   ;;  %s2363_s7 = inlined_call_operand.vmem [shape: f32[1,96], index: 7, kind: input, shape index: {}]   ;;  %s2364_s8 = inlined_call_operand.vmem [shape: bf16[32,32], index: 8, kind: input, shape index: {}]   ;;  %s2365_s9 = inlined_call_operand.vmem [shape: f32[1,32], index: 9, kind: input, shape index: {}]   ;;  %s2366_s10 = inlined_call_operand.vmem [shape: s32[2,1,16], index: 10, kind: input, shape index: {}]   ;;  %s2367_s11 = inlined_call_operand.vmem [shape: f32[2,16,32], index: 11, kind: output, shape index: {}]  }
   0x1   :  { %s2011_s19 = smov 0   ;;  %s2013_s20 = smov 0  }
   0x2   :  { %s2015_s21 = smov 0  }
   0x3 LB: > { %2371 = sst [smem:[#allocation5_spill]] %s1908_s19  ;;  %s30_s22 = sadd.s32 1, %s1908_s19  ;;  %s1916_s21 = sphi %s2015_s21, %s21_s21   ;;  %s1912_s20 = sphi %s2013_s20, %s2380_s20   ;;  %s1908_s19 = sphi %s2011_s19, %s2379_s19   ;;  %s1904_s18 = sphi %s2009_s18, %s2378_s18   ;;  %s1900_s17 = sphi %s2007_s17, %s2377_s17  }
   0x4   : > { %2372 = sst [smem:[#allocation6_spill]] %s1912_s20  ;;  %s33_s23 = sadd.s32 1, %s1912_s20 }
   0x5   : > { %2373 = sst [smem:[#allocation7_spill]] %s1916_s21  ;;  %p31_p0 = scmp.ge.s32.totalorder %s30_s22, 2 }
   0x6   : > { %p1606_p1 = scmp.ge.s32.totalorder %s1916_s21, 1  ;;  %p374_p2 = scmp.lt.s32.totalorder %s1916_s21, 5 }
   0x7   : > { %s2382_s22 = smov (%p31_p0, %s30_s22), 0  ;;  %s2384_s23 = smov (!%p31_p0, %s33_s23), %s1912_s20 }
   0x8   : > { %2374 = sst [smem:[#allocation8_spill]] %s2382_s22  ;;  %p375_p3 = pnand %p1606_p1, %p374_p2 }
   0x9   : > { %p35_p4 = scmp.ge.s32.totalorder %s2384_s23, 2  ;;  %p428_p5 = scmp.lt.s32.totalorder (!%p375_p3), %s1904_s18, 1 }
   0xa   : > { %378 = sbr.rel (%p375_p3) target bundleno = 2094 (0x82e), region = 64  ;;  %p435_p6 = scmp.lt.s32.totalorder (!%p375_p3), %s1900_s17, 1 }
   0xb   : > { %s2386_s23 = smov (%p35_p4, %s2384_s23), 0  ;;  %p1613_p7 = scmp.ne.s32.totalorder (!%p375_p3), %s1900_s17, 0 }
   0xc   : > { %2375 = sst [smem:[#allocation9_spill]] %s2386_s23 }
   0xf   : > { %s2388_s18 = smov (!%p428_p5, %s1904_s18), 1  ;;  %s1922_s27 = smov (!%p1613_p7), 84  }
  0x10   : > { %s436_s24 = scalar_select %p435_p6, %s1900_s17, 1 }
  0x11   : > { %s1649_s25 = sshll.u32 %s2388_s18, 4  ;;  %s1609_s26 = sshll.u32 %s2388_s18, 1 }
  0x12   : > { %s432_s29 = scalar_lea.vmem %s2356_s0, %s1649_s25  ;;  %s438_s30 = sadd.s32 %s1609_s26, %s436_s24 }
  0x13   : > { %s1610_s12 = sshll.u32 %s438_s30, 3  ;;  %s443_s15 = scalar_lea.vmem %s2366_s10, %s2388_s18 }
  0x14   : > { %s2055_s22 = scalar_lea.vmem %s2357_s1, %s1610_s12  ;;  %s2060_s21 = scalar_lea.vmem %s2367_s11, %s1610_s12 }
  0x15   : > { %456 = sbr.rel (%p1613_p7) target bundleno = 930 (0x3a2), region = 68  ;;  %s1920_s25 = smov (!%p1613_p7), 100  }
  0x16   : > { %s1921_s26 = smov (!%p1613_p7), 92   ;;  %s1923_s28 = smov (!%p1613_p7), 76  }
  0x17   : > { %s1925_s30 = smov (!%p1613_p7), 124   ;;  %s1926_s12 = smov (!%p1613_p7), 116  }
  0x18   : > { %s1927_s24 = smov (!%p1613_p7), 32   ;;  %s1928_s19 = smov (!%p1613_p7), 40  }
  0x19   : > { %s1929_s20 = smov (!%p1613_p7), 108   ;;  %s1933_s13 = smov (!%p1613_p7), 8  }
  0x1a   : > { %v457_v0 = vld [vmem:[%s432_s29] sm:$0xff]  ;;  %vm461_vm0 = vcmask 261120   ;;  %v458_v1 = vld [vmem:[%s432_s29 + $0x8] sm:$0xff]  ;;  %v1918_v5 = vmov 0.0   ;;  %v1845_v19 = vld [vmem:[%s2362_s6 + $0x18] sm:$0xff]   ;;  %vm1919_vm1 = vmmov 0  }
  0x1b   : > { %v462_v2 = vsel %vm461_vm0, %v457_v0, 0.0  ;;  %v465_v3 = vsel %vm461_vm0, %v458_v1, 0.0  ;;  %v1843_v4 = vld [vmem:[%s2362_s6 + $0x28] sm:$0xff]   ;;  %1682 = vmatprep.subr.bf16.mxu0 %v1918_v5  ;;  %v1844_v17 = vld [vmem:[%s2362_s6 + $0x20] sm:$0xff]   ;;  %v583_v20 = vsel %vm461_vm0, %v1845_v19, 0  ;;  %v1846_v21 = vld [vmem:[%s2362_s6 + $0x10] sm:$0xff]   ;;  %1694 = vmatprep.mubr.msk.bf16.mxu0 %vm1919_vm1, %v1918_v5 }
  0x1c   : > { %463 = vadd.xlane.f32.xlu0 %v462_v2  ;;  %v589_v6 = vsel %vm461_vm0, %v1843_v4, 0  ;;  %v586_v18 = vsel %vm461_vm0, %v1844_v17, 0  ;;  %v580_v22 = vsel %vm461_vm0, %v1846_v21, 0  ;;  %v1847_v23 = vld [vmem:[%s2362_s6 + $0x8] sm:$0xff]   ;;  %v1848_v25 = vld [vmem:[%s2362_s6] sm:$0xff]   ;;  %s1924_s29 = smov 68  }
  0x1d   : > { %1683 = vmatpush3.bf16.xpose.msra.mxu0 %v589_v6  ;;  %v577_v24 = vsel %vm461_vm0, %v1847_v23, 0  ;;  %v574_v26 = vsel %vm461_vm0, %v1848_v25, 0  ;;  %v1614_v43 = vld [vmem:[%s2358_s2] ss:$0 sm:$0xff]  ;;  %v2125_v62 = vld [vmem:[%s2360_s4 + $0x8] sm:$0xff]  ;;  %vm650_vm6 = vcmask 31744  }
  0x1e   : > { %1684 = vmatprep.subr.bf16.mxu0 %v1918_v5  ;;  %v1615_v49 = vld [vmem:[%s2359_s3] ss:$0 sm:$0xff]  ;;  %s1934_s14 = smov 16   ;;  %s1935_s16 = smov 24   ;;  %vm857_vm7 = vcmask 64512   ;;  %vm860_vm8 = vcmask 130048  }
  0x1f   : > { %v1616_v54 = vld [vmem:[%s2363_s7] ss:$0 sm:$0xff]  ;;  %s1936_s23 = smov 96   ;;  %vm863_vm9 = vcmask 195584   ;;  %vm874_vm10 = vcmask 257024  }
  0x20   : > { %466 = vadd.xlane.f32.xlu0 %v465_v3  ;;  %v2120_v61 = vld [vmem:[%s2360_s4] sm:$0xff] }
  0x21   : > { %v2150_v63 = vld [vmem:[%s2361_s5] sm:$0xff] }
  0x25   : > { %1685 = vmatpush3.bf16.xpose.msra.mxu0 %v586_v18 }
  0x26   : > { %1686 = vmatprep.subr.bf16.mxu0 %v1918_v5 }
  0x2d   : > { %1687 = vmatpush3.bf16.xpose.msra.mxu0 %v583_v20 }
  0x2e   : > { %1688 = vmatprep.subr.bf16.mxu0 %v1918_v5 }
  0x35   : > { %1689 = vmatpush3.bf16.xpose.msra.mxu0 %v580_v22 }
  0x36   : > { %1690 = vmatprep.subr.bf16.mxu0 %v1918_v5 }
  0x3d   : > { %1691 = vmatpush3.bf16.xpose.msra.mxu0 %v577_v24 }
  0x3e   : > { %1692 = vmatprep.subr.bf16.mxu0 %v1918_v5 }
  0x45   : > { %1693 = vmatpush3.bf16.xpose.msra.mxu0 %v574_v26 }
  0xa5   : > { %v464_v7 = vpop.xlane.xlu0 %463 }
  0xa6   : > { %v469_v8 = vmul.f32 0.03125, %v464_v7 }
  0xa8   : > { %v471_v9 = vsub.f32 %v457_v0, %v469_v8  ;;  %v2160_v8 = vld [vmem:[%s2361_s5 + $0x8] sm:$0xff] }
  0xa9   : > { %v467_v10 = vpop.xlane.xlu0 %466 }
  0xaa   : > { %v470_v11 = vmul.f32 0.03125, %v467_v10  ;;  %v473_v12 = vmul.f32 %v471_v9, %v471_v9  ;;  %v490_v45 = vmul.f32 %v1614_v43, %v471_v9 }
  0xac   : > { %v472_v13 = vsub.f32 %v458_v1, %v470_v11  ;;  %v475_v14 = vsel %vm461_vm0, %v473_v12, 0.0 }
  0xad   : > { %476 = vadd.xlane.f32.xlu1 %v475_v14 }
  0xae   : > { %v474_v15 = vmul.f32 %v472_v13, %v472_v13  ;;  %v491_v46 = vmul.f32 %v1614_v43, %v472_v13 }
  0xb0   : > { %v478_v16 = vsel %vm461_vm0, %v474_v15, 0.0 }
  0xb1   : > { %479 = vadd.xlane.f32.xlu1 %v478_v16 }
 0x136   : > { %v477_v27 = vpop.xlane.xlu1 %476 }
 0x137   : > { %v482_v28 = vmul.f32 0.032258064, %v477_v27 }
 0x139   : > { %1849 = vrsqrt.f32 %v482_v28  ;;  %vm494_vm2 = vcmp.eq.f32.partialorder %v482_v28, inf  ;;  %v497_v33 = vand.u32 2147483648, %v482_v28  ;;  %vm496_vm3 = vcmp.eq.f32.partialorder %v482_v28, 0.0 }
 0x13a   : > { %v480_v29 = vpop.xlane.xlu1 %479 }
 0x13b   : > { %v483_v30 = vmul.f32 0.032258064, %v480_v29 }
 0x13d   : > { %1851 = vrsqrt.f32 %v483_v30  ;;  %vm501_vm4 = vcmp.eq.f32.partialorder %v483_v30, inf  ;;  %v504_v39 = vand.u32 2147483648, %v483_v30  ;;  %vm503_vm5 = vcmp.eq.f32.partialorder %v483_v30, 0.0 }
 0x146   : > { %v1850_v31 = vpop.eup %1849 }
 0x147   : > { %v493_v32 = vmul.f32 %v1850_v31, %v482_v28 }
 0x149   : > { %v495_v34 = vsel %vm494_vm2, %v482_v28, %v493_v32 }
 0x14a   : > { %v1852_v35 = vpop.eup %1851  ;;  %v498_v36 = vsel %vm496_vm3, %v497_v33, %v495_v34 }
 0x14b   : > { %v506_v37 = vadd.f32 1e-06, %v498_v36  ;;  %v500_v38 = vmul.f32 %v1852_v35, %v483_v30 }
 0x14d   : > { %1853 = vrcp.f32 %v506_v37  ;;  %v502_v40 = vsel %vm501_vm4, %v483_v30, %v500_v38 }
 0x14e   : > { %v505_v41 = vsel %vm503_vm5, %v504_v39, %v502_v40 }
 0x14f   : > { %v507_v42 = vadd.f32 1e-06, %v505_v41 }
 0x151   : > { %1855 = vrcp.f32 %v507_v42 }
 0x15a   : > { %v1854_v44 = vpop.eup %1853 }
 0x15b   : > { %v509_v47 = vmul.f32 %v1854_v44, %v490_v45 }
 0x15d   : > { %v518_v51 = vadd.f32 %v1615_v49, %v509_v47 }
 0x15e   : > { %v1856_v48 = vpop.eup %1855 }
 0x15f   : > { %v511_v50 = vmul.f32 %v1856_v48, %v491_v46 }
 0x161   : > { %v519_v52 = vadd.f32 %v1615_v49, %v511_v50 }
 0x163   : > { %v520_v53 = vpack.c.bf16 %v519_v52, %v518_v51 }
 0x165   : > { %1695 = vmatmul.mubr.msk.bf16.vlgmr.msra.gmra.mxu0 %vm461_vm0, %v520_v53 }
 0x225   : > { %v625_v55 = vpop.f32.mrf.mxu0 }
 0x226   : > { %v2101_v56 = vadd.f32 %v1616_v54, %v625_v55 }
 0x227   : > { %v1696_v57 = vpop.f32.mrf.mxu0 }
 0x228   : > { %665 = vrot.lane.b32.xlu1 %v2101_v56, %s1920_s25  ;;  %659 = vrot.lane.b32.xlu0 %v2101_v56, %s1921_s26 }
 0x229   : > { %v628_v58 = vpop.f32.mrf.mxu0 }
 0x22a   : > { %v2105_v59 = vadd.f32 %v1616_v54, %v628_v58 }
 0x22b   : > { %v1697_v60 = vpop.f32.mrf.mxu0 }
 0x22c   : > { %723 = vrot.lane.b32.xlu0 %v2101_v56, %s1922_s27  ;;  %661 = vrot.lane.b32.xlu1 %v2105_v59, %s1921_s26  ;;  %s1931_s26 = smov 56  }
 0x230   : > { %779 = vrot.lane.b32.xlu0 %v2101_v56, %s1923_s28  ;;  %667 = vrot.lane.b32.xlu1 %v2105_v59, %s1920_s25  ;;  %s1930_s25 = smov 48  }
 0x234   : > { %829 = vrot.lane.b32.xlu0 %v2101_v56, %s1924_s29  ;;  %725 = vrot.lane.b32.xlu1 %v2105_v59, %s1922_s27 }
 0x238   : > { %638 = vrot.lane.b32.xlu0 %v2101_v56, %s1925_s30  ;;  %781 = vrot.lane.b32.xlu1 %v2105_v59, %s1923_s28 }
 0x23c   : > { %695 = vrot.lane.b32.xlu0 %v2101_v56, %s1926_s12  ;;  %831 = vrot.lane.b32.xlu1 %v2105_v59, %s1924_s29 }
 0x240   : > { %675 = vrot.lane.b32.xlu0 %v2120_v61, %s1927_s24  ;;  %677 = vrot.lane.b32.xlu1 %v2125_v62, %s1927_s24 }
 0x244   : > { %731 = vrot.lane.b32.xlu0 %v2120_v61, %s1928_s19  ;;  %733 = vrot.lane.b32.xlu1 %v2125_v62, %s1928_s19 }
 0x248   : > { %751 = vrot.lane.b32.xlu0 %v2101_v56, %s1929_s20  ;;  %789 = vrot.lane.b32.xlu1 %v2125_v62, %s1930_s25 }
 0x24c   : > { %787 = vrot.lane.b32.xlu0 %v2120_v61, %s1930_s25  ;;  %839 = vrot.lane.b32.xlu1 %v2125_v62, %s1931_s26 }
 0x250   : > { %837 = vrot.lane.b32.xlu0 %v2120_v61, %s1931_s26  ;;  %640 = vrot.lane.b32.xlu1 %v2105_v59, %s1925_s30 }
 0x254   : > { %697 = vrot.lane.b32.xlu1 %v2105_v59, %s1926_s12  ;;  %s1932_s12 = smov 4  }
 0x258   : > { %753 = vrot.lane.b32.xlu1 %v2105_v59, %s1929_s20 }
 0x29a   : > { %v666_v0 = vpop.permute.xlu1 %665  ;;  %v660_v1 = vpop.permute.xlu0 %659 }
 0x29b   : > { %v671_v2 = vsel %vm650_vm6, %v660_v1, %v666_v0 }
 0x29c   : > { %v683_v3 = vmul.f32 %v671_v2, %v2150_v63 }
 0x29e   : > { %687 = vrot.lane.b32.xlu0 %v683_v3, %s1927_s24  ;;  %v724_v4 = vpop.permute.xlu0 %723  ;;  %v662_v5 = vpop.permute.xlu1 %661 }
 0x29f   : > { %v729_v6 = vsel %vm650_vm6, %v724_v4, %v660_v1 }
 0x2a0   : > { %v739_v7 = vmul.f32 %v729_v6, %v2150_v63 }
 0x2a2   : > { %743 = vrot.lane.b32.xlu0 %v739_v7, %s1928_s19  ;;  %v780_v9 = vpop.permute.xlu0 %779  ;;  %v668_v10 = vpop.permute.xlu1 %667 }
 0x2a3   : > { %v785_v11 = vsel %vm650_vm6, %v780_v9, %v724_v4  ;;  %v672_v12 = vsel %vm650_vm6, %v662_v5, %v668_v10 }
 0x2a4   : > { %v795_v13 = vmul.f32 %v785_v11, %v2150_v63  ;;  %v684_v14 = vmul.f32 %v672_v12, %v2160_v8 }
 0x2a6   : > { %799 = vrot.lane.b32.xlu0 %v795_v13, %s1930_s25  ;;  %v830_v15 = vpop.permute.xlu0 %829  ;;  %689 = vrot.lane.b32.xlu1 %v684_v14, %s1927_s24  ;;  %v726_v16 = vpop.permute.xlu1 %725  ;;  %s1937_s24 = smov 64  }
 0x2a7   : > { %v835_v17 = vsel %vm650_vm6, %v830_v15, %v780_v9  ;;  %v730_v18 = vsel %vm650_vm6, %v726_v16, %v662_v5 }
 0x2a8   : > { %v845_v19 = vmul.f32 %v835_v17, %v2150_v63  ;;  %v740_v20 = vmul.f32 %v730_v18, %v2160_v8 }
 0x2aa   : > { %849 = vrot.lane.b32.xlu0 %v845_v19, %s1931_s26  ;;  %v2174_v21 = vpop.permute.xlu0 %638  ;;  %745 = vrot.lane.b32.xlu1 %v740_v20, %s1928_s19  ;;  %v782_v22 = vpop.permute.xlu1 %781 }
 0x2ab   : > { %v786_v23 = vsel %vm650_vm6, %v782_v22, %v726_v16 }
 0x2ac   : > { %v796_v24 = vmul.f32 %v786_v23, %v2160_v8 }
 0x2ae   : > { %644 = vrot.lane.b32.xlu0 %v2101_v56, %s1932_s12  ;;  %v696_v25 = vpop.permute.xlu0 %695  ;;  %801 = vrot.lane.b32.xlu1 %v796_v24, %s1930_s25  ;;  %v832_v26 = vpop.permute.xlu1 %831 }
 0x2af   : > { %v836_v27 = vsel %vm650_vm6, %v832_v26, %v782_v22  ;;  %v701_v31 = vsel %vm650_vm6, %v696_v25, %v2174_v21  ;;  %v1654_v26 = vpack.c.bf16 %v2101_v56, %v2101_v56 }
 0x2b0   : > { %v846_v28 = vmul.f32 %v836_v27, %v2160_v8  ;;  %v711_v34 = vmul.f32 %v701_v31, %v2150_v63 }
 0x2b2   : > { %703 = vrot.lane.b32.xlu0 %v2120_v61, %s1933_s13  ;;  %v676_v29 = vpop.permute.xlu0 %675  ;;  %851 = vrot.lane.b32.xlu1 %v846_v28, %s1931_s26  ;;  %v678_v30 = vpop.permute.xlu1 %677 }
 0x2b3   : > { %v681_v55 = vmul.f32 %v676_v29, %v2101_v56  ;;  %v682_v57 = vmul.f32 %v678_v30, %v2105_v59  ;;  %v1655_v29 = vpack.c.bf16 %v2105_v59, %v2105_v59 }
 0x2b6   : > { %759 = vrot.lane.b32.xlu0 %v2120_v61, %s1934_s14  ;;  %v732_v32 = vpop.permute.xlu0 %731  ;;  %646 = vrot.lane.b32.xlu1 %v2105_v59, %s1932_s12  ;;  %v734_v33 = vpop.permute.xlu1 %733 }
 0x2b7   : > { %v737_v2 = vmul.f32 %v732_v32, %v2101_v56  ;;  %v738_v3 = vmul.f32 %v734_v33, %v2105_v59 }
 0x2ba   : > { %715 = vrot.lane.b32.xlu0 %v711_v34, %s1933_s13  ;;  %v752_v35 = vpop.permute.xlu0 %751  ;;  %705 = vrot.lane.b32.xlu1 %v2125_v62, %s1933_s13  ;;  %v790_v36 = vpop.permute.xlu1 %789 }
 0x2bb   : > { %v757_v37 = vsel %vm650_vm6, %v752_v35, %v696_v25  ;;  %v807_v40 = vsel %vm650_vm6, %v666_v0, %v752_v35 }
 0x2bc   : > { %v767_v39 = vmul.f32 %v757_v37, %v2150_v63  ;;  %v817_v42 = vmul.f32 %v807_v40, %v2150_v63 }
 0x2be   : > { %809 = vrot.lane.b32.xlu0 %v2120_v61, %s1935_s16  ;;  %761 = vrot.lane.b32.xlu1 %v2125_v62, %s1934_s14  ;;  %v840_v38 = vpop.permute.xlu1 %839  ;;  %v788_v51 = vpop.permute.xlu0 %787 }
 0x2bf   : > { %v793_v11 = vmul.f32 %v788_v51, %v2101_v56  ;;  %v844_v17 = vmul.f32 %v840_v38, %v2105_v59 }
 0x2c2   : > { %771 = vrot.lane.b32.xlu0 %v767_v39, %s1934_s14  ;;  %811 = vrot.lane.b32.xlu1 %v2125_v62, %s1935_s16  ;;  %v2200_v41 = vpop.permute.xlu1 %640  ;;  %v838_v52 = vpop.permute.xlu0 %837  ;;  %v653_v39 = vmul.f32 %v2120_v61, %v2101_v56 }
 0x2c3   : > { %v843_v18 = vmul.f32 %v838_v52, %v2101_v56 }
 0x2c6   : > { %821 = vrot.lane.b32.xlu0 %v817_v42, %s1935_s16  ;;  %v698_v43 = vpop.permute.xlu1 %697 }
 0x2c7   : > { %v702_v44 = vsel %vm650_vm6, %v698_v43, %v2200_v41 }
 0x2c8   : > { %v712_v45 = vmul.f32 %v702_v44, %v2160_v8 }
 0x2ca   : > { %717 = vrot.lane.b32.xlu1 %v712_v45, %s1933_s13  ;;  %v754_v46 = vpop.permute.xlu1 %753 }
 0x2cb   : > { %v758_v47 = vsel %vm650_vm6, %v754_v46, %v698_v43  ;;  %v808_v49 = vsel %vm650_vm6, %v668_v10, %v754_v46  ;;  %v794_v10 = vmul.f32 %v790_v36, %v2105_v59 }
 0x2cc   : > { %v768_v48 = vmul.f32 %v758_v47, %v2160_v8  ;;  %v818_v50 = vmul.f32 %v808_v49, %v2160_v8 }
 0x2ce   : > { %773 = vrot.lane.b32.xlu1 %v768_v48, %s1934_s14 }
 0x2d2   : > { %823 = vrot.lane.b32.xlu1 %v818_v50, %s1935_s16 }
 0x310   : > { %v688_v53 = vpop.permute.xlu0 %687 }
 0x311   : > { %v693_v0 = vadd.f32 %v688_v53, %v681_v55 }
 0x314   : > { %v744_v54 = vpop.permute.xlu0 %743 }
 0x315   : > { %v749_v7 = vadd.f32 %v744_v54, %v737_v2  ;;  %v654_v54 = vmul.f32 %v2125_v62, %v2105_v59 }
 0x318   : > { %v800_v58 = vpop.permute.xlu0 %799  ;;  %v690_v60 = vpop.permute.xlu1 %689 }
 0x319   : > { %v694_v1 = vadd.f32 %v690_v60, %v682_v57  ;;  %v805_v15 = vadd.f32 %v800_v58, %v793_v11 }
 0x31b   : > { %v1823_v4 = vpack.i.bf16 %v694_v1, %v693_v0 }
 0x31c   : > { %v850_v5 = vpop.permute.xlu0 %849  ;;  %v746_v6 = vpop.permute.xlu1 %745 }
 0x31d   : > { %v750_v9 = vadd.f32 %v746_v6, %v738_v3  ;;  %1824 = vrot.lane.b32.xlu0 %v1823_v4, %s1936_s23  ;;  %v855_v23 = vadd.f32 %v850_v5, %v843_v18 }
 0x31f   : > { %v1828_v12 = vpack.i.bf16 %v750_v9, %v749_v7 }
 0x320   : > { %v645_v13 = vpop.permute.xlu0 %644  ;;  %v802_v14 = vpop.permute.xlu1 %801 }
 0x321   : > { %v806_v16 = vadd.f32 %v802_v14, %v794_v10  ;;  %1829 = vrot.lane.b32.xlu1 %v1828_v12, %s1936_s23  ;;  %v651_v32 = vsel %vm650_vm6, %v2174_v21, %v645_v13 }
 0x322   : > { %v655_v35 = vmul.f32 %v651_v32, %v2150_v63 }
 0x323   : > { %v1833_v19 = vpack.i.bf16 %v806_v16, %v805_v15 }
 0x324   : > { %v704_v20 = vpop.permute.xlu0 %703  ;;  %v852_v22 = vpop.permute.xlu1 %851  ;;  %v657_v43 = vadd.f32 %v655_v35, %v653_v39 }
 0x325   : > { %v856_v24 = vadd.f32 %v852_v22, %v844_v17  ;;  %1834 = vrot.lane.b32.xlu0 %v1833_v19, %s1936_s23  ;;  %v709_v36 = vmul.f32 %v704_v20, %v2101_v56 }
 0x327   : > { %v1838_v25 = vpack.i.bf16 %v856_v24, %v855_v23 }
 0x328   : > { %v760_v27 = vpop.permute.xlu0 %759  ;;  %v647_v28 = vpop.permute.xlu1 %646 }
 0x329   : > { %931 = vrot.lane.b32.xlu0 %v1654_v26, %s1937_s24  ;;  %1839 = vrot.lane.b32.xlu1 %v1838_v25, %s1936_s23  ;;  %v765_v37 = vmul.f32 %v760_v27, %v2101_v56  ;;  %v652_v61 = vsel %vm650_vm6, %v2200_v41, %v647_v28 }
 0x32c   : > { %v716_v30 = vpop.permute.xlu0 %715  ;;  %v706_v31 = vpop.permute.xlu1 %705 }
 0x32d   : > { %933 = vrot.lane.b32.xlu1 %v1655_v29, %s1937_s24  ;;  %v721_v40 = vadd.f32 %v716_v30, %v709_v36  ;;  %v710_v51 = vmul.f32 %v706_v31, %v2105_v59 }
 0x32f   : > { %v858_v63 = vsel %vm857_vm7, %v657_v43, %v721_v40 }
 0x330   : > { %v810_v33 = vpop.permute.xlu0 %809  ;;  %v762_v34 = vpop.permute.xlu1 %761 }
 0x331   : > { %v815_v44 = vmul.f32 %v810_v33, %v2101_v56  ;;  %v656_v56 = vmul.f32 %v652_v61, %v2160_v8  ;;  %v766_v52 = vmul.f32 %v762_v34, %v2105_v59 }
 0x333   : > { %v658_v58 = vadd.f32 %v656_v56, %v654_v54 }
 0x334   : > { %v772_v38 = vpop.permute.xlu0 %771  ;;  %v812_v21 = vpop.permute.xlu1 %811 }
 0x335   : > { %v777_v42 = vadd.f32 %v772_v38, %v765_v37  ;;  %v816_v60 = vmul.f32 %v812_v21, %v2105_v59 }
 0x337   : > { %v861_v47 = vsel %vm860_vm8, %v858_v63, %v777_v42 }
 0x338   : > { %v822_v45 = vpop.permute.xlu0 %821 }
 0x339   : > { %v827_v46 = vadd.f32 %v822_v45, %v815_v44 }
 0x33b   : > { %v864_v48 = vsel %vm863_vm9, %v861_v47, %v827_v46 }
 0x33c   : > { %v1650_v49 = vpack.c.bf16 %v864_v48, %v864_v48  ;;  %v718_v50 = vpop.permute.xlu1 %717 }
 0x33d   : > { %v722_v55 = vadd.f32 %v718_v50, %v710_v51 }
 0x33e   : > { %875 = vst.msk [vmem:[#allocation2] sm:$0xf] %vm874_vm10, %v1650_v49 }
 0x33f   : > { %v859_v0 = vsel %vm857_vm7, %v658_v58, %v722_v55 }
 0x340   : > { %v774_v53 = vpop.permute.xlu1 %773 }
 0x341   : > { %v778_v57 = vadd.f32 %v774_v53, %v766_v52 }
 0x343   : > { %v862_v2 = vsel %vm860_vm8, %v859_v0, %v778_v57 }
 0x344   : > { %v824_v41 = vpop.permute.xlu1 %823 }
 0x345   : > { %v828_v1 = vadd.f32 %v824_v41, %v816_v60 }
 0x347   : > { %v865_v8 = vsel %vm863_vm9, %v862_v2, %v828_v1 }
 0x348   : > { %v1651_v3 = vpack.c.bf16 %v865_v8, %v865_v8 }
 0x34a   : > { %876 = vst.msk [vmem:[#allocation2 + $0x4] sm:$0xf] %vm874_vm10, %v1651_v3 }
 0x38f   : > { %v1825_v4 = vpop.permute.xlu0 %1824 }
 0x390   : > { %v1827_v11 = vunpack.i.h.bf16 %v1825_v4  ;;  %v1826_v59 = vunpack.i.l.bf16 %v1825_v4 }
 0x393   : > { %v1830_v5 = vpop.permute.xlu1 %1829 }
 0x394   : > { %v1832_v62 = vunpack.i.h.bf16 %v1830_v5  ;;  %v1831_v7 = vunpack.i.l.bf16 %v1830_v5 }
 0x396   : > { %v910_v14 = vsel %vm857_vm7, %v1827_v11, %v1832_v62  ;;  %v909_v15 = vsel %vm857_vm7, %v1826_v59, %v1831_v7 }
 0x397   : > { %v1835_v6 = vpop.permute.xlu0 %1834 }
 0x398   : > { %v1837_v9 = vunpack.i.h.bf16 %v1835_v6  ;;  %v1836_v10 = vunpack.i.l.bf16 %v1835_v6 }
 0x39a   : > { %v911_v18 = vsel %vm860_vm8, %v909_v15, %v1836_v10  ;;  %v912_v19 = vsel %vm860_vm8, %v910_v14, %v1837_v9 }
 0x39b   : > { %v932_v12 = vpop.permute.xlu0 %931  ;;  %v1840_v13 = vpop.permute.xlu1 %1839 }
 0x39c   : > { %937 = vst.msk [vmem:[#allocation4] sm:$0xf] %vm874_vm10, %v932_v12  ;;  %v1842_v16 = vunpack.i.h.bf16 %v1840_v13  ;;  %v1841_v17 = vunpack.i.l.bf16 %v1840_v13 }
 0x39e   : > { %v913_v20 = vsel %vm863_vm9, %v911_v18, %v1841_v17  ;;  %v914_v22 = vsel %vm863_vm9, %v912_v19, %v1842_v16 }
 0x39f   : > { %v1652_v23 = vpack.c.bf16 %v913_v20, %v913_v20  ;;  %v1653_v24 = vpack.c.bf16 %v914_v22, %v914_v22  ;;  %v934_v25 = vpop.permute.xlu1 %933 }
 0x3a0   : > { %938 = vst.msk [vmem:[#allocation4 + $0x4] sm:$0xf] %vm874_vm10, %v934_v25 }
 0x3a1   : > { %923 = vst.msk [vmem:[#allocation3] sm:$0xf] %vm874_vm10, %v1652_v23  ;;  %924 = vst.msk [vmem:[#allocation3 + $0x4] sm:$0xf] %vm874_vm10, %v1653_v24 }
 0x3a2 PF: > { %v1938_v27 = vmov 0.0   ;;  %vm956_vm11 = vcmask 64512   ;;  %s1939_s19 = smov 120   ;;  %vm1940_vm12 = vmmov 0   ;;  %s1630_s20 = sshll.u32 %s1900_s17, 3  ;;  %v1005_v40 = vlaneseq }
 0x3a3   : > { %1698 = vmatprep.subr.bf16.mxu0 %v1938_v27  ;;  %1710 = vmatprep.subr.bf16.mxu1 %v1938_v27  ;;  %s1941_s25 = smov 112   ;;  %s942_s26 = sshra.s32 %s1630_s20, 3  ;;  %v940_v42 = vld [vmem:[%s443_s15] sm:$0x1]  ;;  %v1943_v21 = vmov 0   ;;  %vm1011_vm15 = vcmask 130048  }
 0x3a4   : > { %1700 = vmatprep.mubr.msk.bf16.mxu0 %vm1940_vm12, %v1938_v27  ;;  %s1631_s27 = sshll.u32 %s942_s26, 2  ;;  %1712 = vmatprep.mubr.msk.bf16.mxu1 %vm1940_vm12, %v1938_v27  ;;  %s1942_s17 = smov 104   ;;  %v1006_v43 = vshrl.u32 %v1005_v40, 7  ;;  %vm1003_vm13 = vcmp.eq.s32.totalorder %v940_v42, 0  ;;  %vm1441_vm0 = vcmask 261120   ;;  %vm1417_vm1 = vcmask 195584  }
 0x3a5   : > { %s945_s28 = scalar_lea.vmem [#allocation2], %s1631_s27  ;;  %v1004_v45 = vsel %vm1003_vm13, 1, %v1943_v21  ;;  %s1944_s14 = smov 8  }
 0x3a6   : > { %v946_v29 = vld [vmem:[%s945_s28] sm:$0xf]  ;;  %v1007_v44 = vsub.s32 0, %v1006_v43  ;;  %s1945_s16 = smov 16   ;;  %s1946_s23 = smov 24  }
 0x3a7   : > { %v1636_v30 = vcombine.low %v946_v29, %v946_v29  ;;  %v1859_v56 = vld [vmem:[#allocation4] sm:$0xff]  }
 0x3a8   : > { %v1857_v26 = vld [vmem:[#allocation3] sm:$0xff]   ;;  %v1008_v63 = vrot.slane %v1004_v45, %v1007_v44 }
 0x3a9   : > { %1078 = vrot.lane.b32.xlu0 %v1857_v26, %s1939_s19  ;;  %v961_v28 = vsel %vm956_vm11, %v1857_v26, 0  ;;  %1187 = vrot.lane.b32.xlu1 %v1857_v26, %s1941_s25 }
 0x3aa   : > { %1699 = vmatpush3.bf16.xpose.msra.mxu0 %v961_v28  ;;  %vm1009_vm14 = vcmp.eq.s32.totalorder %v1008_v63, 1 }
 0x3ab   : > { %1704 = vmatprep.subr.bf16.mxu0 %v1938_v27 }
 0x3ad   : > { %1076 = vrot.lane.b32.xlu0 %v1636_v30, %s1939_s19  ;;  %1185 = vrot.lane.b32.xlu1 %v1636_v30, %s1941_s25 }
 0x3b1   : > { %1701 = vmatmul.mubr.msk.bf16.vlgmr.msra.gmra.mxu0 %vm956_vm11, %v946_v29  ;;  %1296 = vrot.lane.b32.xlu0 %v1857_v26, %s1942_s17 }
 0x3b2   : > { %1706 = vmatprep.mubr.msk.bf16.mxu0 %vm1940_vm12, %v1938_v27  ;;  %1294 = vrot.lane.b32.xlu1 %v1636_v30, %s1942_s17 }
 0x3b3   : > { %1705 = vmatpush3.bf16.msra.mxu0 %v1859_v56 }
 0x3b4   : > { %1716 = vmatprep.subr.bf16.mxu0 %v1938_v27 }
 0x41b   : > { %v1079_v31 = vpop.permute.xlu0 %1078  ;;  %v1188_v33 = vpop.permute.xlu1 %1187 }
 0x41c   : > { %v1084_v32 = vsel %vm956_vm11, %v1079_v31, 0  ;;  %v1193_v34 = vsel %vm956_vm11, %v1188_v33, 0 }
 0x41d   : > { %1711 = vmatpush3.bf16.xpose.msra.mxu1 %v1084_v32 }
 0x41e   : > { %1722 = vmatprep.subr.bf16.mxu1 %v1938_v27 }
 0x41f   : > { %v1077_v35 = vpop.permute.xlu0 %1076  ;;  %v1186_v37 = vpop.permute.xlu1 %1185 }
 0x423   : > { %v1297_v36 = vpop.permute.xlu0 %1296 }
 0x424   : > { %1713 = vmatmul.mubr.msk.bf16.vlgmr.msra.gmra.mxu1 %vm956_vm11, %v1077_v35  ;;  %v1302_v38 = vsel %vm956_vm11, %v1297_v36, 0  ;;  %v1295_v39 = vpop.permute.xlu1 %1294 }
 0x425   : > { %1723 = vmatpush3.bf16.xpose.msra.mxu1 %v1193_v34  ;;  %1724 = vmatprep.mubr.msk.bf16.mxu1 %vm1940_vm12, %v1938_v27 }
 0x426   : > { %1734 = vmatprep.subr.bf16.mxu1 %v1938_v27 }
 0x42c   : > { %1725 = vmatmul.mubr.msk.bf16.vlgmr.msra.gmra.mxu1 %vm956_vm11, %v1186_v37 }
 0x42d   : > { %1735 = vmatpush3.bf16.xpose.msra.mxu1 %v1302_v38  ;;  %1736 = vmatprep.mubr.msk.bf16.mxu1 %vm1940_vm12, %v1938_v27 }
 0x42e   : > { %1746 = vmatprep.subr.bf16.mxu1 %v1938_v27 }
 0x434   : > { %1737 = vmatmul.mubr.msk.bf16.vlgmr.msra.gmra.mxu1 %vm956_vm11, %v1295_v39 }
 0x435   : > { %1750 = vmatprep.mubr.msk.bf16.mxu1 %vm1940_vm12, %v1938_v27 }
 0x471   : > { %v997_v46 = vpop.f32.mrf.mxu0 }
 0x472   : > { %v1010_v47 = vsel %vm1009_vm14, -1e+09, %v997_v46 }
 0x473   : > { %v1012_v48 = vsel %vm1011_vm15, %v1010_v47, -inf  ;;  %v1702_v61 = vpop.f32.mrf.mxu0 }
 0x474   : > { %1013 = vmax.xlane.f32.xlu0 %v1012_v48 }
 0x475   : > { %v1000_v49 = vpop.f32.mrf.mxu0 }
 0x477   : > { %v1703_v50 = vpop.f32.mrf.mxu0 }
 0x478   : > { %v1860_v50 = vld [vmem:[%s2364_s8 + $0x8] sm:$0xff]  }
 0x4e4   : > { %v1120_v51 = vpop.f32.mrf.mxu1 }
 0x4e5   : > { %v1126_v52 = vsel %vm1009_vm14, -1e+09, %v1120_v51  ;;  %v1861_v51 = vld [vmem:[%s2364_s8] sm:$0xff]  }
 0x4e6   : > { %v1714_v53 = vpop.f32.mrf.mxu1  ;;  %v1127_v54 = vsel %vm1011_vm15, %v1126_v52, -inf }
 0x4e7   : > { %1128 = vmax.xlane.f32.xlu1 %v1127_v54 }
 0x4e8   : > { %v1123_v55 = vpop.f32.mrf.mxu1 }
 0x4ea   : > { %v1715_v57 = vpop.f32.mrf.mxu1 }
 0x4ec   : > { %v1229_v58 = vpop.f32.mrf.mxu1 }
 0x4ed   : > { %v1235_v60 = vsel %vm1009_vm14, -1e+09, %v1229_v58 }
 0x4ee   : > { %v1726_v41 = vpop.f32.mrf.mxu1  ;;  %v1236_v0 = vsel %vm1011_vm15, %v1235_v60, -inf }
 0x4ef   : > { %1237 = vmax.xlane.f32.xlu0 %v1236_v0 }
 0x4f0   : > { %v1232_v1 = vpop.f32.mrf.mxu1 }
 0x4f2   : > { %v1727_v2 = vpop.f32.mrf.mxu1 }
 0x4f4   : > { %v1338_v8 = vpop.f32.mrf.mxu1 }
 0x4f5   : > { %v1344_v3 = vsel %vm1009_vm14, -1e+09, %v1338_v8 }
 0x4f6   : > { %v1738_v4 = vpop.f32.mrf.mxu1  ;;  %v1345_v5 = vsel %vm1011_vm15, %v1344_v3, -inf }
 0x4f7   : > { %1346 = vmax.xlane.f32.xlu0 %v1345_v5 }
 0x4f8   : > { %v1341_v6 = vpop.f32.mrf.mxu1 }
 0x4fa   : > { %v1739_v62 = vpop.f32.mrf.mxu1 }
 0x4fd   : > { %v1014_v7 = vpop.xlane.xlu0 %1013 }
 0x4fe   : > { %v1015_v9 = vsub.f32 %v1010_v47, %v1014_v7 }
 0x500   : > { %v1016_v10 = vmul.f32 1.442695, %v1015_v9 }
 0x502   : > { %1862 = vpow2.f32 %v1016_v10  ;;  %v1643_v10 = vld [vmem:[%s2365_s9] ss:$0 sm:$0xff] }
 0x50f   : > { %v1863_v11 = vpop.eup %1862 }
 0x510   : > { %v1018_v59 = vsel %vm1011_vm15, %v1863_v11, 0.0 }
 0x511   : > { %1019 = vadd.xlane.f32.xlu1 %v1018_v59 }
 0x522   : > { %1139 = vrot.lane.b32.xlu1 %v1859_v56, %s1939_s19 }
 0x570   : > { %v1129_v12 = vpop.xlane.xlu1 %1128 }
 0x571   : > { %v1130_v13 = vsub.f32 %v1126_v52, %v1129_v12  ;;  %v1446_v52 = vsel %vm1441_vm0, %v1861_v51, 0 }
 0x573   : > { %v1131_v14 = vmul.f32 1.442695, %v1130_v13 }
 0x575   : > { %1864 = vpow2.f32 %v1131_v14 }
 0x578   : > { %v1238_v15 = vpop.xlane.xlu0 %1237 }
 0x579   : > { %v1239_v16 = vsub.f32 %v1235_v60, %v1238_v15 }
 0x57b   : > { %v1240_v17 = vmul.f32 1.442695, %v1239_v16 }
 0x57d   : > { %1866 = vpow2.f32 %v1240_v17 }
 0x580   : > { %v1347_v18 = vpop.xlane.xlu0 %1346 }
 0x581   : > { %v1348_v19 = vsub.f32 %v1344_v3, %v1347_v18 }
 0x582   : > { %v1865_v20 = vpop.eup %1864 }
 0x583   : > { %v1349_v22 = vmul.f32 1.442695, %v1348_v19  ;;  %v1133_v23 = vsel %vm1011_vm15, %v1865_v20, 0.0 }
 0x584   : > { %1134 = vadd.xlane.f32.xlu0 %v1133_v23 }
 0x585   : > { %1868 = vpow2.f32 %v1349_v22 }
 0x58a   : > { %v1867_v24 = vpop.eup %1866 }
 0x58b   : > { %v1242_v25 = vsel %vm1011_vm15, %v1867_v24, 0.0 }
 0x58c   : > { %1243 = vadd.xlane.f32.xlu1 %v1242_v25 }
 0x592   : > { %v1869_v26 = vpop.eup %1868 }
 0x593   : > { %v1351_v28 = vsel %vm1011_vm15, %v1869_v26, 0.0 }
 0x594   : > { %1352 = vadd.xlane.f32.xlu0 %v1351_v28 }
 0x59a   : > { %v1020_v29 = vpop.xlane.xlu1 %1019 }
 0x59b   : > { %1870 = vrcp.f32 %v1020_v29 }
 0x59d   : > { %1357 = vrot.lane.b32.xlu1 %v1859_v56, %s1942_s17 }
 0x59e   : > { %v1140_v33 = vpop.permute.xlu1 %1139 }
 0x5a8   : > { %v1871_v30 = vpop.eup %1870 }
 0x5a9   : > { %v1022_v31 = vmul.f32 %v1871_v30, %v1863_v11  ;;  %v941_v11 = vld [vmem:[%s2055_s22] sm:$0xff] }
 0x5aa   : > { %1248 = vrot.lane.b32.xlu0 %v1859_v56, %s1941_s25  ;;  %v1449_v56 = vsel %vm1441_vm0, %v1860_v50, 0 }
 0x5ab   : > { %v1023_v32 = vpack.c.bf16 %v1022_v31, %v1022_v31  ;;  %1747 = vmatpush3.bf16.xpose.msra.mxu1 %v1449_v56 }
 0x5ac   : > { %1748 = vmatprep.subr.bf16.mxu1 %v1938_v27 }
 0x5ad   : > { %1707 = vmatmul.mubr.msk.bf16.vlgmr.msra.gmra.mxu0 %vm1011_vm15, %v1023_v32 }
 0x5ae   : > { %1717 = vmatpush3.bf16.msra.mxu0 %v1140_v33  ;;  %1718 = vmatprep.mubr.msk.bf16.mxu0 %vm1940_vm12, %v1938_v27 }
 0x5af   : > { %1728 = vmatprep.subr.bf16.mxu0 %v1938_v27 }
 0x5b3   : > { %1749 = vmatpush3.bf16.xpose.msra.mxu1 %v1446_v52 }
 0x60d   : > { %v1135_v34 = vpop.xlane.xlu0 %1134 }
 0x60e   : > { %1872 = vrcp.f32 %v1135_v34 }
 0x615   : > { %v1244_v35 = vpop.xlane.xlu1 %1243 }
 0x616   : > { %1874 = vrcp.f32 %v1244_v35 }
 0x619   : > { %v1358_v21 = vpop.permute.xlu1 %1357 }
 0x61b   : > { %v1873_v36 = vpop.eup %1872 }
 0x61c   : > { %v1137_v37 = vmul.f32 %v1873_v36, %v1865_v20 }
 0x61d   : > { %v1353_v38 = vpop.xlane.xlu0 %1352 }
 0x61e   : > { %1876 = vrcp.f32 %v1353_v38  ;;  %v1138_v39 = vpack.c.bf16 %v1137_v37, %v1137_v37 }
 0x620   : > { %1719 = vmatmul.mubr.msk.bf16.vlgmr.msra.gmra.mxu0 %vm1011_vm15, %v1138_v39 }
 0x621   : > { %v1249_v40 = vpop.permute.xlu0 %1248  ;;  %1730 = vmatprep.mubr.msk.bf16.mxu0 %vm1940_vm12, %v1938_v27 }
 0x622   : > { %1729 = vmatpush3.bf16.msra.mxu0 %v1249_v40 }
 0x623   : > { %v1875_v42 = vpop.eup %1874  ;;  %1740 = vmatprep.subr.bf16.mxu0 %v1938_v27 }
 0x624   : > { %v1246_v43 = vmul.f32 %v1875_v42, %v1867_v24 }
 0x626   : > { %v1247_v44 = vpack.c.bf16 %v1246_v43, %v1246_v43 }
 0x628   : > { %1731 = vmatmul.mubr.msk.bf16.vlgmr.msra.gmra.mxu0 %vm1011_vm15, %v1247_v44 }
 0x629   : > { %1741 = vmatpush3.bf16.msra.mxu0 %v1358_v21  ;;  %1742 = vmatprep.mubr.msk.bf16.mxu0 %vm1940_vm12, %v1938_v27 }
 0x62b   : > { %v1877_v45 = vpop.eup %1876 }
 0x62c   : > { %v1355_v63 = vmul.f32 %v1877_v45, %v1869_v26 }
 0x62e   : > { %v1356_v46 = vpack.c.bf16 %v1355_v63, %v1355_v63 }
 0x630   : > { %1743 = vmatmul.mubr.msk.bf16.vlgmr.msra.gmra.mxu0 %vm1011_vm15, %v1356_v46 }
 0x66d   : > { %v1067_v47 = vpop.f32.mrf.mxu0 }
 0x66f   : > { %v1708_v48 = vpop.f32.mrf.mxu0 }
 0x671   : > { %v1070_v61 = vpop.f32.mrf.mxu0 }
 0x673   : > { %v1709_v49 = vpop.f32.mrf.mxu0 }
 0x6e0   : > { %v1179_v53 = vpop.f32.mrf.mxu0 }
 0x6e1   : > { %1404 = vrot.lane.b32.xlu1 %v1179_v53, %s1944_s14 }
 0x6e2   : > { %v1720_v54 = vpop.f32.mrf.mxu0 }
 0x6e4   : > { %v1182_v55 = vpop.f32.mrf.mxu0 }
 0x6e6   : > { %v1721_v57 = vpop.f32.mrf.mxu0 }
 0x6e8   : > { %v1288_v58 = vpop.f32.mrf.mxu0 }
 0x6e9   : > { %1408 = vrot.lane.b32.xlu0 %v1288_v58, %s1945_s16 }
 0x6ea   : > { %v1732_v60 = vpop.f32.mrf.mxu0 }
 0x6ec   : > { %v1291_v41 = vpop.f32.mrf.mxu0 }
 0x6ee   : > { %v1733_v0 = vpop.f32.mrf.mxu0 }
 0x6f0   : > { %v1397_v27 = vpop.f32.mrf.mxu0 }
 0x6f1   : > { %1412 = vrot.lane.b32.xlu1 %v1397_v27, %s1946_s23 }
 0x6f2   : > { %v1744_v1 = vpop.f32.mrf.mxu0 }
 0x6f4   : > { %v1400_v2 = vpop.f32.mrf.mxu0 }
 0x6f6   : > { %v1745_v8 = vpop.f32.mrf.mxu0 }
 0x753   : > { %v1405_v3 = vpop.permute.xlu1 %1404 }
 0x754   : > { %v1415_v5 = vsel %vm956_vm11, %v1067_v47, %v1405_v3 }
 0x75b   : > { %v1409_v4 = vpop.permute.xlu0 %1408 }
 0x75c   : > { %v1416_v6 = vsel %vm1011_vm15, %v1415_v5, %v1409_v4 }
 0x763   : > { %v1413_v62 = vpop.permute.xlu1 %1412 }
 0x764   : > { %v1418_v7 = vsel %vm1417_vm1, %v1416_v6, %v1413_v62 }
 0x765   : > { %v1419_v9 = vpack.c.bf16 %v1418_v7, %v1418_v7 }
 0x767   : > { %1751 = vmatmul.mubr.msk.bf16.vlgmr.msra.gmra.mxu1 %vm1441_vm0, %v1419_v9 }
 0x827   : > { %v1485_v59 = vpop.f32.mrf.mxu1 }
 0x828   : > { %v1486_v12 = vadd.f32 %v1643_v10, %v1485_v59 }
 0x829   : > { %v1752_v13 = vpop.f32.mrf.mxu1 }
 0x82a   : > { %v1491_v14 = vadd.f32 %v1486_v12, %v941_v11 }
 0x82b   : > { %v1488_v15 = vpop.f32.mrf.mxu1 }
 0x82c   : > { %1492 = vst.msk [vmem:[%s2060_s21] sm:$0xff] %vm1441_vm0, %v1491_v14 }
 0x82d   : > { %v1753_v16 = vpop.f32.mrf.mxu1 }
 0x82e PF: > { %s2376_s20 = sld [smem:[#allocation7_spill]] }
 0x82f   : > { %s2377_s17 = sld [smem:[#allocation5_spill]] }
 0x830   : > { %s2378_s18 = sld [smem:[#allocation6_spill]] }
 0x831   : > { %s2379_s19 = sld [smem:[#allocation8_spill]] }
 0x834   : > { %s21_s21 = sadd.s32 1, %s2376_s20   ;;  %s2380_s20 = sld [smem:[#allocation9_spill]] }
 0x835   : > { %p18_p8 = scmp.ge.s32.totalorder %s21_s21, 6  }
 0x837   :  { %20 = sbr.rel (!%p18_p8) target bundleno = 3 (0x3), region = 105 }

// kernel: decoder_layer.4
= control target key start
LH: loop header
LB: loop body
LE: loop exit
PB: predicated region body
PF: predicated region fallthrough
CT: control target
= control target key end

     0   :  { %s2193_s21 = smov 0   ;;  %s2195_s22 = smov 0   ;;  %s2590_s0 = inlined_call_operand.vmem [shape: f32[2,16,32], index: 0, kind: input, shape index: {}, may-alias: {0,1}]   ;;  %s2591_s1 = inlined_call_operand.vmem [shape: f32[2,16,32], index: 1, kind: input, shape index: {}, may-alias: {0,1}]   ;;  %s2592_s2 = inlined_call_operand.vmem [shape: f32[2,16,32], index: 2, kind: input, shape index: {}]   ;;  %s2593_s3 = inlined_call_operand.vmem [shape: f32[1,32], index: 3, kind: input, shape index: {}]   ;;  %s2594_s4 = inlined_call_operand.vmem [shape: f32[1,32], index: 4, kind: input, shape index: {}]   ;;  %s2595_s5 = inlined_call_operand.vmem [shape: f32[16,8], index: 5, kind: input, shape index: {}, may-alias: {5,7}]   ;;  %s2596_s6 = inlined_call_operand.vmem [shape: f32[16,8], index: 6, kind: input, shape index: {}, may-alias: {6,8}]   ;;  %s2597_s7 = inlined_call_operand.vmem [shape: f32[16,8], index: 7, kind: input, shape index: {}, may-alias: {5,7}]   ;;  %s2598_s8 = inlined_call_operand.vmem [shape: f32[16,8], index: 8, kind: input, shape index: {}, may-alias: {6,8}]   ;;  %s2599_s9 = inlined_call_operand.vmem [shape: bf16[32,32], index: 9, kind: input, shape index: {}]   ;;  %s2600_s10 = inlined_call_operand.vmem [shape: f32[1,32], index: 10, kind: input, shape index: {}]   ;;  %s2601_s11 = inlined_call_operand.vmem [shape: bf16[64,32], index: 11, kind: input, shape index: {}]   ;;  %s2602_s12 = inlined_call_operand.vmem [shape: f32[1,64], index: 12, kind: input, shape index: {}]   ;;  %s2603_s13 = inlined_call_operand.vmem [shape: bf16[32,32], index: 13, kind: input, shape index: {}]   ;;  %s2604_s14 = inlined_call_operand.vmem [shape: f32[1,32], index: 14, kind: input, shape index: {}]   ;;  %s2605_s15 = inlined_call_operand.vmem [shape: s32[2,1,16], index: 15, kind: input, shape index: {}]   ;;  %s2606_s16 = inlined_call_operand.vmem [shape: f32[2,16,32], index: 16, kind: output, shape index: {}]  }
   0x1   :  { %2615 = sst [smem:[#allocation10_spill]] %s2590_s0  ;;  %s2197_s23 = smov 0  }
   0x2   :  { %2616 = sst [smem:[#allocation11_spill]] %s2595_s5  ;;  %s2199_s24 = smov 0  }
   0x3   :  { %2617 = sst [smem:[#allocation12_spill]] %s2596_s6  ;;  %s2201_s25 = smov 0  }
   0x4   :  { %2618 = sst [smem:[#allocation13_spill]] %s2597_s7 }
   0x5   :  { %2619 = sst [smem:[#allocation14_spill]] %s2598_s8 }
   0x6   :  { %2620 = sst [smem:[#allocation15_spill]] %s2600_s10 }
   0x7   :  { %2621 = sst [smem:[#allocation16_spill]] %s2603_s13 }
   0x8   :  { %2622 = sst [smem:[#allocation17_spill]] %s2604_s14 }
   0x9 LB: > { %2623 = sst [smem:[#allocation5_spill]] %s2078_s23  ;;  %s35_s26 = sadd.s32 1, %s2078_s23  ;;  %s2086_s25 = sphi %s2201_s25, %s26_s25   ;;  %s2082_s24 = sphi %s2199_s24, %s2641_s24   ;;  %s2078_s23 = sphi %s2197_s23, %s2640_s23   ;;  %s2074_s22 = sphi %s2195_s22, %s2639_s22   ;;  %s2070_s21 = sphi %s2193_s21, %s2638_s21  }
   0xa   : > { %2624 = sst [smem:[#allocation6_spill]] %s2082_s24  ;;  %s38_s27 = sadd.s32 1, %s2082_s24 }
   0xb   : > { %2625 = sst [smem:[#allocation7_spill]] %s2086_s25  ;;  %p36_p0 = scmp.ge.s32.totalorder %s35_s26, 2 }
   0xc   : > { %p1795_p1 = scmp.ge.s32.totalorder %s2086_s25, 1  ;;  %p509_p2 = scmp.lt.s32.totalorder %s2086_s25, 5 }
   0xd   : > { %s2643_s26 = smov (%p36_p0, %s35_s26), 0  ;;  %s2645_s27 = smov (!%p36_p0, %s38_s27), %s2082_s24 }
   0xe   : > { %2626 = sst [smem:[#allocation8_spill]] %s2643_s26  ;;  %p510_p3 = pnand %p1795_p1, %p509_p2 }
   0xf   : > { %p40_p4 = scmp.ge.s32.totalorder %s2645_s27, 2  ;;  %p578_p5 = scmp.lt.s32.totalorder (!%p510_p3), %s2074_s22, 1 }
  0x10   : > { %513 = sbr.rel (%p510_p3) target bundleno = 1981 (0x7bd), region = 84  ;;  %p585_p6 = scmp.lt.s32.totalorder (!%p510_p3), %s2070_s21, 1 }
  0x11   : > { %s2647_s27 = smov (%p40_p4, %s2645_s27), 0  ;;  %s2628_s18 = sld [smem:[#allocation10_spill]] (!%p510_p3) }
  0x12   : > { %2627 = sst [smem:[#allocation9_spill]] %s2647_s27  ;;  %p1804_p7 = scmp.ne.s32.totalorder (!%p510_p3), %s2070_s21, 0 }
  0x15   : > { %s2649_s22 = smov (!%p578_p5, %s2074_s22), 1  ;;  %s2629_s25 = sld [smem:[#allocation15_spill]] (!%p1804_p7) }
  0x16   : > { %s586_s28 = scalar_select %p585_p6, %s2070_s21, 1 }
  0x17   : > { %s1842_s29 = sshll.u32 %s2649_s22, 4  ;;  %s1798_s30 = sshll.u32 %s2649_s22, 1 }
  0x18   : > { %s582_s19 = scalar_lea.vmem %s2628_s18, %s1842_s29  ;;  %s588_s20 = sadd.s32 %s1798_s30, %s586_s28 }
  0x19   : > { %s1799_s26 = sshll.u32 %s588_s20, 3  ;;  %s2237_s23 = scalar_lea.vmem %s2592_s2, %s1842_s29 }
  0x1a   : > { %s2242_s13 = scalar_lea.vmem %s2591_s1, %s1799_s26  ;;  %s598_s7 = scalar_lea.vmem %s2605_s15, %s2649_s22 }
  0x1b   : > { %s2251_s0 = scalar_lea.vmem %s2606_s16, %s1799_s26  ;;  %611 = sbr.rel (%p1804_p7) target bundleno = 817 (0x331), region = 88 }
  0x1c   : > { %s2090_s18 = smov (!%p1804_p7), 124   ;;  %s2092_s20 = smov (!%p1804_p7), 108  }
  0x1d   : > { %s2093_s26 = smov (!%p1804_p7), 100   ;;  %s2094_s27 = smov (!%p1804_p7), 4  }
  0x1e   : > { %s2630_s29 = sld [smem:[#allocation11_spill]] (!%p1804_p7)  ;;  %s2096_s8 = smov (!%p1804_p7), 16  }
  0x1f   : > { %s2631_s14 = sld [smem:[#allocation13_spill]] (!%p1804_p7)  ;;  %s2097_s30 = smov (!%p1804_p7), 24  }
  0x20   : > { %v612_v0 = vld [vmem:[%s582_s19] sm:$0xff]  ;;  %vm616_vm0 = vcmask 261120   ;;  %v613_v1 = vld [vmem:[%s582_s19 + $0x8] sm:$0xff]  ;;  %v2013_v4 = vld [vmem:[%s2601_s11 + $0x18] sm:$0xff]   ;;  %v2088_v5 = vmov 0.0   ;;  %vm2089_vm1 = vmmov 0  }
  0x21   : > { %v617_v2 = vsel %vm616_vm0, %v612_v0, 0.0  ;;  %v620_v3 = vsel %vm616_vm0, %v613_v1, 0.0  ;;  %1885 = vmatprep.subr.bf16.mxu1 %v2088_v5  ;;  %1893 = vmatprep.mubr.msk.bf16.mxu1 %vm2089_vm1, %v2088_v5  ;;  %v798_v6 = vsel %vm616_vm0, %v2013_v4, 0  ;;  %v2014_v7 = vld [vmem:[%s2601_s11 + $0x10] sm:$0xff]   ;;  %v2015_v9 = vld [vmem:[%s2601_s11 + $0x8] sm:$0xff]   ;;  %v2016_v11 = vld [vmem:[%s2601_s11] sm:$0xff]  }
  0x22   : > { %618 = vadd.xlane.f32.xlu0 %v617_v2  ;;  %1877 = vmatprep.subr.bf16.mxu0 %v2088_v5  ;;  %v795_v8 = vsel %vm616_vm0, %v2014_v7, 0  ;;  %v792_v10 = vsel %vm616_vm0, %v2015_v9, 0  ;;  %v789_v12 = vsel %vm616_vm0, %v2016_v11, 0  ;;  %v747_v13 = vld [vmem:[%s2237_s23] sm:$0xff]  ;;  %v748_v14 = vld [vmem:[%s2237_s23 + $0x8] sm:$0xff]  ;;  %s2091_s19 = smov 116  }
  0x23   : > { %1881 = vmatprep.mubr.msk.bf16.mxu0 %vm2089_vm1, %v2088_v5  ;;  %1886 = vmatpush3.bf16.xpose.msra.mxu1 %v798_v6  ;;  %v749_v15 = vpack.c.bf16 %v748_v14, %v747_v13  ;;  %v2017_v26 = vld [vmem:[%s2599_s9 + $0x8] sm:$0xff]   ;;  %v2018_v28 = vld [vmem:[%s2599_s9] sm:$0xff]   ;;  %vm863_vm6 = vcmask 31744   ;;  %vm1066_vm7 = vcmask 64512   ;;  %vm1069_vm8 = vcmask 130048  }
  0x24   : > { %1887 = vmatprep.subr.bf16.mxu1 %v2088_v5  ;;  %v704_v27 = vsel %vm616_vm0, %v2017_v26, 0  ;;  %v701_v29 = vsel %vm616_vm0, %v2018_v28, 0  ;;  %v1811_v30 = vld [vmem:[%s2602_s12] ss:$0 sm:$0xff]  ;;  %v2350_v9 = vld [vmem:[%s2630_s29 + $0x8] sm:$0xff]  ;;  %vm1072_vm9 = vcmask 195584  }
  0x25   : > { %1878 = vmatpush3.bf16.xpose.msra.mxu0 %v704_v27  ;;  %v1805_v53 = vld [vmem:[%s2593_s3] ss:$0 sm:$0xff]  ;;  %vm1083_vm10 = vcmask 257024  }
  0x26   : > { %621 = vadd.xlane.f32.xlu0 %v620_v3  ;;  %1879 = vmatprep.subr.bf16.mxu0 %v2088_v5  ;;  %v1806_v59 = vld [vmem:[%s2594_s4] ss:$0 sm:$0xff] }
  0x27   : > { %v2361_v11 = vld [vmem:[%s2631_s14] sm:$0xff] }
  0x2b   : > { %1888 = vmatpush3.bf16.xpose.msra.mxu1 %v795_v8  ;;  %v2345_v8 = vld [vmem:[%s2630_s29] sm:$0xff] }
  0x2c   : > { %1889 = vmatprep.subr.bf16.mxu1 %v2088_v5 }
  0x2d   : > { %1880 = vmatpush3.bf16.xpose.msra.mxu0 %v701_v29 }
  0x33   : > { %1890 = vmatpush3.bf16.xpose.msra.mxu1 %v792_v10 }
  0x34   : > { %1891 = vmatprep.subr.bf16.mxu1 %v2088_v5 }
  0x3b   : > { %1892 = vmatpush3.bf16.xpose.msra.mxu1 %v789_v12  ;;  %v2366_v12 = vld [vmem:[%s2631_s14 + $0x8] sm:$0xff] }
  0x42   : > { %1894 = vmatmul.mubr.msk.bf16.vlgmr.msra.gmra.mxu1 %vm616_vm0, %v749_v15 }
  0xab   : > { %v619_v16 = vpop.xlane.xlu0 %618 }
  0xac   : > { %v624_v17 = vmul.f32 0.03125, %v619_v16 }
  0xae   : > { %v626_v18 = vsub.f32 %v612_v0, %v624_v17  ;;  %v1807_v0 = vld [vmem:[%s2629_s25] ss:$0 sm:$0xff]  ;;  %s2632_s25 = sld [smem:[#allocation14_spill]] }
  0xaf   : > { %v622_v19 = vpop.xlane.xlu0 %621 }
  0xb0   : > { %v625_v20 = vmul.f32 0.03125, %v622_v19  ;;  %v628_v21 = vmul.f32 %v626_v18, %v626_v18  ;;  %v645_v55 = vmul.f32 %v1805_v53, %v626_v18 }
  0xb2   : > { %v627_v22 = vsub.f32 %v613_v1, %v625_v20  ;;  %v630_v23 = vsel %vm616_vm0, %v628_v21, 0.0 }
  0xb3   : > { %631 = vadd.xlane.f32.xlu1 %v630_v23 }
  0xb4   : > { %v629_v24 = vmul.f32 %v627_v22, %v627_v22  ;;  %v646_v56 = vmul.f32 %v1805_v53, %v627_v22  ;;  %v2379_v15 = vld [vmem:[%s2632_s25 + $0x8] sm:$0xff] }
  0xb6   : > { %v633_v25 = vsel %vm616_vm0, %v629_v24, 0.0 }
  0xb7   : > { %634 = vadd.xlane.f32.xlu1 %v633_v25 }
 0x102   : > { %v834_v31 = vpop.f32.mrf.mxu1 }
 0x103   : > { %v2288_v32 = vadd.f32 %v1811_v30, %v834_v31 }
 0x104   : > { %v1895_v33 = vpop.f32.mrf.mxu1 }
 0x105   : > { %874 = vrot.lane.b32.xlu1 %v2288_v32, %s2090_s18  ;;  %924 = vrot.lane.b32.xlu0 %v2288_v32, %s2091_s19 }
 0x106   : > { %v837_v34 = vpop.f32.mrf.mxu1 }
 0x107   : > { %v2294_v35 = vadd.f32 %v1811_v30, %v837_v34 }
 0x108   : > { %v1896_v36 = vpop.f32.mrf.mxu1 }
 0x109   : > { %876 = vrot.lane.b32.xlu1 %v2294_v35, %s2090_s18  ;;  %982 = vrot.lane.b32.xlu0 %v2288_v32, %s2092_s20 }
 0x10d   : > { %926 = vrot.lane.b32.xlu1 %v2294_v35, %s2091_s19 }
 0x111   : > { %984 = vrot.lane.b32.xlu1 %v2294_v35, %s2092_s20 }
 0x13c   : > { %v632_v37 = vpop.xlane.xlu1 %631 }
 0x13d   : > { %v637_v38 = vmul.f32 0.032258064, %v632_v37 }
 0x13f   : > { %2019 = vrsqrt.f32 %v637_v38  ;;  %vm649_vm2 = vcmp.eq.f32.partialorder %v637_v38, inf  ;;  %v652_v43 = vand.u32 2147483648, %v637_v38  ;;  %vm651_vm3 = vcmp.eq.f32.partialorder %v637_v38, 0.0 }
 0x140   : > { %v635_v39 = vpop.xlane.xlu1 %634 }
 0x141   : > { %v638_v40 = vmul.f32 0.032258064, %v635_v39 }
 0x143   : > { %2021 = vrsqrt.f32 %v638_v40  ;;  %vm656_vm4 = vcmp.eq.f32.partialorder %v638_v40, inf  ;;  %v659_v49 = vand.u32 2147483648, %v638_v40  ;;  %vm658_vm5 = vcmp.eq.f32.partialorder %v638_v40, 0.0 }
 0x14c   : > { %v2020_v41 = vpop.eup %2019 }
 0x14d   : > { %v648_v42 = vmul.f32 %v2020_v41, %v637_v38 }
 0x14f   : > { %v650_v44 = vsel %vm649_vm2, %v637_v38, %v648_v42 }
 0x150   : > { %v2022_v45 = vpop.eup %2021  ;;  %v653_v46 = vsel %vm651_vm3, %v652_v43, %v650_v44 }
 0x151   : > { %v661_v47 = vadd.f32 1e-06, %v653_v46  ;;  %v655_v48 = vmul.f32 %v2022_v45, %v638_v40 }
 0x153   : > { %2023 = vrcp.f32 %v661_v47  ;;  %v657_v50 = vsel %vm656_vm4, %v638_v40, %v655_v48 }
 0x154   : > { %v660_v51 = vsel %vm658_vm5, %v659_v49, %v657_v50 }
 0x155   : > { %v662_v52 = vadd.f32 1e-06, %v660_v51 }
 0x157   : > { %2025 = vrcp.f32 %v662_v52 }
 0x160   : > { %v2024_v54 = vpop.eup %2023 }
 0x161   : > { %v664_v57 = vmul.f32 %v2024_v54, %v645_v55 }
 0x163   : > { %v673_v61 = vadd.f32 %v1806_v59, %v664_v57 }
 0x164   : > { %v2026_v58 = vpop.eup %2025 }
 0x165   : > { %v666_v60 = vmul.f32 %v2026_v58, %v646_v56 }
 0x167   : > { %v674_v62 = vadd.f32 %v1806_v59, %v666_v60 }
 0x169   : > { %v675_v63 = vpack.c.bf16 %v674_v62, %v673_v61  ;;  %v1848_v61 = vpack.c.bf16 %v2288_v32, %v2288_v32 }
 0x16b   : > { %1882 = vmatmul.mubr.msk.bf16.vlgmr.msra.gmra.mxu0 %vm616_vm0, %v675_v63 }
 0x177   : > { %v2336_v7 = vpop.permute.xlu1 %874  ;;  %v925_v14 = vpop.permute.xlu0 %924 }
 0x178   : > { %v930_v18 = vsel %vm863_vm6, %v925_v14, %v2336_v7 }
 0x17b   : > { %v2356_v10 = vpop.permute.xlu1 %876  ;;  %v983_v22 = vpop.permute.xlu0 %982 }
 0x17c   : > { %v988_v24 = vsel %vm863_vm6, %v983_v22, %v925_v14 }
 0x17f   : > { %v927_v13 = vpop.permute.xlu1 %926 }
 0x180   : > { %v931_v16 = vsel %vm863_vm6, %v927_v13, %v2356_v10 }
 0x181   : > { %v943_v19 = vmul.f32 %v931_v16, %v2379_v15 }
 0x183   : > { %v985_v21 = vpop.permute.xlu1 %984 }
 0x184   : > { %v989_v23 = vsel %vm863_vm6, %v985_v21, %v927_v13 }
 0x185   : > { %v999_v25 = vmul.f32 %v989_v23, %v2379_v15 }
 0x22b   : > { %v740_v1 = vpop.f32.mrf.mxu0 }
 0x22c   : > { %v2314_v2 = vadd.f32 %v1807_v0, %v740_v1 }
 0x22d   : > { %v1883_v3 = vpop.f32.mrf.mxu0 }
 0x22e   : > { %851 = vrot.lane.b32.xlu0 %v2314_v2, %s2090_s18  ;;  %v866_v59 = vmul.f32 %v2345_v8, %v2314_v2 }
 0x22f   : > { %v743_v4 = vpop.f32.mrf.mxu0 }
 0x230   : > { %v2318_v5 = vadd.f32 %v1807_v0, %v743_v4  ;;  %v1849_v0 = vpack.c.bf16 %v2294_v35, %v2294_v35 }
 0x231   : > { %v1884_v6 = vpop.f32.mrf.mxu0 }
 0x232   : > { %894 = vrot.lane.b32.xlu0 %v2314_v2, %s2091_s19  ;;  %853 = vrot.lane.b32.xlu1 %v2318_v5, %s2090_s18  ;;  %s2095_s18 = smov 8  }
 0x236   : > { %954 = vrot.lane.b32.xlu0 %v2314_v2, %s2092_s20  ;;  %896 = vrot.lane.b32.xlu1 %v2318_v5, %s2091_s19 }
 0x23a   : > { %1010 = vrot.lane.b32.xlu0 %v2314_v2, %s2093_s26  ;;  %956 = vrot.lane.b32.xlu1 %v2318_v5, %s2092_s20  ;;  %s2634_s20 = sld [smem:[#allocation12_spill]] }
 0x23e   : > { %1038 = vrot.lane.b32.xlu0 %v2288_v32, %s2093_s26  ;;  %1012 = vrot.lane.b32.xlu1 %v2318_v5, %s2093_s26 }
 0x240   : > { %v843_v28 = vld [vmem:[%s2634_s20] sm:$0xff]  ;;  %v844_v34 = vld [vmem:[%s2634_s20 + $0x8] sm:$0xff] }
 0x242   : > { %857 = vrot.lane.b32.xlu0 %v2314_v2, %s2094_s27  ;;  %1040 = vrot.lane.b32.xlu1 %v2294_v35, %s2093_s26  ;;  %s2633_s26 = smov %s2632_s25 }
 0x243   : > { %v2386_v17 = vld [vmem:[%s2633_s26] sm:$0xff] }
 0x244   : > { %v942_v20 = vmul.f32 %v930_v18, %v2386_v17  ;;  %v998_v26 = vmul.f32 %v988_v24, %v2386_v17 }
 0x246   : > { %880 = vrot.lane.b32.xlu0 %v2288_v32, %s2094_s27  ;;  %882 = vrot.lane.b32.xlu1 %v2294_v35, %s2094_s27 }
 0x24a   : > { %904 = vrot.lane.b32.xlu0 %v2345_v8, %s2095_s18  ;;  %906 = vrot.lane.b32.xlu1 %v2350_v9, %s2095_s18 }
 0x24e   : > { %934 = vrot.lane.b32.xlu0 %v2361_v11, %s2095_s18  ;;  %936 = vrot.lane.b32.xlu1 %v2366_v12, %s2095_s18 }
 0x252   : > { %962 = vrot.lane.b32.xlu0 %v2345_v8, %s2096_s8  ;;  %964 = vrot.lane.b32.xlu1 %v2350_v9, %s2096_s8 }
 0x256   : > { %990 = vrot.lane.b32.xlu0 %v2361_v11, %s2096_s8  ;;  %992 = vrot.lane.b32.xlu1 %v2366_v12, %s2096_s8 }
 0x25a   : > { %948 = vrot.lane.b32.xlu1 %v943_v19, %s2095_s18  ;;  %946 = vrot.lane.b32.xlu0 %v942_v20, %s2095_s18  ;;  %v867_v20 = vmul.f32 %v2350_v9, %v2318_v5 }
 0x25e   : > { %1020 = vrot.lane.b32.xlu1 %v2350_v9, %s2097_s30  ;;  %1018 = vrot.lane.b32.xlu0 %v2345_v8, %s2097_s30 }
 0x262   : > { %1048 = vrot.lane.b32.xlu1 %v2366_v12, %s2097_s30  ;;  %1046 = vrot.lane.b32.xlu0 %v2361_v11, %s2097_s30 }
 0x266   : > { %1004 = vrot.lane.b32.xlu1 %v999_v25, %s2096_s8  ;;  %1002 = vrot.lane.b32.xlu0 %v998_v26, %s2096_s8 }
 0x26a   : > { %859 = vrot.lane.b32.xlu1 %v2318_v5, %s2094_s27  ;;  %s2098_s27 = smov 96  }
 0x2a0   : > { %v852_v27 = vpop.permute.xlu0 %851 }
 0x2a4   : > { %v854_v29 = vpop.permute.xlu1 %853  ;;  %v895_v30 = vpop.permute.xlu0 %894 }
 0x2a5   : > { %v900_v31 = vsel %vm863_vm6, %v895_v30, %v852_v27 }
 0x2a6   : > { %v912_v33 = vmul.f32 %v900_v31, %v843_v28 }
 0x2a8   : > { %v897_v36 = vpop.permute.xlu1 %896  ;;  %916 = vrot.lane.b32.xlu0 %v912_v33, %s2095_s18  ;;  %v955_v37 = vpop.permute.xlu0 %954 }
 0x2a9   : > { %v901_v38 = vsel %vm863_vm6, %v897_v36, %v854_v29  ;;  %v960_v39 = vsel %vm863_vm6, %v955_v37, %v895_v30 }
 0x2aa   : > { %v913_v40 = vmul.f32 %v901_v38, %v844_v34  ;;  %v970_v41 = vmul.f32 %v960_v39, %v843_v28 }
 0x2ac   : > { %918 = vrot.lane.b32.xlu1 %v913_v40, %s2095_s18  ;;  %v957_v42 = vpop.permute.xlu1 %956  ;;  %974 = vrot.lane.b32.xlu0 %v970_v41, %s2096_s8  ;;  %v1011_v43 = vpop.permute.xlu0 %1010  ;;  %v888_v40 = vmul.f32 %v2361_v11, %v2288_v32 }
 0x2ad   : > { %v961_v44 = vsel %vm863_vm6, %v957_v42, %v897_v36  ;;  %v1016_v45 = vsel %vm863_vm6, %v1011_v43, %v955_v37 }
 0x2ae   : > { %v971_v46 = vmul.f32 %v961_v44, %v844_v34  ;;  %v1026_v47 = vmul.f32 %v1016_v45, %v843_v28 }
 0x2b0   : > { %976 = vrot.lane.b32.xlu1 %v971_v46, %s2096_s8  ;;  %v1013_v48 = vpop.permute.xlu1 %1012  ;;  %1030 = vrot.lane.b32.xlu0 %v1026_v47, %s2097_s30  ;;  %v1039_v49 = vpop.permute.xlu0 %1038 }
 0x2b1   : > { %v1017_v50 = vsel %vm863_vm6, %v1013_v48, %v957_v42  ;;  %v1044_v51 = vsel %vm863_vm6, %v1039_v49, %v983_v22 }
 0x2b2   : > { %v1027_v52 = vmul.f32 %v1017_v50, %v844_v34  ;;  %v1054_v53 = vmul.f32 %v1044_v51, %v2386_v17 }
 0x2b4   : > { %1032 = vrot.lane.b32.xlu1 %v1027_v52, %s2097_s30  ;;  %v1041_v54 = vpop.permute.xlu1 %1040  ;;  %1058 = vrot.lane.b32.xlu0 %v1054_v53, %s2097_s30  ;;  %v858_v55 = vpop.permute.xlu0 %857 }
 0x2b5   : > { %v1045_v56 = vsel %vm863_vm6, %v1041_v54, %v985_v21  ;;  %v864_v57 = vsel %vm863_vm6, %v852_v27, %v858_v55 }
 0x2b6   : > { %v1055_v58 = vmul.f32 %v1045_v56, %v2379_v15  ;;  %v868_v60 = vmul.f32 %v864_v57, %v843_v28 }
 0x2b8   : > { %v870_v62 = vadd.f32 %v868_v60, %v866_v59  ;;  %1060 = vrot.lane.b32.xlu1 %v1055_v58, %s2097_s30  ;;  %v883_v63 = vpop.permute.xlu1 %882  ;;  %1108 = vrot.lane.b32.xlu0 %v1848_v61, %s2098_s27  ;;  %v881_v23 = vpop.permute.xlu0 %880  ;;  %v889_v58 = vmul.f32 %v2366_v12, %v2294_v35 }
 0x2b9   : > { %v887_v39 = vsel %vm863_vm6, %v2356_v10, %v883_v63 }
 0x2ba   : > { %v891_v46 = vmul.f32 %v887_v39, %v2379_v15 }
 0x2bc   : > { %1110 = vrot.lane.b32.xlu1 %v1849_v0, %s2098_s27  ;;  %v907_v1 = vpop.permute.xlu1 %906  ;;  %v905_v24 = vpop.permute.xlu0 %904  ;;  %v893_v12 = vadd.f32 %v891_v46, %v889_v58 }
 0x2bd   : > { %v910_v37 = vmul.f32 %v905_v24, %v2314_v2  ;;  %v911_v44 = vmul.f32 %v907_v1, %v2318_v5 }
 0x2c0   : > { %v937_v3 = vpop.permute.xlu1 %936  ;;  %v935_v25 = vpop.permute.xlu0 %934 }
 0x2c1   : > { %v941_v52 = vmul.f32 %v937_v3, %v2294_v35 }
 0x2c4   : > { %v965_v4 = vpop.permute.xlu1 %964  ;;  %v963_v26 = vpop.permute.xlu0 %962 }
 0x2c5   : > { %v968_v38 = vmul.f32 %v963_v26, %v2314_v2  ;;  %v969_v10 = vmul.f32 %v965_v4, %v2318_v5 }
 0x2c8   : > { %v993_v6 = vpop.permute.xlu1 %992  ;;  %v991_v27 = vpop.permute.xlu0 %990 }
 0x2c9   : > { %v996_v47 = vmul.f32 %v991_v27, %v2288_v32  ;;  %v997_v59 = vmul.f32 %v993_v6, %v2294_v35 }
 0x2cc   : > { %v949_v13 = vpop.permute.xlu1 %948  ;;  %v947_v28 = vpop.permute.xlu0 %946 }
 0x2cd   : > { %v953_v60 = vadd.f32 %v949_v13, %v941_v52 }
 0x2d0   : > { %v1021_v8 = vpop.permute.xlu1 %1020  ;;  %v1019_v30 = vpop.permute.xlu0 %1018 }
 0x2d1   : > { %v1024_v45 = vmul.f32 %v1019_v30, %v2314_v2  ;;  %v1025_v15 = vmul.f32 %v1021_v8, %v2318_v5 }
 0x2d4   : > { %v2445_v14 = vpop.permute.xlu1 %1048  ;;  %v1047_v31 = vpop.permute.xlu0 %1046 }
 0x2d5   : > { %v1052_v56 = vmul.f32 %v1047_v31, %v2288_v32  ;;  %v1053_v6 = vmul.f32 %v2445_v14, %v2294_v35 }
 0x2d8   : > { %v1005_v16 = vpop.permute.xlu1 %1004  ;;  %v1003_v33 = vpop.permute.xlu0 %1002 }
 0x2d9   : > { %v1008_v53 = vadd.f32 %v1003_v33, %v996_v47  ;;  %v1009_v5 = vadd.f32 %v1005_v16, %v997_v59  ;;  %v1087_v16 = vsel %vm1066_vm7, %v893_v12, %v953_v60 }
 0x2db   : > { %v1089_v24 = vsel %vm1069_vm8, %v1087_v16, %v1009_v5 }
 0x2dc   : > { %v860_v18 = vpop.permute.xlu1 %859 }
 0x2dd   : > { %v865_v19 = vsel %vm863_vm6, %v854_v29, %v860_v18  ;;  %v886_v29 = vsel %vm863_vm6, %v2336_v7, %v881_v23  ;;  %v940_v7 = vmul.f32 %v935_v25, %v2288_v32 }
 0x2de   : > { %v869_v21 = vmul.f32 %v865_v19, %v844_v34  ;;  %v890_v43 = vmul.f32 %v886_v29, %v2386_v17 }
 0x2df   : > { %v952_v49 = vadd.f32 %v947_v28, %v940_v7 }
 0x2e0   : > { %v871_v22 = vadd.f32 %v869_v21, %v867_v20  ;;  %v892_v55 = vadd.f32 %v890_v43, %v888_v40 }
 0x2e2   : > { %v1086_v0 = vsel %vm1066_vm7, %v892_v55, %v952_v49 }
 0x2e3   : > { %v1088_v32 = vsel %vm1069_vm8, %v1086_v0, %v1008_v53 }
 0x31a   : > { %v917_v36 = vpop.permute.xlu0 %916 }
 0x31b   : > { %v922_v41 = vadd.f32 %v917_v36, %v910_v37 }
 0x31d   : > { %v1067_v50 = vsel %vm1066_vm7, %v870_v62, %v922_v41 }
 0x31e   : > { %v919_v9 = vpop.permute.xlu1 %918  ;;  %v975_v34 = vpop.permute.xlu0 %974 }
 0x31f   : > { %v980_v42 = vadd.f32 %v975_v34, %v968_v38  ;;  %v923_v51 = vadd.f32 %v919_v9, %v911_v44 }
 0x321   : > { %v1070_v54 = vsel %vm1069_vm8, %v1067_v50, %v980_v42  ;;  %v1068_v1 = vsel %vm1066_vm7, %v871_v22, %v923_v51 }
 0x322   : > { %v977_v11 = vpop.permute.xlu1 %976  ;;  %v1031_v48 = vpop.permute.xlu0 %1030 }
 0x323   : > { %v1036_v17 = vadd.f32 %v1031_v48, %v1024_v45  ;;  %v981_v2 = vadd.f32 %v977_v11, %v969_v10 }
 0x325   : > { %v1073_v57 = vsel %vm1072_vm9, %v1070_v54, %v1036_v17  ;;  %v1071_v8 = vsel %vm1069_vm8, %v1068_v1, %v981_v2 }
 0x326   : > { %v1844_v61 = vpack.c.bf16 %v1073_v57, %v1073_v57  ;;  %v1033_v62 = vpop.permute.xlu1 %1032  ;;  %v1059_v63 = vpop.permute.xlu0 %1058 }
 0x327   : > { %v1037_v3 = vadd.f32 %v1033_v62, %v1025_v15  ;;  %v1064_v4 = vadd.f32 %v1059_v63, %v1052_v56 }
 0x328   : > { %1084 = vst.msk [vmem:[#allocation2] sm:$0xf] %vm1083_vm10, %v1844_v61 }
 0x329   : > { %v1074_v13 = vsel %vm1072_vm9, %v1071_v8, %v1037_v3  ;;  %v1090_v18 = vsel %vm1072_vm9, %v1088_v32, %v1064_v4 }
 0x32a   : > { %v1845_v19 = vpack.c.bf16 %v1074_v13, %v1074_v13  ;;  %v1846_v20 = vpack.c.bf16 %v1090_v18, %v1090_v18  ;;  %v1061_v21 = vpop.permute.xlu1 %1060  ;;  %v1109_v22 = vpop.permute.xlu0 %1108 }
 0x32b   : > { %v1065_v23 = vadd.f32 %v1061_v21, %v1053_v6  ;;  %1114 = vst.msk [vmem:[#allocation4] sm:$0xf] %vm1083_vm10, %v1109_v22 }
 0x32c   : > { %1085 = vst.msk [vmem:[#allocation2 + $0x4] sm:$0xf] %vm1083_vm10, %v1845_v19  ;;  %1100 = vst.msk [vmem:[#allocation3] sm:$0xf] %vm1083_vm10, %v1846_v20 }
 0x32d   : > { %v1091_v35 = vsel %vm1072_vm9, %v1089_v24, %v1065_v23 }
 0x32e   : > { %v1847_v14 = vpack.c.bf16 %v1091_v35, %v1091_v35  ;;  %v1111_v25 = vpop.permute.xlu1 %1110 }
 0x32f   : > { %1115 = vst.msk [vmem:[#allocation4 + $0x4] sm:$0xf] %vm1083_vm10, %v1111_v25 }
 0x330   : > { %1101 = vst.msk [vmem:[#allocation3 + $0x4] sm:$0xf] %vm1083_vm10, %v1847_v14 }
 0x331 PF: > { %v2099_v27 = vmov 0.0   ;;  %vm1133_vm11 = vcmask 64512   ;;  %s2100_s18 = smov 120   ;;  %vm2101_vm12 = vmmov 0   ;;  %s1823_s8 = sshll.u32 %s2070_s21, 3  ;;  %v1182_v41 = vlaneseq }
 0x332   : > { %1897 = vmatprep.subr.bf16.mxu0 %v2099_v27  ;;  %1909 = vmatprep.subr.bf16.mxu1 %v2099_v27  ;;  %s2102_s10 = smov 112   ;;  %s1119_s24 = sshra.s32 %s1823_s8, 3  ;;  %v1117_v42 = vld [vmem:[%s598_s7] sm:$0x1]  ;;  %v2104_v7 = vmov 0   ;;  %vm1188_vm15 = vcmask 130048  }
 0x333   : > { %1899 = vmatprep.mubr.msk.bf16.mxu0 %vm2101_vm12, %v2099_v27  ;;  %s1824_s25 = sshll.u32 %s1119_s24, 2  ;;  %1911 = vmatprep.mubr.msk.bf16.mxu1 %vm2101_vm12, %v2099_v27  ;;  %s2103_s21 = smov 104   ;;  %v1183_v43 = vshrl.u32 %v1182_v41, 7  ;;  %vm1180_vm13 = vcmp.eq.s32.totalorder %v1117_v42, 0  ;;  %vm1618_vm0 = vcmask 261120   ;;  %vm1594_vm1 = vcmask 195584  }
 0x334   : > { %s1122_s28 = scalar_lea.vmem [#allocation2], %s1824_s25  ;;  %v1181_v45 = vsel %vm1180_vm13, 1, %v2104_v7  ;;  %s2635_s17 = sld [smem:[#allocation16_spill]] }
 0x335   : > { %v1123_v30 = vld [vmem:[%s1122_s28] sm:$0xf]  ;;  %v1184_v44 = vsub.s32 0, %v1183_v43  ;;  %s2105_s5 = smov 8   ;;  %s2106_s27 = smov 16  }
 0x336   : > { %v1829_v31 = vcombine.low %v1123_v30, %v1123_v30  ;;  %v2029_v51 = vld [vmem:[#allocation4] sm:$0xff]   ;;  %s2636_s24 = sld [smem:[#allocation17_spill]] }
 0x337   : > { %v2027_v26 = vld [vmem:[#allocation3] sm:$0xff]   ;;  %v1185_v46 = vrot.slane %v1181_v45, %v1184_v44 }
 0x338   : > { %1255 = vrot.lane.b32.xlu0 %v2027_v26, %s2100_s18  ;;  %v1138_v28 = vsel %vm1133_vm11, %v2027_v26, 0  ;;  %1364 = vrot.lane.b32.xlu1 %v2027_v26, %s2102_s10 }
 0x339   : > { %1898 = vmatpush3.bf16.xpose.msra.mxu0 %v1138_v28  ;;  %vm1186_vm14 = vcmp.eq.s32.totalorder %v1185_v46, 1 }
 0x33a   : > { %1903 = vmatprep.subr.bf16.mxu0 %v2099_v27 }
 0x33c   : > { %1253 = vrot.lane.b32.xlu0 %v1829_v31, %s2100_s18  ;;  %1362 = vrot.lane.b32.xlu1 %v1829_v31, %s2102_s10 }
 0x340   : > { %1900 = vmatmul.mubr.msk.bf16.vlgmr.msra.gmra.mxu0 %vm1133_vm11, %v1123_v30  ;;  %1473 = vrot.lane.b32.xlu0 %v2027_v26, %s2103_s21 }
 0x341   : > { %1905 = vmatprep.mubr.msk.bf16.mxu0 %vm2101_vm12, %v2099_v27  ;;  %1471 = vrot.lane.b32.xlu1 %v1829_v31, %s2103_s21 }
 0x342   : > { %1904 = vmatpush3.bf16.msra.mxu0 %v2029_v51 }
 0x343   : > { %1915 = vmatprep.subr.bf16.mxu0 %v2099_v27 }
 0x3aa   : > { %v1256_v33 = vpop.permute.xlu0 %1255  ;;  %v1365_v37 = vpop.permute.xlu1 %1364 }
 0x3ab   : > { %v1261_v36 = vsel %vm1133_vm11, %v1256_v33, 0  ;;  %v1370_v29 = vsel %vm1133_vm11, %v1365_v37, 0 }
 0x3ac   : > { %1910 = vmatpush3.bf16.xpose.msra.mxu1 %v1261_v36 }
 0x3ad   : > { %1921 = vmatprep.subr.bf16.mxu1 %v2099_v27 }
 0x3ae   : > { %v1254_v38 = vpop.permute.xlu0 %1253  ;;  %v1363_v34 = vpop.permute.xlu1 %1362 }
 0x3b2   : > { %v1474_v9 = vpop.permute.xlu0 %1473 }
 0x3b3   : > { %1912 = vmatmul.mubr.msk.bf16.vlgmr.msra.gmra.mxu1 %vm1133_vm11, %v1254_v38  ;;  %v1479_v39 = vsel %vm1133_vm11, %v1474_v9, 0  ;;  %v1472_v40 = vpop.permute.xlu1 %1471 }
 0x3b4   : > { %1922 = vmatpush3.bf16.xpose.msra.mxu1 %v1370_v29  ;;  %1923 = vmatprep.mubr.msk.bf16.mxu1 %vm2101_vm12, %v2099_v27 }
 0x3b5   : > { %1933 = vmatprep.subr.bf16.mxu1 %v2099_v27 }
 0x3bb   : > { %1924 = vmatmul.mubr.msk.bf16.vlgmr.msra.gmra.mxu1 %vm1133_vm11, %v1363_v34 }
 0x3bc   : > { %1934 = vmatpush3.bf16.xpose.msra.mxu1 %v1479_v39  ;;  %1935 = vmatprep.mubr.msk.bf16.mxu1 %vm2101_vm12, %v2099_v27 }
 0x3bd   : > { %1945 = vmatprep.subr.bf16.mxu1 %v2099_v27 }
 0x3c3   : > { %1936 = vmatmul.mubr.msk.bf16.vlgmr.msra.gmra.mxu1 %vm1133_vm11, %v1472_v40 }
 0x3c4   : > { %1949 = vmatprep.mubr.msk.bf16.mxu1 %vm2101_vm12, %v2099_v27 }
 0x400   : > { %v1174_v10 = vpop.f32.mrf.mxu0 }
 0x401   : > { %v1187_v47 = vsel %vm1186_vm14, -1e+09, %v1174_v10 }
 0x402   : > { %v1189_v11 = vsel %vm1188_vm15, %v1187_v47, -inf  ;;  %v1901_v48 = vpop.f32.mrf.mxu0 }
 0x403   : > { %1190 = vmax.xlane.f32.xlu0 %v1189_v11 }
 0x404   : > { %v1177_v49 = vpop.f32.mrf.mxu0 }
 0x406   : > { %v1902_v50 = vpop.f32.mrf.mxu0 }
 0x407   : > { %v2030_v50 = vld [vmem:[%s2635_s17 + $0x8] sm:$0xff]  }
 0x473   : > { %v1297_v17 = vpop.f32.mrf.mxu1 }
 0x474   : > { %v1303_v52 = vsel %vm1186_vm14, -1e+09, %v1297_v17  ;;  %v2031_v17 = vld [vmem:[%s2635_s17] sm:$0xff]  }
 0x475   : > { %v1913_v53 = vpop.f32.mrf.mxu1  ;;  %v1304_v54 = vsel %vm1188_vm15, %v1303_v52, -inf }
 0x476   : > { %1305 = vmax.xlane.f32.xlu1 %v1304_v54 }
 0x477   : > { %v1300_v2 = vpop.f32.mrf.mxu1 }
 0x479   : > { %v1914_v55 = vpop.f32.mrf.mxu1 }
 0x47b   : > { %v1406_v15 = vpop.f32.mrf.mxu1 }
 0x47c   : > { %v1412_v56 = vsel %vm1186_vm14, -1e+09, %v1406_v15 }
 0x47d   : > { %v1925_v57 = vpop.f32.mrf.mxu1  ;;  %v1413_v58 = vsel %vm1188_vm15, %v1412_v56, -inf }
 0x47e   : > { %1414 = vmax.xlane.f32.xlu0 %v1413_v58 }
 0x47f   : > { %v1409_v59 = vpop.f32.mrf.mxu1 }
 0x481   : > { %v1926_v60 = vpop.f32.mrf.mxu1 }
 0x483   : > { %v1515_v61 = vpop.f32.mrf.mxu1 }
 0x484   : > { %v1521_v62 = vsel %vm1186_vm14, -1e+09, %v1515_v61 }
 0x485   : > { %v1937_v63 = vpop.f32.mrf.mxu1  ;;  %v1522_v0 = vsel %vm1188_vm15, %v1521_v62, -inf }
 0x486   : > { %1523 = vmax.xlane.f32.xlu0 %v1522_v0 }
 0x487   : > { %v1518_v1 = vpop.f32.mrf.mxu1 }
 0x489   : > { %v1938_v3 = vpop.f32.mrf.mxu1 }
 0x48c   : > { %v1191_v4 = vpop.xlane.xlu0 %1190 }
 0x48d   : > { %v1192_v5 = vsub.f32 %v1187_v47, %v1191_v4 }
 0x48f   : > { %v1193_v32 = vmul.f32 1.442695, %v1192_v5 }
 0x491   : > { %2032 = vpow2.f32 %v1193_v32  ;;  %v1836_v32 = vld [vmem:[%s2636_s24] ss:$0 sm:$0xff] }
 0x49e   : > { %v2033_v8 = vpop.eup %2032 }
 0x49f   : > { %v1195_v12 = vsel %vm1188_vm15, %v2033_v8, 0.0 }
 0x4a0   : > { %1196 = vadd.xlane.f32.xlu1 %v1195_v12 }
 0x4b1   : > { %1316 = vrot.lane.b32.xlu1 %v2029_v51, %s2100_s18  ;;  %s2107_s18 = smov 24  }
 0x4ff   : > { %v1306_v6 = vpop.xlane.xlu1 %1305 }
 0x500   : > { %v1307_v13 = vsub.f32 %v1303_v52, %v1306_v6  ;;  %v1623_v52 = vsel %vm1618_vm0, %v2031_v17, 0 }
 0x502   : > { %v1308_v18 = vmul.f32 1.442695, %v1307_v13 }
 0x504   : > { %2034 = vpow2.f32 %v1308_v18 }
 0x507   : > { %v1415_v19 = vpop.xlane.xlu0 %1414 }
 0x508   : > { %v1416_v20 = vsub.f32 %v1412_v56, %v1415_v19 }
 0x50a   : > { %v1417_v21 = vmul.f32 1.442695, %v1416_v20 }
 0x50c   : > { %2036 = vpow2.f32 %v1417_v21 }
 0x50f   : > { %v1524_v22 = vpop.xlane.xlu0 %1523 }
 0x510   : > { %v1525_v16 = vsub.f32 %v1521_v62, %v1524_v22 }
 0x511   : > { %v2035_v23 = vpop.eup %2034 }
 0x512   : > { %v1526_v24 = vmul.f32 1.442695, %v1525_v16  ;;  %v1310_v35 = vsel %vm1188_vm15, %v2035_v23, 0.0 }
 0x513   : > { %1311 = vadd.xlane.f32.xlu0 %v1310_v35 }
 0x514   : > { %2038 = vpow2.f32 %v1526_v24 }
 0x519   : > { %v2037_v14 = vpop.eup %2036 }
 0x51a   : > { %v1419_v25 = vsel %vm1188_vm15, %v2037_v14, 0.0 }
 0x51b   : > { %1420 = vadd.xlane.f32.xlu1 %v1419_v25 }
 0x521   : > { %v2039_v26 = vpop.eup %2038 }
 0x522   : > { %v1528_v28 = vsel %vm1188_vm15, %v2039_v26, 0.0 }
 0x523   : > { %1529 = vadd.xlane.f32.xlu0 %v1528_v28 }
 0x529   : > { %v1197_v30 = vpop.xlane.xlu1 %1196 }
 0x52a   : > { %2040 = vrcp.f32 %v1197_v30 }
 0x52c   : > { %1534 = vrot.lane.b32.xlu1 %v2029_v51, %s2103_s21 }
 0x52d   : > { %v1317_v37 = vpop.permute.xlu1 %1316 }
 0x537   : > { %v2041_v31 = vpop.eup %2040 }
 0x538   : > { %v1199_v33 = vmul.f32 %v2041_v31, %v2033_v8  ;;  %v1118_v8 = vld [vmem:[%s2242_s13] sm:$0xff] }
 0x539   : > { %1425 = vrot.lane.b32.xlu0 %v2029_v51, %s2102_s10  ;;  %v1626_v51 = vsel %vm1618_vm0, %v2030_v50, 0 }
 0x53a   : > { %v1200_v36 = vpack.c.bf16 %v1199_v33, %v1199_v33  ;;  %1946 = vmatpush3.bf16.xpose.msra.mxu1 %v1626_v51 }
 0x53b   : > { %1947 = vmatprep.subr.bf16.mxu1 %v2099_v27 }
 0x53c   : > { %1906 = vmatmul.mubr.msk.bf16.vlgmr.msra.gmra.mxu0 %vm1188_vm15, %v1200_v36 }
 0x53d   : > { %1916 = vmatpush3.bf16.msra.mxu0 %v1317_v37  ;;  %1917 = vmatprep.mubr.msk.bf16.mxu0 %vm2101_vm12, %v2099_v27 }
 0x53e   : > { %1927 = vmatprep.subr.bf16.mxu0 %v2099_v27 }
 0x542   : > { %1948 = vmatpush3.bf16.xpose.msra.mxu1 %v1623_v52 }
 0x59c   : > { %v1312_v29 = vpop.xlane.xlu0 %1311 }
 0x59d   : > { %2042 = vrcp.f32 %v1312_v29 }
 0x5a4   : > { %v1421_v38 = vpop.xlane.xlu1 %1420 }
 0x5a5   : > { %2044 = vrcp.f32 %v1421_v38 }
 0x5a8   : > { %v1535_v7 = vpop.permute.xlu1 %1534 }
 0x5aa   : > { %v2043_v9 = vpop.eup %2042 }
 0x5ab   : > { %v1314_v34 = vmul.f32 %v2043_v9, %v2035_v23 }
 0x5ac   : > { %v1530_v39 = vpop.xlane.xlu0 %1529 }
 0x5ad   : > { %2046 = vrcp.f32 %v1530_v39  ;;  %v1315_v40 = vpack.c.bf16 %v1314_v34, %v1314_v34 }
 0x5af   : > { %1918 = vmatmul.mubr.msk.bf16.vlgmr.msra.gmra.mxu0 %vm1188_vm15, %v1315_v40 }
 0x5b0   : > { %v1426_v41 = vpop.permute.xlu0 %1425  ;;  %1929 = vmatprep.mubr.msk.bf16.mxu0 %vm2101_vm12, %v2099_v27 }
 0x5b1   : > { %1928 = vmatpush3.bf16.msra.mxu0 %v1426_v41 }
 0x5b2   : > { %v2045_v42 = vpop.eup %2044  ;;  %1939 = vmatprep.subr.bf16.mxu0 %v2099_v27 }
 0x5b3   : > { %v1423_v43 = vmul.f32 %v2045_v42, %v2037_v14 }
 0x5b5   : > { %v1424_v44 = vpack.c.bf16 %v1423_v43, %v1423_v43 }
 0x5b7   : > { %1930 = vmatmul.mubr.msk.bf16.vlgmr.msra.gmra.mxu0 %vm1188_vm15, %v1424_v44 }
 0x5b8   : > { %1940 = vmatpush3.bf16.msra.mxu0 %v1535_v7  ;;  %1941 = vmatprep.mubr.msk.bf16.mxu0 %vm2101_vm12, %v2099_v27 }
 0x5ba   : > { %v2047_v45 = vpop.eup %2046 }
 0x5bb   : > { %v1532_v46 = vmul.f32 %v2047_v45, %v2039_v26 }
 0x5bd   : > { %v1533_v10 = vpack.c.bf16 %v1532_v46, %v1532_v46 }
 0x5bf   : > { %1942 = vmatmul.mubr.msk.bf16.vlgmr.msra.gmra.mxu0 %vm1188_vm15, %v1533_v10 }
 0x5fc   : > { %v1244_v47 = vpop.f32.mrf.mxu0 }
 0x5fe   : > { %v1907_v11 = vpop.f32.mrf.mxu0 }
 0x600   : > { %v1247_v48 = vpop.f32.mrf.mxu0 }
 0x602   : > { %v1908_v49 = vpop.f32.mrf.mxu0 }
 0x66f   : > { %v1356_v53 = vpop.f32.mrf.mxu0 }
 0x670   : > { %1581 = vrot.lane.b32.xlu1 %v1356_v53, %s2105_s5 }
 0x671   : > { %v1919_v54 = vpop.f32.mrf.mxu0 }
 0x673   : > { %v1359_v2 = vpop.f32.mrf.mxu0 }
 0x675   : > { %v1920_v55 = vpop.f32.mrf.mxu0 }
 0x677   : > { %v1465_v15 = vpop.f32.mrf.mxu0 }
 0x678   : > { %1585 = vrot.lane.b32.xlu0 %v1465_v15, %s2106_s27 }
 0x679   : > { %v1931_v56 = vpop.f32.mrf.mxu0 }
 0x67b   : > { %v1468_v57 = vpop.f32.mrf.mxu0 }
 0x67d   : > { %v1932_v58 = vpop.f32.mrf.mxu0 }
 0x67f   : > { %v1574_v27 = vpop.f32.mrf.mxu0 }
 0x680   : > { %1589 = vrot.lane.b32.xlu1 %v1574_v27, %s2107_s18 }
 0x681   : > { %v1943_v59 = vpop.f32.mrf.mxu0 }
 0x683   : > { %v1577_v60 = vpop.f32.mrf.mxu0 }
 0x685   : > { %v1944_v61 = vpop.f32.mrf.mxu0 }
 0x6e2   : > { %v1582_v62 = vpop.permute.xlu1 %1581 }
 0x6e3   : > { %v1592_v0 = vsel %vm1133_vm11, %v1244_v47, %v1582_v62 }
 0x6ea   : > { %v1586_v63 = vpop.permute.xlu0 %1585 }
 0x6eb   : > { %v1593_v1 = vsel %vm1188_vm15, %v1592_v0, %v1586_v63 }
 0x6f2   : > { %v1590_v3 = vpop.permute.xlu1 %1589 }
 0x6f3   : > { %v1595_v4 = vsel %vm1594_vm1, %v1593_v1, %v1590_v3 }
 0x6f4   : > { %v1596_v5 = vpack.c.bf16 %v1595_v4, %v1595_v4 }
 0x6f6   : > { %1950 = vmatmul.mubr.msk.bf16.vlgmr.msra.gmra.mxu1 %vm1618_vm0, %v1596_v5 }
 0x7b6   : > { %v1662_v12 = vpop.f32.mrf.mxu1 }
 0x7b7   : > { %v1663_v6 = vadd.f32 %v1836_v32, %v1662_v12 }
 0x7b8   : > { %v1951_v13 = vpop.f32.mrf.mxu1 }
 0x7b9   : > { %v1668_v18 = vadd.f32 %v1663_v6, %v1118_v8 }
 0x7ba   : > { %v1665_v19 = vpop.f32.mrf.mxu1 }
 0x7bb   : > { %1669 = vst.msk [vmem:[%s2251_s0] sm:$0xff] %vm1618_vm0, %v1668_v18 }
 0x7bc   : > { %v1952_v20 = vpop.f32.mrf.mxu1 }
 0x7bd PF: > { %s2637_s25 = sld [smem:[#allocation7_spill]] }
 0x7be   : > { %s2638_s21 = sld [smem:[#allocation5_spill]] }
 0x7bf   : > { %s2639_s22 = sld [smem:[#allocation6_spill]] }
 0x7c0   : > { %s2640_s23 = sld [smem:[#allocation8_spill]] }
 0x7c1   : > { %s2641_s24 = sld [smem:[#allocation9_spill]] }
 0x7c3   : > { %s26_s25 = sadd.s32 1, %s2637_s25  }
 0x7c4   : > { %p23_p8 = scmp.ge.s32.totalorder %s26_s25, 6  }
 0x7c6   :  { %25 = sbr.rel (!%p23_p8) target bundleno = 9 (0x9), region = 128 }

// kernel: decoder_layer.5
= control target key start
LH: loop header
LB: loop body
LE: loop exit
PB: predicated region body
PF: predicated region fallthrough
CT: control target
= control target key end

     0   :  { %vm34_vm0 = vcmask 261120   ;;  %s4139_s0 = inlined_call_operand.vmem [shape: f32[32,32], index: 0, kind: input, shape index: {}]   ;;  %s4140_s1 = inlined_call_operand.vmem [shape: f32[1,32], index: 1, kind: input, shape index: {}]   ;;  %s4141_s2 = inlined_call_operand.vmem [shape: f32[1,32], index: 2, kind: input, shape index: {}]   ;;  %s4142_s3 = inlined_call_operand.vmem [shape: bf16[2048,32], index: 3, kind: input, shape index: {}]   ;;  %s4143_s4 = inlined_call_operand.vmem [shape: f32[1,2048], index: 4, kind: input, shape index: {}]   ;;  %s4144_s5 = inlined_call_operand.vmem [shape: bf16[32,2048], index: 5, kind: input, shape index: {}]   ;;  %s4145_s6 = inlined_call_operand.vmem [shape: f32[1,32], index: 6, kind: input, shape index: {}]   ;;  %s4146_s7 = inlined_call_operand.hbm [shape: f32[32,32], index: 7, kind: output, shape index: {}]  }
   0x1   :  { %v28_v0 = vld [vmem:[%s4139_s0] sm:$0xff]  ;;  %v30_v1 = vld [vmem:[%s4139_s0 + $0x10] sm:$0xff]  ;;  %v29_v2 = vld [vmem:[%s4139_s0 + $0x8] sm:$0xff] }
   0x2   :  { %v35_v3 = vsel %vm34_vm0, %v28_v0, 0.0  ;;  %v41_v4 = vsel %vm34_vm0, %v30_v1, 0.0  ;;  %v31_v5 = vld [vmem:[%s4139_s0 + $0x18] sm:$0xff]  ;;  %v38_v6 = vsel %vm34_vm0, %v29_v2, 0.0  ;;  %v3058_v12 = vld [vmem:[%s4142_s3 + $0x70] sm:$0xff]   ;;  %v3064_v18 = vld [vmem:[%s4142_s3 + $0x28] sm:$0xff]  }
   0x3   :  { %36 = vadd.xlane.f32.xlu0 %v35_v3  ;;  %42 = vadd.xlane.f32.xlu1 %v41_v4  ;;  %v44_v7 = vsel %vm34_vm0, %v31_v5, 0.0  ;;  %v3054_v8 = vld [vmem:[%s4142_s3 + $0x78] sm:$0xff]   ;;  %v3059_v13 = vld [vmem:[%s4142_s3 + $0xf0] sm:$0xff]   ;;  %v3065_v19 = vld [vmem:[%s4142_s3 + $0xa8] sm:$0xff]   ;;  %v1141_v22 = vsel %vm34_vm0, %v3064_v18, 0 }
   0x4   :  { %v3055_v9 = vld [vmem:[%s4142_s3 + $0xf8] sm:$0xff]   ;;  %2987 = vmatprep.subr.msk.bf16.mxu0 %vm34_vm0, %v3054_v8  ;;  %v3060_v15 = vld [vmem:[%s4142_s3 + $0x30] sm:$0xff]   ;;  %v1189_v23 = vsel %vm34_vm0, %v3065_v19, 0  ;;  %v3062_v24 = vld [vmem:[%s4142_s3 + $0x68] sm:$0xff]  }
   0x5   :  { %v3056_v10 = vld [vmem:[%s4142_s3 + $0x38] sm:$0xff]   ;;  %2995 = vmatprep.subr.msk.bf16.mxu1 %vm34_vm0, %v3055_v9  ;;  %v3061_v16 = vld [vmem:[%s4142_s3 + $0xb0] sm:$0xff]   ;;  %v1144_v20 = vsel %vm34_vm0, %v3060_v15, 0  ;;  %v3063_v25 = vld [vmem:[%s4142_s3 + $0xe8] sm:$0xff]  }
   0x6   :  { %v3057_v11 = vld [vmem:[%s4142_s3 + $0xb8] sm:$0xff]   ;;  %v1147_v14 = vsel %vm34_vm0, %v3056_v10, 0  ;;  %v1192_v21 = vsel %vm34_vm0, %v3061_v16, 0 }
   0x7   :  { %39 = vadd.xlane.f32.xlu0 %v38_v6  ;;  %45 = vadd.xlane.f32.xlu1 %v44_v7  ;;  %v1195_v17 = vsel %vm34_vm0, %v3057_v11, 0 }
   0x8   :  { %2828 = vmatpush3.bf16.xpose.msra.mxu0 %v1147_v14  ;;  %2848 = vmatpush3.bf16.xpose.msra.mxu1 %v1195_v17 }
   0x9   :  { %2988 = vmatprep.subr.msk.bf16.mxu0 %vm34_vm0, %v3058_v12  ;;  %2996 = vmatprep.subr.msk.bf16.mxu1 %vm34_vm0, %v3059_v13 }
  0x10   :  { %2830 = vmatpush3.bf16.xpose.msra.mxu0 %v1144_v20  ;;  %2850 = vmatpush3.bf16.xpose.msra.mxu1 %v1192_v21 }
  0x11   :  { %2989 = vmatprep.subr.msk.bf16.mxu0 %vm34_vm0, %v3062_v24  ;;  %2997 = vmatprep.subr.msk.bf16.mxu1 %vm34_vm0, %v3063_v25 }
  0x18   :  { %2832 = vmatpush3.bf16.xpose.msra.mxu0 %v1141_v22  ;;  %2852 = vmatpush3.bf16.xpose.msra.mxu1 %v1189_v23 }
  0x19   :  { %12 = vsyncpa [#allocation3], 0  ;;  %v3066_v46 = vld [vmem:[%s4142_s3 + $0x60] sm:$0xff]   ;;  %v3070_v52 = vld [vmem:[%s4142_s3 + $0x58] sm:$0xff]   ;;  %s3224_s18 = smov [#allocation2]  }
  0x1a   :  { %v3067_v47 = vld [vmem:[%s4142_s3 + $0xe0] sm:$0xff]   ;;  %2990 = vmatprep.subr.msk.bf16.mxu0 %vm34_vm0, %v3066_v46  ;;  %v3071_v53 = vld [vmem:[%s4142_s3 + $0xd8] sm:$0xff]   ;;  %v3074_v58 = vld [vmem:[%s4142_s3 + $0x50] sm:$0xff]   ;;  %s2637_s19 = sshll.u32 %s3224_s18, 4  ;;  %s2638_s19 = int_to_ptr.vmem [resolvable:$true] %s2637_s19 }
  0x1b   :  { %v3068_v48 = vld [vmem:[%s4142_s3 + $0x20] sm:$0xff]   ;;  %2998 = vmatprep.subr.msk.bf16.mxu1 %vm34_vm0, %v3067_v47  ;;  %v3072_v54 = vld [vmem:[%s4142_s3 + $0x18] sm:$0xff]   ;;  %v3075_v59 = vld [vmem:[%s4142_s3 + $0xd0] sm:$0xff]   ;;  %s3202_s22 = scalar_lea.vmem %s2638_s19, 512  ;;  %p3207_p1 = scmp.lt.s32.totalorder %s2638_s19, %s2638_s19 }
  0x1c   :  { %v3069_v49 = vld [vmem:[%s4142_s3 + $0xa0] sm:$0xff]   ;;  %v1138_v50 = vsel %vm34_vm0, %v3068_v48, 0  ;;  %v3073_v55 = vld [vmem:[%s4142_s3 + $0x98] sm:$0xff]   ;;  %v1135_v56 = vsel %vm34_vm0, %v3072_v54, 0  ;;  %v3076_v60 = vld [vmem:[%s4142_s3 + $0x10] sm:$0xff]   ;;  %p3203_p0 = scmp.ne.s32.totalorder %s2638_s19, %s3202_s22  ;;  %p3208_p2 = scmp.lt.s32.totalorder %s3202_s22, %s3202_s22 }
  0x1d   :  { %v1186_v51 = vsel %vm34_vm0, %v3069_v49, 0  ;;  %v1183_v57 = vsel %vm34_vm0, %v3073_v55, 0  ;;  %v3077_v61 = vld [vmem:[%s4142_s3 + $0x90] sm:$0xff]   ;;  %v1132_v62 = vsel %vm34_vm0, %v3076_v60, 0  ;;  %v3081_v3 = vld [vmem:[%s4142_s3 + $0x88] sm:$0xff]   ;;  %v3082_v6 = vld [vmem:[%s4142_s3 + $0x40] sm:$0xff]  }
  0x1e   :  { %v1180_v63 = vsel %vm34_vm0, %v3077_v61, 0  ;;  %v3083_v7 = vld [vmem:[%s4142_s3 + $0xc0] sm:$0xff]   ;;  %v3086_v12 = vld [vmem:[%s4142_s3 + $0x178] sm:$0xff]   ;;  %p3209_p3 = por %p3208_p2, %p3207_p1 }
  0x1f   :  { %v3084_v8 = vld [vmem:[%s4142_s3] sm:$0xff]   ;;  %v3087_v13 = vld [vmem:[%s4142_s3 + $0x1f8] sm:$0xff]  }
  0x20   :  { %2834 = vmatpush3.bf16.xpose.msra.mxu0 %v1138_v50  ;;  %2854 = vmatpush3.bf16.xpose.msra.mxu1 %v1186_v51  ;;  %v3085_v9 = vld [vmem:[%s4142_s3 + $0x80] sm:$0xff]   ;;  %v1126_v10 = vsel %vm34_vm0, %v3084_v8, 0  ;;  %v3088_v60 = vld [vmem:[%s4142_s3 + $0x138] sm:$0xff]   ;;  %v3092_v8 = vld [vmem:[%s4142_s3 + $0x130] sm:$0xff]   ;;  %p3210_p4 = pnand %p3209_p3, %p3203_p0 }
  0x21   :  { %2991 = vmatprep.subr.msk.bf16.mxu0 %vm34_vm0, %v3070_v52  ;;  %2999 = vmatprep.subr.msk.bf16.mxu1 %vm34_vm0, %v3071_v53  ;;  %v1174_v11 = vsel %vm34_vm0, %v3085_v9, 0  ;;  %v2648_v50 = vld [vmem:[%s4140_s1] ss:$0 sm:$0xff]  ;;  %v3093_v9 = vld [vmem:[%s4142_s3 + $0x1b0] sm:$0xff]  }
  0x28   :  { %2836 = vmatpush3.bf16.xpose.msra.mxu0 %v1135_v56  ;;  %2856 = vmatpush3.bf16.xpose.msra.mxu1 %v1183_v57  ;;  %v2649_v56 = vld [vmem:[%s4141_s2] ss:$0 sm:$0xff] }
  0x29   :  { %2992 = vmatprep.subr.msk.bf16.mxu0 %vm34_vm0, %v3074_v58  ;;  %3000 = vmatprep.subr.msk.bf16.mxu1 %vm34_vm0, %v3075_v59 }
  0x30   :  { %2838 = vmatpush3.bf16.xpose.msra.mxu0 %v1132_v62  ;;  %2858 = vmatpush3.bf16.xpose.msra.mxu1 %v1180_v63 }
  0x8c   :  { %v37_v26 = vpop.xlane.xlu0 %36  ;;  %v43_v27 = vpop.xlane.xlu1 %42 }
  0x8d   :  { %v48_v28 = vmul.f32 0.03125, %v37_v26  ;;  %v50_v29 = vmul.f32 0.03125, %v43_v27 }
  0x8f   :  { %v3331_v30 = vsub.f32 %v28_v0, %v48_v28  ;;  %v3333_v31 = vsub.f32 %v30_v1, %v50_v29  ;;  %v3078_v0 = vld [vmem:[%s4142_s3 + $0x48] sm:$0xff]  }
  0x90   :  { %v40_v32 = vpop.xlane.xlu0 %39  ;;  %v46_v33 = vpop.xlane.xlu1 %45  ;;  %v3079_v1 = vld [vmem:[%s4142_s3 + $0xc8] sm:$0xff]   ;;  %2993 = vmatprep.subr.msk.bf16.mxu0 %vm34_vm0, %v3078_v0 }
  0x91   :  { %v49_v34 = vmul.f32 0.03125, %v40_v32  ;;  %v51_v35 = vmul.f32 0.03125, %v46_v33  ;;  %v56_v36 = vmul.f32 %v3331_v30, %v3331_v30  ;;  %v58_v37 = vmul.f32 %v3333_v31, %v3333_v31  ;;  %3001 = vmatprep.subr.msk.bf16.mxu1 %vm34_vm0, %v3079_v1 }
  0x92   :  { %v83_v52 = vmul.f32 %v2648_v50, %v3331_v30  ;;  %v85_v58 = vmul.f32 %v2648_v50, %v3333_v31  ;;  %v3089_v30 = vld [vmem:[%s4142_s3 + $0x1b8] sm:$0xff]   ;;  %v1243_v31 = vsel %vm34_vm0, %v3088_v60, 0  ;;  %v3124_v60 = vld [vmem:[%s4142_s3 + $0x230] sm:$0xff]  }
  0x93   :  { %v3339_v38 = vsub.f32 %v29_v2, %v49_v34  ;;  %v3341_v39 = vsub.f32 %v31_v5, %v51_v35  ;;  %v60_v40 = vsel %vm34_vm0, %v56_v36, 0.0  ;;  %v66_v43 = vsel %vm34_vm0, %v58_v37, 0.0  ;;  %v3080_v2 = vld [vmem:[%s4142_s3 + $0x8] sm:$0xff]  }
  0x94   :  { %61 = vadd.xlane.f32.xlu0 %v60_v40  ;;  %v1129_v4 = vsel %vm34_vm0, %v3080_v2, 0  ;;  %v1177_v5 = vsel %vm34_vm0, %v3081_v3, 0  ;;  %v1291_v3 = vsel %vm34_vm0, %v3089_v30, 0  ;;  %v3125_v30 = vld [vmem:[%s4142_s3 + $0x2b0] sm:$0xff]  }
  0x95   :  { %v57_v41 = vmul.f32 %v3339_v38, %v3339_v38  ;;  %v59_v42 = vmul.f32 %v3341_v39, %v3341_v39  ;;  %2840 = vmatpush3.bf16.xpose.msra.mxu0 %v1129_v4  ;;  %2860 = vmatpush3.bf16.xpose.msra.mxu1 %v1177_v5  ;;  %v84_v53 = vmul.f32 %v2648_v50, %v3339_v38  ;;  %v3090_v4 = vld [vmem:[%s4142_s3 + $0x170] sm:$0xff]  }
  0x96   :  { %2994 = vmatprep.subr.msk.bf16.mxu0 %vm34_vm0, %v3082_v6  ;;  %3002 = vmatprep.subr.msk.bf16.mxu1 %vm34_vm0, %v3083_v7  ;;  %v86_v38 = vmul.f32 %v2648_v50, %v3341_v39  ;;  %v3091_v5 = vld [vmem:[%s4142_s3 + $0x1f0] sm:$0xff]  }
  0x97   :  { %v63_v44 = vsel %vm34_vm0, %v57_v41, 0.0  ;;  %v69_v45 = vsel %vm34_vm0, %v59_v42, 0.0 }
  0x98   :  { %64 = vadd.xlane.f32.xlu1 %v63_v44  ;;  %67 = vadd.xlane.f32.xlu0 %v66_v43 }
  0x9c   :  { %70 = vadd.xlane.f32.xlu1 %v69_v45 }
  0x9d   :  { %2842 = vmatpush3.bf16.xpose.msra.mxu0 %v1126_v10  ;;  %2862 = vmatpush3.bf16.xpose.msra.mxu1 %v1174_v11  ;;  %v1240_v10 = vsel %vm34_vm0, %v3092_v8, 0  ;;  %v1288_v11 = vsel %vm34_vm0, %v3093_v9, 0 }
  0x9e   :  { %3003 = vmatprep.subr.msk.bf16.mxu0 %vm34_vm0, %v3086_v12  ;;  %3011 = vmatprep.subr.msk.bf16.mxu1 %vm34_vm0, %v3087_v13  ;;  %v3094_v12 = vld [vmem:[%s4142_s3 + $0x168] sm:$0xff]  }
  0x9f   :  { %v3095_v13 = vld [vmem:[%s4142_s3 + $0x1e8] sm:$0xff]  }
 0x11d   :  { %v62_v14 = vpop.xlane.xlu0 %61 }
 0x11e   :  { %v73_v15 = vmul.f32 0.032258064, %v62_v14  ;;  %v3096_v14 = vld [vmem:[%s4142_s3 + $0x128] sm:$0xff]  }
 0x120   :  { %3182 = vrsqrt.f32 %v73_v15  ;;  %vm89_vm1 = vcmp.eq.f32.partialorder %v73_v15, inf  ;;  %v92_v24 = vand.u32 2147483648, %v73_v15  ;;  %vm91_vm2 = vcmp.eq.f32.partialorder %v73_v15, 0.0 }
 0x121   :  { %v65_v16 = vpop.xlane.xlu1 %64  ;;  %v68_v18 = vpop.xlane.xlu0 %67 }
 0x122   :  { %v74_v17 = vmul.f32 0.032258064, %v65_v16  ;;  %v75_v19 = vmul.f32 0.032258064, %v68_v18  ;;  %v1237_v16 = vsel %vm34_vm0, %v3096_v14, 0  ;;  %v3098_v18 = vld [vmem:[%s4142_s3 + $0x160] sm:$0xff]  }
 0x124   :  { %3184 = vrsqrt.f32 %v74_v17  ;;  %vm96_vm3 = vcmp.eq.f32.partialorder %v74_v17, inf  ;;  %vm103_vm4 = vcmp.eq.f32.partialorder %v75_v19, inf  ;;  %v106_v32 = vand.u32 2147483648, %v75_v19 }
 0x125   :  { %3186 = vrsqrt.f32 %v75_v19  ;;  %v71_v20 = vpop.xlane.xlu1 %70  ;;  %v99_v34 = vand.u32 2147483648, %v74_v17  ;;  %vm105_vm5 = vcmp.eq.f32.partialorder %v75_v19, 0.0  ;;  %vm98_vm6 = vcmp.eq.f32.partialorder %v74_v17, 0.0 }
 0x126   :  { %v76_v21 = vmul.f32 0.032258064, %v71_v20  ;;  %v3100_v20 = vld [vmem:[%s4142_s3 + $0x120] sm:$0xff]  }
 0x128   :  { %3188 = vrsqrt.f32 %v76_v21  ;;  %vm110_vm7 = vcmp.eq.f32.partialorder %v76_v21, inf  ;;  %v113_v42 = vand.u32 2147483648, %v76_v21  ;;  %vm112_vm8 = vcmp.eq.f32.partialorder %v76_v21, 0.0 }
 0x12d   :  { %v3183_v22 = vpop.eup %3182 }
 0x12e   :  { %v88_v23 = vmul.f32 %v3183_v22, %v73_v15  ;;  %v1234_v22 = vsel %vm34_vm0, %v3100_v20, 0 }
 0x130   :  { %v90_v26 = vsel %vm89_vm1, %v73_v15, %v88_v23  ;;  %v3097_v15 = vld [vmem:[%s4142_s3 + $0x1a8] sm:$0xff]  }
 0x131   :  { %v3185_v25 = vpop.eup %3184  ;;  %v93_v28 = vsel %vm91_vm2, %v92_v24, %v90_v26  ;;  %v3102_v24 = vld [vmem:[%s4142_s3 + $0x158] sm:$0xff]  }
 0x132   :  { %v3187_v27 = vpop.eup %3186  ;;  %v95_v29 = vmul.f32 %v3185_v25, %v74_v17  ;;  %v115_v33 = vadd.f32 1e-06, %v93_v28  ;;  %v3103_v25 = vld [vmem:[%s4142_s3 + $0x1d8] sm:$0xff]  }
 0x133   :  { %v102_v35 = vmul.f32 %v3187_v27, %v75_v19  ;;  %v3104_v26 = vld [vmem:[%s4142_s3 + $0x118] sm:$0xff]  }
 0x134   :  { %v97_v36 = vsel %vm96_vm3, %v74_v17, %v95_v29  ;;  %3190 = vrcp.f32 %v115_v33  ;;  %v1285_v17 = vsel %vm34_vm0, %v3097_v15, 0  ;;  %v3105_v27 = vld [vmem:[%s4142_s3 + $0x198] sm:$0xff]   ;;  %v1231_v28 = vsel %vm34_vm0, %v3104_v26, 0  ;;  %v3107_v33 = vld [vmem:[%s4142_s3 + $0x1d0] sm:$0xff]  }
 0x135   :  { %v3189_v37 = vpop.eup %3188  ;;  %v100_v40 = vsel %vm98_vm6, %v99_v34, %v97_v36  ;;  %v104_v41 = vsel %vm103_vm4, %v75_v19, %v102_v35  ;;  %v3099_v19 = vld [vmem:[%s4142_s3 + $0x1e0] sm:$0xff]   ;;  %v1279_v29 = vsel %vm34_vm0, %v3105_v27, 0  ;;  %v3108_v34 = vld [vmem:[%s4142_s3 + $0x110] sm:$0xff]  }
 0x136   :  { %v116_v43 = vadd.f32 1e-06, %v100_v40  ;;  %v107_v44 = vsel %vm105_vm5, %v106_v32, %v104_v41  ;;  %v109_v45 = vmul.f32 %v3189_v37, %v76_v21  ;;  %v3106_v32 = vld [vmem:[%s4142_s3 + $0x150] sm:$0xff]   ;;  %v1228_v36 = vsel %vm34_vm0, %v3108_v34, 0  ;;  %v3110_v40 = vld [vmem:[%s4142_s3 + $0x148] sm:$0xff]  }
 0x137   :  { %v117_v46 = vadd.f32 1e-06, %v107_v44  ;;  %v3109_v35 = vld [vmem:[%s4142_s3 + $0x190] sm:$0xff]   ;;  %v3111_v41 = vld [vmem:[%s4142_s3 + $0x1c8] sm:$0xff]  }
 0x138   :  { %3192 = vrcp.f32 %v116_v43  ;;  %v111_v47 = vsel %vm110_vm7, %v76_v21, %v109_v45  ;;  %v3101_v21 = vld [vmem:[%s4142_s3 + $0x1a0] sm:$0xff]   ;;  %v1276_v37 = vsel %vm34_vm0, %v3109_v35, 0  ;;  %v3113_v43 = vld [vmem:[%s4142_s3 + $0x188] sm:$0xff]  }
 0x139   :  { %3194 = vrcp.f32 %v117_v46  ;;  %v114_v48 = vsel %vm112_vm8, %v113_v42, %v111_v47  ;;  %v1282_v23 = vsel %vm34_vm0, %v3101_v21, 0  ;;  %v3112_v42 = vld [vmem:[%s4142_s3 + $0x108] sm:$0xff]   ;;  %v1273_v45 = vsel %vm34_vm0, %v3113_v43, 0  ;;  %v3114_v46 = vld [vmem:[%s4142_s3 + $0x140] sm:$0xff]  }
 0x13a   :  { %v118_v49 = vadd.f32 1e-06, %v114_v48  ;;  %v1225_v44 = vsel %vm34_vm0, %v3112_v42, 0  ;;  %v3115_v47 = vld [vmem:[%s4142_s3 + $0x1c0] sm:$0xff]  }
 0x13b   :  { %v3116_v48 = vld [vmem:[%s4142_s3 + $0x100] sm:$0xff]  }
 0x13c   :  { %3196 = vrcp.f32 %v118_v49  ;;  %v3117_v49 = vld [vmem:[%s4142_s3 + $0x180] sm:$0xff]   ;;  %v1222_v50 = vsel %vm34_vm0, %v3116_v48, 0 }
 0x141   :  { %v3191_v51 = vpop.eup %3190 }
 0x142   :  { %v120_v54 = vmul.f32 %v3191_v51, %v83_v52  ;;  %v1270_v51 = vsel %vm34_vm0, %v3117_v49, 0  ;;  %v3118_v52 = vld [vmem:[%s4142_s3 + $0x278] sm:$0xff]  }
 0x144   :  { %v133_v61 = vadd.f32 %v2649_v56, %v120_v54  ;;  %v3120_v54 = vld [vmem:[%s4142_s3 + $0x238] sm:$0xff]  }
 0x145   :  { %v3193_v55 = vpop.eup %3192 }
 0x146   :  { %v3195_v57 = vpop.eup %3194  ;;  %v122_v59 = vmul.f32 %v3193_v55, %v84_v53  ;;  %v3119_v53 = vld [vmem:[%s4142_s3 + $0x2f8] sm:$0xff]  }
 0x147   :  { %v124_v63 = vmul.f32 %v3195_v57, %v85_v58  ;;  %v3121_v55 = vld [vmem:[%s4142_s3 + $0x2b8] sm:$0xff]   ;;  %v3122_v58 = vld [vmem:[%s4142_s3 + $0x270] sm:$0xff]  }
 0x148   :  { %v134_v62 = vadd.f32 %v2649_v56, %v122_v59  ;;  %v1387_v57 = vsel %vm34_vm0, %v3121_v55, 0  ;;  %v3123_v59 = vld [vmem:[%s4142_s3 + $0x2f0] sm:$0xff]  }
 0x149   :  { %v3197_v0 = vpop.eup %3196  ;;  %v135_v39 = vadd.f32 %v2649_v56, %v124_v63  ;;  %v3127_v63 = vld [vmem:[%s4142_s3 + $0x2e8] sm:$0xff]  }
 0x14a   :  { %v3455_v1 = vpack.c.bf16 %v134_v62, %v133_v61  ;;  %v126_v2 = vmul.f32 %v3197_v0, %v86_v38  ;;  %v1336_v38 = vsel %vm34_vm0, %v3124_v60, 0  ;;  %v1384_v61 = vsel %vm34_vm0, %v3125_v30, 0  ;;  %v3126_v62 = vld [vmem:[%s4142_s3 + $0x268] sm:$0xff]  }
 0x14b   :  { %v3128_v0 = vld [vmem:[%s4142_s3 + $0x228] sm:$0xff]  }
 0x14c   :  { %v136_v6 = vadd.f32 %v2649_v56, %v126_v2  ;;  %2843 = vmatprep.mubr.msk.bf16.mxu0 %vm34_vm0, %v3455_v1  ;;  %2863 = vmatprep.mubr.msk.bf16.mxu1 %vm34_vm0, %v3455_v1  ;;  %v1339_v56 = vsel %vm34_vm0, %v3120_v54, 0  ;;  %v3129_v2 = vld [vmem:[%s4142_s3 + $0x2a8] sm:$0xff]  }
 0x14d   :  { %2844 = vmatmul.mubr.msk.bf16.vlgmr.msra.gmra.mxu0 %vm34_vm0, %v3455_v1  ;;  %2864 = vmatmul.mubr.msk.bf16.vlgmr.msra.gmra.mxu1 %vm34_vm0, %v3455_v1 }
 0x14e   :  { %v3473_v7 = vpack.c.bf16 %v136_v6, %v135_v39  ;;  %2868 = vmatpush3.bf16.xpose.msra.mxu0 %v1243_v31  ;;  %2888 = vmatpush3.bf16.xpose.msra.mxu1 %v1291_v3  ;;  %v1333_v31 = vsel %vm34_vm0, %v3128_v0, 0  ;;  %v1381_v3 = vsel %vm34_vm0, %v3129_v2, 0  ;;  %v3132_v39 = vld [vmem:[%s4142_s3 + $0x220] sm:$0xff]  }
 0x14f   :  { %3004 = vmatprep.subr.msk.bf16.mxu0 %vm34_vm0, %v3090_v4  ;;  %3012 = vmatprep.subr.msk.bf16.mxu1 %vm34_vm0, %v3091_v5  ;;  %v3130_v4 = vld [vmem:[%s4142_s3 + $0x260] sm:$0xff]   ;;  %v1330_v8 = vsel %vm34_vm0, %v3132_v39, 0 }
 0x150   :  { %2845 = vmatprep.mubr.msk.bf16.mxu0 %vm34_vm0, %v3473_v7  ;;  %2865 = vmatprep.mubr.msk.bf16.mxu1 %vm34_vm0, %v3473_v7  ;;  %v3131_v5 = vld [vmem:[%s4142_s3 + $0x2e0] sm:$0xff]  }
 0x151   :  { %v3133_v6 = vld [vmem:[%s4142_s3 + $0x2a0] sm:$0xff]  }
 0x152   :  { %v1378_v9 = vsel %vm34_vm0, %v3133_v6, 0 }
 0x155   :  { %2846 = vmatmul.mubr.msk.bf16.gmra.mxu0 %vm34_vm0, %v3473_v7  ;;  %2866 = vmatmul.mubr.msk.bf16.gmra.mxu1 %vm34_vm0, %v3473_v7 }
 0x156   :  { %2870 = vmatpush3.bf16.xpose.msra.mxu0 %v1240_v10  ;;  %2890 = vmatpush3.bf16.xpose.msra.mxu1 %v1288_v11  ;;  %v3134_v10 = vld [vmem:[%s4142_s3 + $0x258] sm:$0xff]  }
 0x157   :  { %2883 = vmatprep.mubr.msk.bf16.mxu0 %vm34_vm0, %v3455_v1  ;;  %2903 = vmatprep.mubr.msk.bf16.mxu1 %vm34_vm0, %v3455_v1  ;;  %v3135_v11 = vld [vmem:[%s4142_s3 + $0x2d8] sm:$0xff]  }
 0x158   :  { %3005 = vmatprep.subr.msk.bf16.mxu0 %vm34_vm0, %v3094_v12  ;;  %3013 = vmatprep.subr.msk.bf16.mxu1 %vm34_vm0, %v3095_v13  ;;  %v3136_v12 = vld [vmem:[%s4142_s3 + $0x218] sm:$0xff]  }
 0x159   :  { %v3137_v13 = vld [vmem:[%s4142_s3 + $0x298] sm:$0xff]   ;;  %v1327_v14 = vsel %vm34_vm0, %v3136_v12, 0 }
 0x15a   :  { %v1375_v15 = vsel %vm34_vm0, %v3137_v13, 0 }
 0x15e   :  { %2872 = vmatpush3.bf16.xpose.msra.mxu0 %v1237_v16  ;;  %2892 = vmatpush3.bf16.xpose.msra.mxu1 %v1285_v17  ;;  %v3138_v16 = vld [vmem:[%s4142_s3 + $0x250] sm:$0xff]  }
 0x15f   :  { %3006 = vmatprep.subr.msk.bf16.mxu0 %vm34_vm0, %v3098_v18  ;;  %3014 = vmatprep.subr.msk.bf16.mxu1 %vm34_vm0, %v3099_v19  ;;  %v3139_v17 = vld [vmem:[%s4142_s3 + $0x2d0] sm:$0xff]  }
 0x160   :  { %v3140_v18 = vld [vmem:[%s4142_s3 + $0x210] sm:$0xff]  }
 0x161   :  { %v3141_v19 = vld [vmem:[%s4142_s3 + $0x290] sm:$0xff]   ;;  %v1324_v20 = vsel %vm34_vm0, %v3140_v18, 0  ;;  %v2045_v18 = vld [vmem:[%s4144_s5 + $0x80] sm:$0xff] }
 0x162   :  { %v1372_v21 = vsel %vm34_vm0, %v3141_v19, 0  ;;  %v2053_v19 = vld [vmem:[%s4144_s5 + $0xc0] sm:$0xff] }
 0x166   :  { %2874 = vmatpush3.bf16.xpose.msra.mxu0 %v1234_v22  ;;  %2894 = vmatpush3.bf16.xpose.msra.mxu1 %v1282_v23  ;;  %v3142_v22 = vld [vmem:[%s4142_s3 + $0x248] sm:$0xff]  }
 0x167   :  { %3007 = vmatprep.subr.msk.bf16.mxu0 %vm34_vm0, %v3102_v24  ;;  %3015 = vmatprep.subr.msk.bf16.mxu1 %vm34_vm0, %v3103_v25  ;;  %v3143_v23 = vld [vmem:[%s4142_s3 + $0x2c8] sm:$0xff]  }
 0x168   :  { %v3144_v24 = vld [vmem:[%s4142_s3 + $0x208] sm:$0xff]  }
 0x169   :  { %v3145_v25 = vld [vmem:[%s4142_s3 + $0x288] sm:$0xff]   ;;  %v1321_v26 = vsel %vm34_vm0, %v3144_v24, 0 }
 0x16a   :  { %v1369_v27 = vsel %vm34_vm0, %v3145_v25, 0  ;;  %v2811_v25 = vcombine.high %v2045_v18, %v2053_v19 }
 0x16e   :  { %2876 = vmatpush3.bf16.xpose.msra.mxu0 %v1231_v28  ;;  %2896 = vmatpush3.bf16.xpose.msra.mxu1 %v1279_v29  ;;  %v3146_v28 = vld [vmem:[%s4142_s3 + $0x240] sm:$0xff]  }
 0x16f   :  { %3008 = vmatprep.subr.msk.bf16.mxu0 %vm34_vm0, %v3106_v32  ;;  %3016 = vmatprep.subr.msk.bf16.mxu1 %vm34_vm0, %v3107_v33  ;;  %v3147_v29 = vld [vmem:[%s4142_s3 + $0x2c0] sm:$0xff]  }
 0x170   :  { %v3148_v32 = vld [vmem:[%s4142_s3 + $0x200] sm:$0xff]  }
 0x171   :  { %v3149_v33 = vld [vmem:[%s4142_s3 + $0x280] sm:$0xff]   ;;  %v1318_v34 = vsel %vm34_vm0, %v3148_v32, 0 }
 0x172   :  { %v1366_v35 = vsel %vm34_vm0, %v3149_v33, 0  ;;  %v2029_v32 = vld [vmem:[%s4144_s5] sm:$0xff] }
 0x173   :  { %v2037_v33 = vld [vmem:[%s4144_s5 + $0x40] sm:$0xff] }
 0x176   :  { %2878 = vmatpush3.bf16.xpose.msra.mxu0 %v1228_v36  ;;  %2898 = vmatpush3.bf16.xpose.msra.mxu1 %v1276_v37  ;;  %v3150_v36 = vld [vmem:[%s4142_s3 + $0x378] sm:$0xff]  }
 0x177   :  { %3009 = vmatprep.subr.msk.bf16.mxu0 %vm34_vm0, %v3110_v40  ;;  %3017 = vmatprep.subr.msk.bf16.mxu1 %vm34_vm0, %v3111_v41  ;;  %v3151_v37 = vld [vmem:[%s4142_s3 + $0x3f8] sm:$0xff]  }
 0x178   :  { %v3152_v40 = vld [vmem:[%s4142_s3 + $0x338] sm:$0xff]  }
 0x179   :  { %v3153_v41 = vld [vmem:[%s4142_s3 + $0x3b8] sm:$0xff]   ;;  %v1435_v42 = vsel %vm34_vm0, %v3152_v40, 0  ;;  %v3912_v40 = vld [vmem:[%s4143_s4] sm:$0xff] }
 0x17a   :  { %v1483_v43 = vsel %vm34_vm0, %v3153_v41, 0 }
 0x17e   :  { %2880 = vmatpush3.bf16.xpose.msra.mxu0 %v1225_v44  ;;  %2900 = vmatpush3.bf16.xpose.msra.mxu1 %v1273_v45  ;;  %v3154_v44 = vld [vmem:[%s4142_s3 + $0x370] sm:$0xff]  }
 0x17f   :  { %3010 = vmatprep.subr.msk.bf16.mxu0 %vm34_vm0, %v3114_v46  ;;  %3018 = vmatprep.subr.msk.bf16.mxu1 %vm34_vm0, %v3115_v47  ;;  %v3155_v45 = vld [vmem:[%s4142_s3 + $0x3f0] sm:$0xff]  }
 0x180   :  { %v3156_v46 = vld [vmem:[%s4142_s3 + $0x330] sm:$0xff]  }
 0x181   :  { %v3157_v47 = vld [vmem:[%s4142_s3 + $0x3b0] sm:$0xff]   ;;  %v1432_v48 = vsel %vm34_vm0, %v3156_v46, 0 }
 0x182   :  { %v1480_v49 = vsel %vm34_vm0, %v3157_v47, 0 }
 0x186   :  { %2882 = vmatpush3.bf16.xpose.msra.mxu0 %v1222_v50  ;;  %2902 = vmatpush3.bf16.xpose.msra.mxu1 %v1270_v51  ;;  %v3158_v50 = vld [vmem:[%s4142_s3 + $0x368] sm:$0xff]  }
 0x187   :  { %3019 = vmatprep.subr.msk.bf16.mxu0 %vm34_vm0, %v3118_v52  ;;  %3027 = vmatprep.subr.msk.bf16.mxu1 %vm34_vm0, %v3119_v53  ;;  %v3159_v51 = vld [vmem:[%s4142_s3 + $0x3e8] sm:$0xff]  }
 0x188   :  { %v3160_v52 = vld [vmem:[%s4142_s3 + $0x328] sm:$0xff]  }
 0x189   :  { %v3161_v53 = vld [vmem:[%s4142_s3 + $0x3a8] sm:$0xff]   ;;  %v1429_v54 = vsel %vm34_vm0, %v3160_v52, 0 }
 0x18a   :  { %v1477_v55 = vsel %vm34_vm0, %v3161_v53, 0 }
 0x18d   :  { %2884 = vmatmul.mubr.msk.bf16.vlgmr.msra.gmra.mxu0 %vm34_vm0, %v3455_v1  ;;  %2904 = vmatmul.mubr.msk.bf16.vlgmr.msra.gmra.mxu1 %vm34_vm0, %v3455_v1 }
 0x18e   :  { %2885 = vmatprep.mubr.msk.bf16.mxu0 %vm34_vm0, %v3473_v7  ;;  %2905 = vmatprep.mubr.msk.bf16.mxu1 %vm34_vm0, %v3473_v7 }
 0x18f   :  { %2908 = vmatpush3.bf16.xpose.msra.mxu0 %v1339_v56  ;;  %2928 = vmatpush3.bf16.xpose.msra.mxu1 %v1387_v57  ;;  %v3162_v56 = vld [vmem:[%s4142_s3 + $0x360] sm:$0xff]  }
 0x190   :  { %3020 = vmatprep.subr.msk.bf16.mxu0 %vm34_vm0, %v3122_v58  ;;  %3028 = vmatprep.subr.msk.bf16.mxu1 %vm34_vm0, %v3123_v59  ;;  %v3163_v57 = vld [vmem:[%s4142_s3 + $0x3e0] sm:$0xff]  }
 0x191   :  { %v3164_v58 = vld [vmem:[%s4142_s3 + $0x320] sm:$0xff]  }
 0x192   :  { %v3165_v59 = vld [vmem:[%s4142_s3 + $0x3a0] sm:$0xff]   ;;  %v1426_v60 = vsel %vm34_vm0, %v3164_v58, 0 }
 0x193   :  { %v1474_v30 = vsel %vm34_vm0, %v3165_v59, 0 }
 0x195   :  { %2886 = vmatmul.mubr.msk.bf16.gmra.mxu0 %vm34_vm0, %v3473_v7  ;;  %2906 = vmatmul.mubr.msk.bf16.gmra.mxu1 %vm34_vm0, %v3473_v7 }
 0x196   :  { %2923 = vmatprep.mubr.msk.bf16.mxu0 %vm34_vm0, %v3455_v1  ;;  %2943 = vmatprep.mubr.msk.bf16.mxu1 %vm34_vm0, %v3455_v1 }
 0x197   :  { %2910 = vmatpush3.bf16.xpose.msra.mxu0 %v1336_v38  ;;  %2930 = vmatpush3.bf16.xpose.msra.mxu1 %v1384_v61  ;;  %v3166_v38 = vld [vmem:[%s4142_s3 + $0x358] sm:$0xff]  }
 0x198   :  { %3021 = vmatprep.subr.msk.bf16.mxu0 %vm34_vm0, %v3126_v62  ;;  %3029 = vmatprep.subr.msk.bf16.mxu1 %vm34_vm0, %v3127_v63  ;;  %v3167_v61 = vld [vmem:[%s4142_s3 + $0x3d8] sm:$0xff]  }
 0x199   :  { %v3168_v62 = vld [vmem:[%s4142_s3 + $0x318] sm:$0xff]  }
 0x19a   :  { %v3169_v63 = vld [vmem:[%s4142_s3 + $0x398] sm:$0xff]   ;;  %v1423_v0 = vsel %vm34_vm0, %v3168_v62, 0 }
 0x19b   :  { %v1471_v2 = vsel %vm34_vm0, %v3169_v63, 0  ;;  %v2056_v62 = vld [vmem:[%s4144_s5 + $0xd8] sm:$0xff] }
 0x19f   :  { %2912 = vmatpush3.bf16.xpose.msra.mxu0 %v1333_v31  ;;  %2932 = vmatpush3.bf16.xpose.msra.mxu1 %v1381_v3  ;;  %v3170_v31 = vld [vmem:[%s4142_s3 + $0x350] sm:$0xff]  }
 0x1a0   :  { %3022 = vmatprep.subr.msk.bf16.mxu0 %vm34_vm0, %v3130_v4  ;;  %3030 = vmatprep.subr.msk.bf16.mxu1 %vm34_vm0, %v3131_v5  ;;  %v3171_v3 = vld [vmem:[%s4142_s3 + $0x3d0] sm:$0xff]  }
 0x1a1   :  { %v3172_v4 = vld [vmem:[%s4142_s3 + $0x310] sm:$0xff]  }
 0x1a2   :  { %v3173_v5 = vld [vmem:[%s4142_s3 + $0x390] sm:$0xff]   ;;  %v1420_v39 = vsel %vm34_vm0, %v3172_v4, 0 }
 0x1a3   :  { %v1468_v6 = vsel %vm34_vm0, %v3173_v5, 0 }
 0x1a7   :  { %2914 = vmatpush3.bf16.xpose.msra.mxu0 %v1330_v8  ;;  %2934 = vmatpush3.bf16.xpose.msra.mxu1 %v1378_v9  ;;  %v3174_v8 = vld [vmem:[%s4142_s3 + $0x348] sm:$0xff]  }
 0x1a8   :  { %3023 = vmatprep.subr.msk.bf16.mxu0 %vm34_vm0, %v3134_v10  ;;  %3031 = vmatprep.subr.msk.bf16.mxu1 %vm34_vm0, %v3135_v11  ;;  %v3175_v9 = vld [vmem:[%s4142_s3 + $0x3c8] sm:$0xff]  }
 0x1a9   :  { %v3176_v10 = vld [vmem:[%s4142_s3 + $0x308] sm:$0xff]  }
 0x1aa   :  { %v3177_v11 = vld [vmem:[%s4142_s3 + $0x388] sm:$0xff]   ;;  %v1417_v12 = vsel %vm34_vm0, %v3176_v10, 0 }
 0x1ab   :  { %v1465_v13 = vsel %vm34_vm0, %v3177_v11, 0 }
 0x1af   :  { %2916 = vmatpush3.bf16.xpose.msra.mxu0 %v1327_v14  ;;  %2936 = vmatpush3.bf16.xpose.msra.mxu1 %v1375_v15  ;;  %v3178_v14 = vld [vmem:[%s4142_s3 + $0x340] sm:$0xff]  }
 0x1b0   :  { %3024 = vmatprep.subr.msk.bf16.mxu0 %vm34_vm0, %v3138_v16  ;;  %3032 = vmatprep.subr.msk.bf16.mxu1 %vm34_vm0, %v3139_v17  ;;  %v3179_v15 = vld [vmem:[%s4142_s3 + $0x3c0] sm:$0xff]  }
 0x1b1   :  { %v3180_v16 = vld [vmem:[%s4142_s3 + $0x300] sm:$0xff]  }
 0x1b2   :  { %v3181_v17 = vld [vmem:[%s4142_s3 + $0x380] sm:$0xff]  }
 0x1b3   :  { %v1462_v24 = vsel %vm34_vm0, %v3181_v17, 0 }
 0x1b7   :  { %2918 = vmatpush3.bf16.xpose.msra.mxu0 %v1324_v20  ;;  %2938 = vmatpush3.bf16.xpose.msra.mxu1 %v1372_v21  ;;  %v2046_v20 = vld [vmem:[%s4144_s5 + $0x88] sm:$0xff] }
 0x1b8   :  { %3025 = vmatprep.subr.msk.bf16.mxu0 %vm34_vm0, %v3142_v22  ;;  %3033 = vmatprep.subr.msk.bf16.mxu1 %vm34_vm0, %v3143_v23  ;;  %v2054_v21 = vld [vmem:[%s4144_s5 + $0xc8] sm:$0xff]  ;;  %v399_v22 = vlaneseq  ;;  %v1414_v23 = vsel %vm34_vm0, %v3180_v16, 0 }
 0x1bf   :  { %2920 = vmatpush3.bf16.xpose.msra.mxu0 %v1321_v26  ;;  %2940 = vmatpush3.bf16.xpose.msra.mxu1 %v1369_v27  ;;  %v2813_v26 = vcombine.high %v2046_v20, %v2054_v21  ;;  %v3893_v27 = vshrl.u32 %v399_v22, 7 }
 0x1c0   :  { %3026 = vmatprep.subr.msk.bf16.mxu0 %vm34_vm0, %v3146_v28  ;;  %3034 = vmatprep.subr.msk.bf16.mxu1 %vm34_vm0, %v3147_v29 }
 0x1c1   :  { %v405_v28 = vsub.s32 1, %v3893_v27  ;;  %v413_v29 = vsub.s32 3, %v3893_v27  ;;  %v401_v47 = vsub.s32 0, %v3893_v27 }
 0x1c7   :  { %2922 = vmatpush3.bf16.xpose.msra.mxu0 %v1318_v34  ;;  %2942 = vmatpush3.bf16.xpose.msra.mxu1 %v1366_v35  ;;  %v2030_v34 = vld [vmem:[%s4144_s5 + $0x8] sm:$0xff] }
 0x1c8   :  { %3035 = vmatprep.subr.msk.bf16.mxu0 %vm34_vm0, %v3150_v36  ;;  %3043 = vmatprep.subr.msk.bf16.mxu1 %vm34_vm0, %v3151_v37  ;;  %v2038_v35 = vld [vmem:[%s4144_s5 + $0x48] sm:$0xff]  ;;  %v2810_v36 = vcombine.low %v2045_v18, %v2053_v19  ;;  %v2812_v37 = vcombine.low %v2046_v20, %v2054_v21 }
 0x1c9   :  { %v2797_v46 = vcombine.high %v2030_v34, %v2038_v35 }
 0x1ce   :  { %2924 = vmatmul.mubr.msk.bf16.vlgmr.msra.gmra.mxu0 %vm34_vm0, %v3455_v1  ;;  %2944 = vmatmul.mubr.msk.bf16.vlgmr.msra.gmra.mxu1 %vm34_vm0, %v3455_v1 }
 0x1cf   :  { %2925 = vmatprep.mubr.msk.bf16.mxu0 %vm34_vm0, %v3473_v7  ;;  %2945 = vmatprep.mubr.msk.bf16.mxu1 %vm34_vm0, %v3473_v7 }
 0x1d0   :  { %2948 = vmatpush3.bf16.xpose.msra.mxu0 %v1435_v42  ;;  %2968 = vmatpush3.bf16.xpose.msra.mxu1 %v1483_v43  ;;  %v3917_v43 = vrot.slane %v3912_v40, %v405_v28 }
 0x1d1   :  { %3036 = vmatprep.subr.msk.bf16.mxu0 %vm34_vm0, %v3154_v44  ;;  %3044 = vmatprep.subr.msk.bf16.mxu1 %vm34_vm0, %v3155_v45  ;;  %v3922_v44 = vrot.slane %v3912_v40, %v413_v29  ;;  %v2795_v45 = vcombine.high %v2029_v32, %v2037_v33 }
 0x1d6   :  { %2926 = vmatmul.mubr.msk.bf16.gmra.mxu0 %vm34_vm0, %v3473_v7  ;;  %2946 = vmatmul.mubr.msk.bf16.gmra.mxu1 %vm34_vm0, %v3473_v7 }
 0x1d7   :  { %2963 = vmatprep.mubr.msk.bf16.mxu0 %vm34_vm0, %v3455_v1  ;;  %2983 = vmatprep.mubr.msk.bf16.mxu1 %vm34_vm0, %v3455_v1 }
 0x1d8   :  { %2950 = vmatpush3.bf16.xpose.msra.mxu0 %v1432_v48  ;;  %2970 = vmatpush3.bf16.xpose.msra.mxu1 %v1480_v49  ;;  %v409_v48 = vsub.s32 2, %v3893_v27 }
 0x1d9   :  { %3037 = vmatprep.subr.msk.bf16.mxu0 %vm34_vm0, %v3158_v50  ;;  %3045 = vmatprep.subr.msk.bf16.mxu1 %vm34_vm0, %v3159_v51 }
 0x1e0   :  { %2952 = vmatpush3.bf16.xpose.msra.mxu0 %v1429_v54  ;;  %2972 = vmatpush3.bf16.xpose.msra.mxu1 %v1477_v55  ;;  %v3939_v54 = vld [vmem:[%s4144_s5 + $0x90] sm:$0xff] }
 0x1e1   :  { %3038 = vmatprep.subr.msk.bf16.mxu0 %vm34_vm0, %v3162_v56  ;;  %3046 = vmatprep.subr.msk.bf16.mxu1 %vm34_vm0, %v3163_v57  ;;  %v3944_v55 = vld [vmem:[%s4144_s5 + $0xd0] sm:$0xff]  ;;  %v402_v56 = vrot.slane %v3912_v40, %v401_v47  ;;  %v410_v57 = vrot.slane %v3912_v40, %v409_v48 }
 0x1e2   :  { %v2815_v4 = vcombine.high %v3939_v54, %v3944_v55 }
 0x1e8   :  { %2954 = vmatpush3.bf16.xpose.msra.mxu0 %v1426_v60  ;;  %2974 = vmatpush3.bf16.xpose.msra.mxu1 %v1474_v30 }
 0x1e9   :  { %3039 = vmatprep.subr.msk.bf16.mxu0 %vm34_vm0, %v3166_v38  ;;  %3047 = vmatprep.subr.msk.bf16.mxu1 %vm34_vm0, %v3167_v61  ;;  %v2794_v38 = vcombine.low %v2029_v32, %v2037_v33  ;;  %v2048_v61 = vld [vmem:[%s4144_s5 + $0x98] sm:$0xff]  ;;  %v2814_v33 = vcombine.low %v3939_v54, %v3944_v55 }
 0x1f0   :  { %2956 = vmatpush3.bf16.xpose.msra.mxu0 %v1423_v0  ;;  %2976 = vmatpush3.bf16.xpose.msra.mxu1 %v1471_v2  ;;  %v2796_v2 = vcombine.low %v2030_v34, %v2038_v35  ;;  %v2816_v34 = vcombine.low %v2048_v61, %v2056_v62  ;;  %v2039_v35 = vld [vmem:[%s4144_s5 + $0x50] sm:$0xff] }
 0x1f1   :  { %3040 = vmatprep.subr.msk.bf16.mxu0 %vm34_vm0, %v3170_v31  ;;  %3048 = vmatprep.subr.msk.bf16.mxu1 %vm34_vm0, %v3171_v3 }
 0x1f8   :  { %2958 = vmatpush3.bf16.xpose.msra.mxu0 %v1420_v39  ;;  %2978 = vmatpush3.bf16.xpose.msra.mxu1 %v1468_v6 }
 0x1f9   :  { %3041 = vmatprep.subr.msk.bf16.mxu0 %vm34_vm0, %v3174_v8  ;;  %3049 = vmatprep.subr.msk.bf16.mxu1 %vm34_vm0, %v3175_v9 }
 0x200   :  { %2960 = vmatpush3.bf16.xpose.msra.mxu0 %v1417_v12  ;;  %2980 = vmatpush3.bf16.xpose.msra.mxu1 %v1465_v13  ;;  %v2817_v13 = vcombine.high %v2048_v61, %v2056_v62 }
 0x201   :  { %3042 = vmatprep.subr.msk.bf16.mxu0 %vm34_vm0, %v3178_v14  ;;  %3050 = vmatprep.subr.msk.bf16.mxu1 %vm34_vm0, %v3179_v15 }
 0x208   :  { %2962 = vmatpush3.bf16.xpose.msra.mxu0 %v1414_v23  ;;  %2982 = vmatpush3.bf16.xpose.msra.mxu1 %v1462_v24 }
 0x209   :  { %2233 = vmatprep.subr.bf16.mxu0 %v2811_v25  ;;  %2282 = vmatprep.subr.bf16.mxu1 %v2813_v26  ;;  %v2031_v25 = vld [vmem:[%s4144_s5 + $0x10] sm:$0xff] }
 0x20a   :  { %v2798_v62 = vcombine.low %v2031_v25, %v2039_v35 }
 0x20d   :  { %v1543_v41 = vpop.f32.mrf.mxu0  ;;  %v1596_v42 = vpop.f32.mrf.mxu1 }
 0x20e   :  { %v1544_v9 = vadd.f32 %v1543_v41, %v402_v56  ;;  %v1597_v10 = vadd.f32 %v1596_v42, %v410_v57 }
 0x20f   :  { %2964 = vmatmul.mubr.msk.bf16.vlgmr.msra.gmra.mxu0 %vm34_vm0, %v3455_v1  ;;  %2984 = vmatmul.mubr.msk.bf16.vlgmr.msra.gmra.mxu1 %vm34_vm0, %v3455_v1  ;;  %v1545_v49 = vpop.f32.mrf.mxu0  ;;  %v1598_v50 = vpop.f32.mrf.mxu1 }
 0x210   :  { %2965 = vmatprep.mubr.msk.bf16.mxu0 %vm34_vm0, %v3473_v7  ;;  %2985 = vmatprep.mubr.msk.bf16.mxu1 %vm34_vm0, %v3473_v7  ;;  %v1546_v53 = vadd.f32 %v1545_v49, %v3917_v43  ;;  %v1599_v1 = vadd.f32 %v1598_v50, %v3922_v44  ;;  %v1933_v22 = vmax.f32 %v1544_v9, 0.0  ;;  %v1935_v23 = vmax.f32 %v1597_v10, 0.0 }
 0x211   :  { %2234 = vmatpush1.bf16.xpose.msra.mxu0 %v2810_v36  ;;  %2283 = vmatpush1.bf16.xpose.msra.mxu1 %v2812_v37  ;;  %v1547_v51 = vpop.f32.mrf.mxu0  ;;  %v1600_v52 = vpop.f32.mrf.mxu1  ;;  %v2032_v36 = vld [vmem:[%s4144_s5 + $0x18] sm:$0xff] }
 0x212   :  { %2235 = vmatprep.subr.bf16.mxu0 %v2795_v45  ;;  %2284 = vmatprep.subr.bf16.mxu1 %v2797_v46  ;;  %v1548_v63 = vadd.f32 %v1547_v51, %v402_v56  ;;  %v1601_v0 = vadd.f32 %v1600_v52, %v410_v57  ;;  %v1934_v5 = vmax.f32 %v1546_v53, 0.0  ;;  %v1936_v39 = vmax.f32 %v1599_v1, 0.0  ;;  %v2040_v37 = vld [vmem:[%s4144_s5 + $0x58] sm:$0xff] }
 0x213   :  { %v1549_v58 = vpop.f32.mrf.mxu0  ;;  %v1602_v59 = vpop.f32.mrf.mxu1  ;;  %v2799_v52 = vcombine.high %v2031_v25, %v2039_v35  ;;  %v2801_v53 = vcombine.high %v2032_v36, %v2040_v37 }
 0x214   :  { %v1550_v60 = vadd.f32 %v1549_v58, %v3917_v43  ;;  %v1603_v30 = vadd.f32 %v1602_v59, %v3922_v44  ;;  %v1949_v16 = vmax.f32 %v1548_v63, 0.0  ;;  %v1951_v17 = vmax.f32 %v1601_v0, 0.0 }
 0x215   :  { %v1553_v31 = vpop.f32.mrf.mxu0  ;;  %v1606_v3 = vpop.f32.mrf.mxu1  ;;  %v2800_v63 = vcombine.low %v2032_v36, %v2040_v37  ;;  %v4032_v36 = vld [vmem:[%s4144_s5 + $0x60] sm:$0xff] }
 0x216   :  { %v1950_v6 = vmax.f32 %v1550_v60, 0.0  ;;  %v1952_v8 = vmax.f32 %v1603_v30, 0.0  ;;  %v1997_v41 = vpack.c.bf16 %v1949_v16, %v1933_v22  ;;  %v1999_v42 = vpack.c.bf16 %v1951_v17, %v1935_v23  ;;  %v3987_v60 = vld [vmem:[%s4144_s5 + $0xa0] sm:$0xff]  ;;  %v4002_v30 = vld [vmem:[%s4144_s5 + $0xe8] sm:$0xff] }
 0x217   :  { %2966 = vmatmul.mubr.msk.bf16.gmra.mxu0 %vm34_vm0, %v3473_v7  ;;  %2986 = vmatmul.mubr.msk.bf16.gmra.mxu1 %vm34_vm0, %v3473_v7  ;;  %v1555_v11 = vpop.f32.mrf.mxu0  ;;  %v1608_v12 = vpop.f32.mrf.mxu1  ;;  %v1554_v51 = vadd.f32 %v1553_v31, %v402_v56  ;;  %v1607_v1 = vadd.f32 %v1606_v3, %v410_v57 }
 0x218   :  { %v1998_v14 = vpack.c.bf16 %v1950_v6, %v1934_v5  ;;  %v2000_v15 = vpack.c.bf16 %v1952_v8, %v1936_v39  ;;  %v1556_v18 = vadd.f32 %v1555_v11, %v3917_v43  ;;  %v1609_v19 = vadd.f32 %v1608_v12, %v3922_v44 }
 0x219   :  { %2236 = vmatpush1.bf16.xpose.msra.mxu0 %v2794_v38  ;;  %2285 = vmatpush1.bf16.xpose.msra.mxu1 %v2796_v2  ;;  %v1557_v20 = vpop.f32.mrf.mxu0  ;;  %v1610_v21 = vpop.f32.mrf.mxu1  ;;  %v1965_v38 = vmax.f32 %v1554_v51, 0.0  ;;  %v1967_v61 = vmax.f32 %v1607_v1, 0.0  ;;  %v429_v5 = vsub.s32 7, %v3893_v27  ;;  %v417_v39 = vsub.s32 4, %v3893_v27 }
 0x21a   :  { %2253 = vmatprep.mubr.bf16.mxu0 %v1998_v14  ;;  %2302 = vmatprep.mubr.bf16.mxu1 %v2000_v15  ;;  %v1558_v45 = vadd.f32 %v1557_v20, %v402_v56  ;;  %v1611_v46 = vadd.f32 %v1610_v21, %v410_v57  ;;  %v3992_v56 = vld [vmem:[%s4144_s5 + $0xe0] sm:$0xff]  ;;  %v3997_v57 = vld [vmem:[%s4144_s5 + $0xa8] sm:$0xff]  ;;  %v425_v6 = vsub.s32 6, %v3893_v27 }
 0x21b   :  { %v1559_v7 = vpop.f32.mrf.mxu0  ;;  %v1612_v24 = vpop.f32.mrf.mxu1  ;;  %2331 = vmatprep.subr.bf16.mxu0 %v2815_v4  ;;  %2380 = vmatprep.subr.bf16.mxu1 %v2817_v13  ;;  %v2819_v31 = vcombine.high %v3987_v60, %v3992_v56  ;;  %v2821_v3 = vcombine.high %v3997_v57, %v4002_v30  ;;  %v421_v4 = vsub.s32 5, %v3893_v27  ;;  %v430_v11 = vrot.slane %v3912_v40, %v429_v5 }
 0x21c   :  { %v1560_v26 = vadd.f32 %v1559_v7, %v3917_v43  ;;  %v1613_v32 = vadd.f32 %v1612_v24, %v3922_v44  ;;  %v1966_v43 = vmax.f32 %v1556_v18, 0.0  ;;  %v1968_v44 = vmax.f32 %v1609_v19, 0.0 }
 0x21d   :  { %v1981_v58 = vmax.f32 %v1558_v45, 0.0  ;;  %v1983_v59 = vmax.f32 %v1611_v46, 0.0  ;;  %v422_v10 = vrot.slane %v3912_v40, %v421_v4  ;;  %v418_v12 = vrot.slane %v3912_v40, %v417_v39  ;;  %v2042_v45 = vld [vmem:[%s4144_s5 + $0x68] sm:$0xff] }
 0x21e   :  { %v1982_v49 = vmax.f32 %v1560_v26, 0.0  ;;  %v1984_v50 = vmax.f32 %v1613_v32, 0.0  ;;  %v426_v13 = vrot.slane %v3912_v40, %v425_v6  ;;  %v4027_v40 = vld [vmem:[%s4144_s5 + $0x20] sm:$0xff] }
 0x21f   :  { %v2013_v0 = vpack.c.bf16 %v1981_v58, %v1965_v38  ;;  %v2015_v2 = vpack.c.bf16 %v1983_v59, %v1967_v61 }
 0x220   :  { %v2014_v54 = vpack.c.bf16 %v1982_v49, %v1966_v43  ;;  %v2016_v55 = vpack.c.bf16 %v1984_v50, %v1968_v44  ;;  %2254 = vmatmul.mubr.bf16.vlgmr.msra.gmra.mxu0 %v1997_v41  ;;  %2303 = vmatmul.mubr.bf16.vlgmr.msra.gmra.mxu1 %v1999_v42  ;;  %v2034_v44 = vld [vmem:[%s4144_s5 + $0x28] sm:$0xff] }
 0x221   :  { %2332 = vmatpush1.bf16.xpose.msra.mxu0 %v2814_v33  ;;  %2381 = vmatpush1.bf16.xpose.msra.mxu1 %v2816_v34 }
 0x222   :  { %2261 = vmatprep.mubr.bf16.mxu0 %v2014_v54  ;;  %2310 = vmatprep.mubr.bf16.mxu1 %v2016_v55  ;;  %v2820_v54 = vcombine.low %v3997_v57, %v4002_v30  ;;  %v2803_v55 = vcombine.high %v4027_v40, %v4032_v36 }
 0x223   :  { %2333 = vmatprep.subr.bf16.mxu0 %v2799_v52  ;;  %2382 = vmatprep.subr.bf16.mxu1 %v2801_v53  ;;  %v2818_v52 = vcombine.low %v3987_v60, %v3992_v56 }
 0x228   :  { %2262 = vmatmul.mubr.bf16.gmra.mxu0 %v2013_v0  ;;  %2311 = vmatmul.mubr.bf16.gmra.mxu1 %v2015_v2 }
 0x229   :  { %2334 = vmatpush1.bf16.xpose.msra.mxu0 %v2798_v62  ;;  %2383 = vmatpush1.bf16.xpose.msra.mxu1 %v2800_v63  ;;  %v2805_v63 = vcombine.high %v2034_v44, %v2042_v45 }
 0x22a   :  { %2429 = vmatprep.subr.bf16.mxu0 %v2819_v31  ;;  %2478 = vmatprep.subr.bf16.mxu1 %v2821_v3 }
 0x24d   :  { %v1649_v8 = vpop.f32.mrf.mxu0  ;;  %v1702_v9 = vpop.f32.mrf.mxu1 }
 0x24e   :  { %v1650_v22 = vadd.f32 %v1649_v8, %v418_v12  ;;  %v1703_v23 = vadd.f32 %v1702_v9, %v426_v13 }
 0x24f   :  { %v1651_v14 = vpop.f32.mrf.mxu0  ;;  %v1704_v15 = vpop.f32.mrf.mxu1 }
 0x250   :  { %v1652_v18 = vadd.f32 %v1651_v14, %v422_v10  ;;  %v1705_v19 = vadd.f32 %v1704_v15, %v430_v11  ;;  %v1937_v46 = vmax.f32 %v1650_v22, 0.0  ;;  %v1939_v49 = vmax.f32 %v1703_v23, 0.0  ;;  %v4049_v15 = vld [vmem:[%s4144_s5 + $0xb0] sm:$0xff] }
 0x251   :  { %v1653_v16 = vpop.f32.mrf.mxu0  ;;  %v1706_v17 = vpop.f32.mrf.mxu1  ;;  %v2802_v23 = vcombine.low %v4027_v40, %v4032_v36 }
 0x252   :  { %v1654_v20 = vadd.f32 %v1653_v16, %v418_v12  ;;  %v1707_v21 = vadd.f32 %v1706_v17, %v426_v13  ;;  %v1938_v37 = vmax.f32 %v1652_v18, 0.0  ;;  %v1940_v41 = vmax.f32 %v1705_v19, 0.0  ;;  %v4059_v17 = vld [vmem:[%s4144_s5 + $0xb8] sm:$0xff] }
 0x253   :  { %v1655_v7 = vpop.f32.mrf.mxu0  ;;  %v1708_v24 = vpop.f32.mrf.mxu1  ;;  %v4064_v18 = vld [vmem:[%s4144_s5 + $0xf8] sm:$0xff] }
 0x254   :  { %v1656_v25 = vadd.f32 %v1655_v7, %v422_v10  ;;  %v1709_v26 = vadd.f32 %v1708_v24, %v430_v11  ;;  %v1953_v32 = vmax.f32 %v1654_v20, 0.0  ;;  %v1955_v33 = vmax.f32 %v1707_v21, 0.0 }
 0x255   :  { %v1659_v34 = vpop.f32.mrf.mxu0  ;;  %v1712_v35 = vpop.f32.mrf.mxu1  ;;  %v2804_v7 = vcombine.low %v2034_v44, %v2042_v45 }
 0x256   :  { %v1954_v42 = vmax.f32 %v1656_v25, 0.0  ;;  %v1956_v43 = vmax.f32 %v1709_v26, 0.0  ;;  %v2001_v58 = vpack.c.bf16 %v1953_v32, %v1937_v46  ;;  %v2003_v59 = vpack.c.bf16 %v1955_v33, %v1939_v49  ;;  %v4075_v33 = vld [vmem:[%s4143_s4 + $0x8] sm:$0xff] }
 0x257   :  { %v1661_v50 = vpop.f32.mrf.mxu0  ;;  %v1714_v51 = vpop.f32.mrf.mxu1  ;;  %v1660_v60 = vadd.f32 %v1659_v34, %v418_v12  ;;  %v1713_v56 = vadd.f32 %v1712_v35, %v426_v13  ;;  %v2825_v32 = vcombine.high %v4059_v17, %v4064_v18  ;;  %v438_v40 = vrot.slane %v4075_v33, %v405_v28 }
 0x258   :  { %v2002_v53 = vpack.c.bf16 %v1954_v42, %v1938_v37  ;;  %v2004_v1 = vpack.c.bf16 %v1956_v43, %v1940_v41  ;;  %v1662_v38 = vadd.f32 %v1661_v50, %v422_v10  ;;  %v1715_v0 = vadd.f32 %v1714_v51, %v430_v11 }
 0x259   :  { %v1663_v61 = vpop.f32.mrf.mxu0  ;;  %v1716_v62 = vpop.f32.mrf.mxu1  ;;  %v1969_v19 = vmax.f32 %v1660_v60, 0.0  ;;  %v1971_v20 = vmax.f32 %v1713_v56, 0.0  ;;  %v446_v36 = vrot.slane %v4075_v33, %v413_v29  ;;  %v434_v37 = vrot.slane %v4075_v33, %v401_v47 }
 0x25a   :  { %v1664_v2 = vadd.f32 %v1663_v61, %v418_v12  ;;  %v1717_v31 = vadd.f32 %v1716_v62, %v426_v13  ;;  %2351 = vmatprep.mubr.bf16.mxu0 %v2002_v53  ;;  %2400 = vmatprep.mubr.bf16.mxu1 %v2004_v1  ;;  %v4054_v12 = vld [vmem:[%s4144_s5 + $0xf0] sm:$0xff]  ;;  %v1970_v13 = vmax.f32 %v1662_v38, 0.0  ;;  %v1972_v16 = vmax.f32 %v1715_v0, 0.0 }
 0x25b   :  { %v1665_v3 = vpop.f32.mrf.mxu0  ;;  %v1718_v8 = vpop.f32.mrf.mxu1  ;;  %2352 = vmatmul.mubr.bf16.vlgmr.msra.gmra.mxu0 %v2001_v58  ;;  %2401 = vmatmul.mubr.bf16.vlgmr.msra.gmra.mxu1 %v2003_v59  ;;  %v2823_v26 = vcombine.high %v4049_v15, %v4054_v12  ;;  %v442_v41 = vrot.slane %v4075_v33, %v409_v48  ;;  %v2035_v48 = vld [vmem:[%s4144_s5 + $0x30] sm:$0xff] }
 0x25c   :  { %v1666_v57 = vadd.f32 %v1665_v3, %v422_v10  ;;  %v1719_v30 = vadd.f32 %v1718_v8, %v430_v11  ;;  %2430 = vmatpush1.bf16.xpose.msra.mxu0 %v2818_v52  ;;  %2479 = vmatpush1.bf16.xpose.msra.mxu1 %v2820_v54  ;;  %v1985_v9 = vmax.f32 %v1664_v2, 0.0  ;;  %v1987_v14 = vmax.f32 %v1717_v31, 0.0  ;;  %v2043_v38 = vld [vmem:[%s4144_s5 + $0x70] sm:$0xff]  ;;  %v2036_v2 = vld [vmem:[%s4144_s5 + $0x38] sm:$0xff] }
 0x25d   :  { %2431 = vmatprep.subr.bf16.mxu0 %v2803_v55  ;;  %2480 = vmatprep.subr.bf16.mxu1 %v2805_v63  ;;  %v2044_v31 = vld [vmem:[%s4144_s5 + $0x78] sm:$0xff] }
 0x25e   :  { %v1986_v10 = vmax.f32 %v1666_v57, 0.0  ;;  %v1988_v11 = vmax.f32 %v1719_v30, 0.0  ;;  %v2017_v24 = vpack.c.bf16 %v1985_v9, %v1969_v19  ;;  %v2019_v25 = vpack.c.bf16 %v1987_v14, %v1971_v20 }
 0x25f   :  { %v2822_v57 = vcombine.low %v4049_v15, %v4054_v12  ;;  %v2824_v14 = vcombine.low %v4059_v17, %v4064_v18 }
 0x260   :  { %v2018_v21 = vpack.c.bf16 %v1986_v10, %v1970_v13  ;;  %v2020_v22 = vpack.c.bf16 %v1988_v11, %v1972_v16  ;;  %v2807_v13 = vcombine.high %v2035_v48, %v2043_v38 }
 0x262   :  { %2359 = vmatprep.mubr.bf16.mxu0 %v2018_v21  ;;  %2408 = vmatprep.mubr.bf16.mxu1 %v2020_v22  ;;  %v2809_v21 = vcombine.high %v2036_v2, %v2044_v31 }
 0x263   :  { %2360 = vmatmul.mubr.bf16.gmra.mxu0 %v2017_v24  ;;  %2409 = vmatmul.mubr.bf16.gmra.mxu1 %v2019_v25 }
 0x264   :  { %2432 = vmatpush1.bf16.xpose.msra.mxu0 %v2802_v23  ;;  %2481 = vmatpush1.bf16.xpose.msra.mxu1 %v2804_v7 }
 0x265   :  { %2527 = vmatprep.subr.bf16.mxu0 %v2823_v26  ;;  %2576 = vmatprep.subr.bf16.mxu1 %v2825_v32 }
 0x28e   :  { %v1755_v34 = vpop.f32.mrf.mxu0  ;;  %v1808_v35 = vpop.f32.mrf.mxu1 }
 0x28f   :  { %v1756_v51 = vadd.f32 %v1755_v34, %v434_v37  ;;  %v1809_v52 = vadd.f32 %v1808_v35, %v442_v41 }
 0x290   :  { %v1757_v42 = vpop.f32.mrf.mxu0  ;;  %v1810_v43 = vpop.f32.mrf.mxu1 }
 0x291   :  { %v1758_v46 = vadd.f32 %v1757_v42, %v438_v40  ;;  %v1811_v49 = vadd.f32 %v1810_v43, %v446_v36  ;;  %v1941_v60 = vmax.f32 %v1756_v51, 0.0  ;;  %v1943_v56 = vmax.f32 %v1809_v52, 0.0 }
 0x292   :  { %v1759_v44 = vpop.f32.mrf.mxu0  ;;  %v1812_v45 = vpop.f32.mrf.mxu1  ;;  %v454_v51 = vrot.slane %v4075_v33, %v421_v4  ;;  %v462_v52 = vrot.slane %v4075_v33, %v429_v5 }
 0x293   :  { %v1760_v50 = vadd.f32 %v1759_v44, %v434_v37  ;;  %v1813_v28 = vadd.f32 %v1812_v45, %v442_v41  ;;  %v1942_v61 = vmax.f32 %v1758_v46, 0.0  ;;  %v1944_v62 = vmax.f32 %v1811_v49, 0.0 }
 0x294   :  { %v1761_v53 = vpop.f32.mrf.mxu0  ;;  %v1814_v29 = vpop.f32.mrf.mxu1  ;;  %v2806_v46 = vcombine.low %v2035_v48, %v2043_v38  ;;  %v2808_v49 = vcombine.low %v2036_v2, %v2044_v31 }
 0x295   :  { %v1762_v1 = vadd.f32 %v1761_v53, %v438_v40  ;;  %v1815_v54 = vadd.f32 %v1814_v29, %v446_v36  ;;  %v1957_v55 = vmax.f32 %v1760_v50, 0.0  ;;  %v1959_v47 = vmax.f32 %v1813_v28, 0.0 }
 0x296   :  { %v1765_v58 = vpop.f32.mrf.mxu0  ;;  %v1818_v59 = vpop.f32.mrf.mxu1  ;;  %v450_v53 = vrot.slane %v4075_v33, %v417_v39  ;;  %v458_v29 = vrot.slane %v4075_v33, %v425_v6 }
 0x297   :  { %v1958_v63 = vmax.f32 %v1762_v1, 0.0  ;;  %v1960_v0 = vmax.f32 %v1815_v54, 0.0  ;;  %v2005_v16 = vpack.c.bf16 %v1957_v55, %v1941_v60  ;;  %v2007_v10 = vpack.c.bf16 %v1959_v47, %v1943_v56 }
 0x298   :  { %v1767_v3 = vpop.f32.mrf.mxu0  ;;  %v1820_v8 = vpop.f32.mrf.mxu1  ;;  %v1766_v24 = vadd.f32 %v1765_v58, %v434_v37  ;;  %v1819_v25 = vadd.f32 %v1818_v59, %v442_v41 }
 0x299   :  { %v2006_v30 = vpack.c.bf16 %v1958_v63, %v1942_v61  ;;  %v2008_v9 = vpack.c.bf16 %v1960_v0, %v1944_v62  ;;  %v1768_v11 = vadd.f32 %v1767_v3, %v438_v40  ;;  %v1821_v22 = vadd.f32 %v1820_v8, %v446_v36 }
 0x29a   :  { %v1769_v19 = vpop.f32.mrf.mxu0  ;;  %v1822_v20 = vpop.f32.mrf.mxu1  ;;  %v1973_v44 = vmax.f32 %v1766_v24, 0.0  ;;  %v1975_v45 = vmax.f32 %v1819_v25, 0.0 }
 0x29b   :  { %v1770_v23 = vadd.f32 %v1769_v19, %v434_v37  ;;  %v1823_v7 = vadd.f32 %v1822_v20, %v442_v41  ;;  %2449 = vmatprep.mubr.bf16.mxu0 %v2006_v30  ;;  %2498 = vmatprep.mubr.bf16.mxu1 %v2008_v9  ;;  %v1974_v34 = vmax.f32 %v1768_v11, 0.0  ;;  %v1976_v35 = vmax.f32 %v1821_v22, 0.0 }
 0x29c   :  { %v1771_v15 = vpop.f32.mrf.mxu0  ;;  %v1824_v12 = vpop.f32.mrf.mxu1  ;;  %2450 = vmatmul.mubr.bf16.vlgmr.msra.gmra.mxu0 %v2005_v16  ;;  %2499 = vmatmul.mubr.bf16.vlgmr.msra.gmra.mxu1 %v2007_v10 }
 0x29d   :  { %v1772_v26 = vadd.f32 %v1771_v15, %v438_v40  ;;  %v1825_v17 = vadd.f32 %v1824_v12, %v446_v36  ;;  %2528 = vmatpush1.bf16.xpose.msra.mxu0 %v2822_v57  ;;  %2577 = vmatpush1.bf16.xpose.msra.mxu1 %v2824_v14  ;;  %v1989_v18 = vmax.f32 %v1770_v23, 0.0  ;;  %v1991_v32 = vmax.f32 %v1823_v7, 0.0 }
 0x29e   :  { %2529 = vmatprep.subr.bf16.mxu0 %v2807_v13  ;;  %2578 = vmatprep.subr.bf16.mxu1 %v2809_v21 }
 0x29f   :  { %v1990_v42 = vmax.f32 %v1772_v26, 0.0  ;;  %v1992_v43 = vmax.f32 %v1825_v17, 0.0  ;;  %v2021_v50 = vpack.c.bf16 %v1989_v18, %v1973_v44  ;;  %v2023_v28 = vpack.c.bf16 %v1991_v32, %v1975_v45 }
 0x2a1   :  { %v2022_v37 = vpack.c.bf16 %v1990_v42, %v1974_v34  ;;  %v2024_v41 = vpack.c.bf16 %v1992_v43, %v1976_v35 }
 0x2a3   :  { %2457 = vmatprep.mubr.bf16.mxu0 %v2022_v37  ;;  %2506 = vmatprep.mubr.bf16.mxu1 %v2024_v41 }
 0x2a4   :  { %2458 = vmatmul.mubr.bf16.gmra.mxu0 %v2021_v50  ;;  %2507 = vmatmul.mubr.bf16.gmra.mxu1 %v2023_v28 }
 0x2a5   :  { %2530 = vmatpush1.bf16.xpose.msra.mxu0 %v2806_v46  ;;  %2579 = vmatpush1.bf16.xpose.msra.mxu1 %v2808_v49 }
 0x2cf   :  { %v1861_v40 = vpop.f32.mrf.mxu0  ;;  %v1914_v36 = vpop.f32.mrf.mxu1 }
 0x2d0   :  { %v1862_v38 = vadd.f32 %v1861_v40, %v450_v53  ;;  %v1915_v61 = vadd.f32 %v1914_v36, %v458_v29 }
 0x2d1   :  { %v1863_v1 = vpop.f32.mrf.mxu0  ;;  %v1916_v54 = vpop.f32.mrf.mxu1 }
 0x2d2   :  { %v1864_v58 = vadd.f32 %v1863_v1, %v454_v51  ;;  %v1917_v59 = vadd.f32 %v1916_v54, %v462_v52  ;;  %v1945_v3 = vmax.f32 %v1862_v38, 0.0  ;;  %v1947_v8 = vmax.f32 %v1915_v61, 0.0 }
 0x2d3   :  { %v1865_v55 = vpop.f32.mrf.mxu0  ;;  %v1918_v47 = vpop.f32.mrf.mxu1 }
 0x2d4   :  { %v1866_v48 = vadd.f32 %v1865_v55, %v450_v53  ;;  %v1919_v4 = vadd.f32 %v1918_v47, %v458_v29  ;;  %v1946_v60 = vmax.f32 %v1864_v58, 0.0  ;;  %v1948_v6 = vmax.f32 %v1917_v59, 0.0 }
 0x2d5   :  { %v1867_v62 = vpop.f32.mrf.mxu0  ;;  %v1920_v5 = vpop.f32.mrf.mxu1 }
 0x2d6   :  { %v1868_v63 = vadd.f32 %v1867_v62, %v454_v51  ;;  %v1921_v0 = vadd.f32 %v1920_v5, %v462_v52  ;;  %v1961_v2 = vmax.f32 %v1866_v48, 0.0  ;;  %v1963_v39 = vmax.f32 %v1919_v4, 0.0 }
 0x2d7   :  { %v1871_v31 = vpop.f32.mrf.mxu0  ;;  %v1924_v27 = vpop.f32.mrf.mxu1 }
 0x2d8   :  { %v1962_v33 = vmax.f32 %v1868_v63, 0.0  ;;  %v1964_v56 = vmax.f32 %v1921_v0, 0.0  ;;  %v2009_v13 = vpack.c.bf16 %v1961_v2, %v1945_v3  ;;  %v2011_v16 = vpack.c.bf16 %v1963_v39, %v1947_v8 }
 0x2d9   :  { %v1873_v57 = vpop.f32.mrf.mxu0  ;;  %v1926_v30 = vpop.f32.mrf.mxu1  ;;  %v1872_v23 = vadd.f32 %v1871_v31, %v450_v53  ;;  %v1925_v7 = vadd.f32 %v1924_v27, %v458_v29 }
 0x2da   :  { %v2010_v9 = vpack.c.bf16 %v1962_v33, %v1946_v60  ;;  %v2012_v14 = vpack.c.bf16 %v1964_v56, %v1948_v6  ;;  %v1874_v10 = vadd.f32 %v1873_v57, %v454_v51  ;;  %v1927_v20 = vadd.f32 %v1926_v30, %v462_v52 }
 0x2db   :  { %v1875_v11 = vpop.f32.mrf.mxu0  ;;  %v1928_v19 = vpop.f32.mrf.mxu1  ;;  %v1977_v44 = vmax.f32 %v1872_v23, 0.0  ;;  %v1979_v45 = vmax.f32 %v1925_v7, 0.0 }
 0x2dc   :  { %v1876_v21 = vadd.f32 %v1875_v11, %v450_v53  ;;  %v1929_v22 = vadd.f32 %v1928_v19, %v458_v29  ;;  %2547 = vmatprep.mubr.bf16.mxu0 %v2010_v9  ;;  %2596 = vmatprep.mubr.bf16.mxu1 %v2012_v14  ;;  %v1978_v18 = vmax.f32 %v1874_v10, 0.0  ;;  %v1980_v32 = vmax.f32 %v1927_v20, 0.0 }
 0x2dd   :  { %v1877_v24 = vpop.f32.mrf.mxu0  ;;  %v1930_v25 = vpop.f32.mrf.mxu1  ;;  %2548 = vmatmul.mubr.bf16.vlgmr.msra.gmra.mxu0 %v2009_v13  ;;  %2597 = vmatmul.mubr.bf16.vlgmr.msra.gmra.mxu1 %v2011_v16 }
 0x2de   :  { %v1878_v15 = vadd.f32 %v1877_v24, %v454_v51  ;;  %v1931_v12 = vadd.f32 %v1930_v25, %v462_v52  ;;  %v1993_v26 = vmax.f32 %v1876_v21, 0.0  ;;  %v1995_v17 = vmax.f32 %v1929_v22, 0.0 }
 0x2e0   :  { %v1994_v34 = vmax.f32 %v1878_v15, 0.0  ;;  %v1996_v35 = vmax.f32 %v1931_v12, 0.0  ;;  %v2255_v42 = vpop.f32.mrf.mxu0  ;;  %v2304_v43 = vpop.f32.mrf.mxu1  ;;  %v2025_v28 = vpack.c.bf16 %v1993_v26, %v1977_v44  ;;  %v2027_v40 = vpack.c.bf16 %v1995_v17, %v1979_v45 }
 0x2e1   :  { %v2305_v37 = vadd.f32 %v2304_v43, %v2255_v42 }
 0x2e2   :  { %v2026_v41 = vpack.c.bf16 %v1994_v34, %v1978_v18  ;;  %v2028_v46 = vpack.c.bf16 %v1996_v35, %v1980_v32  ;;  %v2257_v49 = vpop.f32.mrf.mxu0  ;;  %v2306_v50 = vpop.f32.mrf.mxu1 }
 0x2e4   :  { %v2258_v36 = vpop.f32.mrf.mxu0  ;;  %v2307_v51 = vpop.f32.mrf.mxu1  ;;  %2555 = vmatprep.mubr.bf16.mxu0 %v2026_v41  ;;  %2604 = vmatprep.mubr.bf16.mxu1 %v2028_v46 }
 0x2e5   :  { %v2308_v52 = vadd.f32 %v2307_v51, %v2258_v36  ;;  %2556 = vmatmul.mubr.bf16.gmra.mxu0 %v2025_v28  ;;  %2605 = vmatmul.mubr.bf16.gmra.mxu1 %v2027_v40 }
 0x2e6   :  { %v2260_v53 = vpop.f32.mrf.mxu0  ;;  %v2309_v29 = vpop.f32.mrf.mxu1 }
 0x2e8   :  { %v2263_v1 = vpop.f32.mrf.mxu0  ;;  %v2312_v54 = vpop.f32.mrf.mxu1 }
 0x2e9   :  { %v2313_v55 = vadd.f32 %v2312_v54, %v2263_v1  ;;  %v3198_v1 = vld [vmem:[%s4139_s0] sm:$0xff] }
 0x2ea   :  { %v2265_v47 = vpop.f32.mrf.mxu0  ;;  %v2314_v58 = vpop.f32.mrf.mxu1 }
 0x2ec   :  { %v2266_v59 = vpop.f32.mrf.mxu0  ;;  %v2315_v48 = vpop.f32.mrf.mxu1 }
 0x2ed   :  { %v2316_v4 = vadd.f32 %v2315_v48, %v2266_v59 }
 0x2ee   :  { %v2268_v38 = vpop.f32.mrf.mxu0  ;;  %v2317_v61 = vpop.f32.mrf.mxu1 }
 0x31b   :  { %v2353_v62 = vpop.f32.mrf.mxu0  ;;  %v2402_v5 = vpop.f32.mrf.mxu1 }
 0x31c   :  { %v2354_v63 = vadd.f32 %v2353_v62, %v2305_v37 }
 0x31d   :  { %v2355_v0 = vpop.f32.mrf.mxu0  ;;  %v2404_v2 = vpop.f32.mrf.mxu1 }
 0x31e   :  { %v2403_v39 = vadd.f32 %v2402_v5, %v2354_v63  ;;  %v3199_v5 = vld [vmem:[%s4139_s0 + $0x8] sm:$0xff] }
 0x31f   :  { %v2356_v31 = vpop.f32.mrf.mxu0  ;;  %v2405_v27 = vpop.f32.mrf.mxu1 }
 0x320   :  { %v2357_v60 = vadd.f32 %v2356_v31, %v2308_v52  ;;  %v2826_v52 = vld [vmem:[%s4145_s6] ss:$0 sm:$0xff] }
 0x321   :  { %v2358_v6 = vpop.f32.mrf.mxu0  ;;  %v2407_v33 = vpop.f32.mrf.mxu1 }
 0x322   :  { %v2406_v56 = vadd.f32 %v2405_v27, %v2357_v60 }
 0x323   :  { %v2361_v3 = vpop.f32.mrf.mxu0  ;;  %v2410_v8 = vpop.f32.mrf.mxu1 }
 0x324   :  { %v2362_v57 = vadd.f32 %v2361_v3, %v2313_v55 }
 0x325   :  { %v2363_v30 = vpop.f32.mrf.mxu0  ;;  %v2412_v9 = vpop.f32.mrf.mxu1 }
 0x326   :  { %v2411_v14 = vadd.f32 %v2410_v8, %v2362_v57 }
 0x327   :  { %v2364_v13 = vpop.f32.mrf.mxu0  ;;  %v2413_v16 = vpop.f32.mrf.mxu1 }
 0x328   :  { %v2365_v10 = vadd.f32 %v2364_v13, %v2316_v4  ;;  %v3201_v13 = vld [vmem:[%s4139_s0 + $0x18] sm:$0xff] }
 0x329   :  { %v2366_v11 = vpop.f32.mrf.mxu0  ;;  %v2415_v19 = vpop.f32.mrf.mxu1 }
 0x32a   :  { %v2414_v20 = vadd.f32 %v2413_v16, %v2365_v10 }
 0x35c   :  { %v2451_v21 = vpop.f32.mrf.mxu0  ;;  %v2500_v22 = vpop.f32.mrf.mxu1 }
 0x35d   :  { %v2452_v44 = vadd.f32 %v2451_v21, %v2403_v39 }
 0x35e   :  { %v2453_v23 = vpop.f32.mrf.mxu0  ;;  %v2502_v7 = vpop.f32.mrf.mxu1 }
 0x35f   :  { %v2501_v45 = vadd.f32 %v2500_v22, %v2452_v44 }
 0x360   :  { %v2454_v24 = vpop.f32.mrf.mxu0  ;;  %v2503_v25 = vpop.f32.mrf.mxu1 }
 0x361   :  { %v2455_v37 = vadd.f32 %v2454_v24, %v2406_v56  ;;  %v3200_v56 = vld [vmem:[%s4139_s0 + $0x10] sm:$0xff] }
 0x362   :  { %v2456_v15 = vpop.f32.mrf.mxu0  ;;  %v2505_v12 = vpop.f32.mrf.mxu1 }
 0x363   :  { %v2504_v40 = vadd.f32 %v2503_v25, %v2455_v37 }
 0x364   :  { %v2459_v26 = vpop.f32.mrf.mxu0  ;;  %v2508_v17 = vpop.f32.mrf.mxu1 }
 0x365   :  { %v2460_v36 = vadd.f32 %v2459_v26, %v2411_v14 }
 0x366   :  { %v2461_v18 = vpop.f32.mrf.mxu0  ;;  %v2510_v32 = vpop.f32.mrf.mxu1 }
 0x367   :  { %v2509_v59 = vadd.f32 %v2508_v17, %v2460_v36 }
 0x368   :  { %v2462_v34 = vpop.f32.mrf.mxu0  ;;  %v2511_v35 = vpop.f32.mrf.mxu1 }
 0x369   :  { %v2463_v48 = vadd.f32 %v2462_v34, %v2414_v20 }
 0x36a   :  { %v2464_v42 = vpop.f32.mrf.mxu0  ;;  %v2513_v43 = vpop.f32.mrf.mxu1 }
 0x36b   :  { %v2512_v31 = vadd.f32 %v2511_v35, %v2463_v48 }
 0x39d   :  { %v2549_v41 = vpop.f32.mrf.mxu0  ;;  %v2598_v46 = vpop.f32.mrf.mxu1 }
 0x39e   :  { %v2550_v49 = vadd.f32 %v2549_v41, %v2501_v45 }
 0x39f   :  { %v2551_v50 = vpop.f32.mrf.mxu0  ;;  %v2600_v28 = vpop.f32.mrf.mxu1 }
 0x3a0   :  { %v2599_v51 = vadd.f32 %v2598_v46, %v2550_v49 }
 0x3a1   :  { %v2552_v53 = vpop.f32.mrf.mxu0  ;;  %v2601_v29 = vpop.f32.mrf.mxu1 }
 0x3a2   :  { %v2613_v54 = vadd.f32 %v3198_v1, %v2599_v51  ;;  %v2553_v55 = vadd.f32 %v2552_v53, %v2504_v40 }
 0x3a3   :  { %v2554_v47 = vpop.f32.mrf.mxu0  ;;  %v2603_v58 = vpop.f32.mrf.mxu1 }
 0x3a4   :  { %v2624_v4 = vadd.f32 %v2826_v52, %v2613_v54  ;;  %v2602_v38 = vadd.f32 %v2601_v29, %v2553_v55 }
 0x3a5   :  { %v2557_v61 = vpop.f32.mrf.mxu0  ;;  %v2606_v62 = vpop.f32.mrf.mxu1 }
 0x3a6   :  { %2628 = vst.msk [vmem:[#allocation2] sm:$0xff] %vm34_vm0, %v2624_v4  ;;  %v2614_v63 = vadd.f32 %v3199_v5, %v2602_v38  ;;  %v2558_v0 = vadd.f32 %v2557_v61, %v2509_v59 }
 0x3a7   :  { %v2559_v2 = vpop.f32.mrf.mxu0  ;;  %v2608_v39 = vpop.f32.mrf.mxu1 }
 0x3a8   :  { %v2625_v27 = vadd.f32 %v2826_v52, %v2614_v63  ;;  %v2607_v60 = vadd.f32 %v2606_v62, %v2558_v0 }
 0x3a9   :  { %v2560_v6 = vpop.f32.mrf.mxu0  ;;  %v2609_v33 = vpop.f32.mrf.mxu1 }
 0x3aa   :  { %2629 = vst.msk [vmem:[#allocation2 + $0x8] sm:$0xff] %vm34_vm0, %v2625_v27  ;;  %v2615_v3 = vadd.f32 %v3200_v56, %v2607_v60  ;;  %v2561_v8 = vadd.f32 %v2560_v6, %v2512_v31 }
 0x3ab   :  { %v2562_v57 = vpop.f32.mrf.mxu0  ;;  %v2611_v30 = vpop.f32.mrf.mxu1 }
 0x3ac   :  { %v2626_v9 = vadd.f32 %v2826_v52, %v2615_v3  ;;  %v2610_v14 = vadd.f32 %v2609_v33, %v2561_v8 }
 0x3ae   :  { %2630 = vst.msk [vmem:[#allocation2 + $0x10] sm:$0xff] %vm34_vm0, %v2626_v9  ;;  %v2616_v16 = vadd.f32 %v3201_v13, %v2610_v14 }
 0x3b0   :  { %v2627_v10 = vadd.f32 %v2826_v52, %v2616_v16 }
 0x3b2   :  { %2631 = vst.msk [vmem:[#allocation2 + $0x18] sm:$0xff] %vm34_vm0, %v2627_v10 }
 0x3b3   :  { %3213 = shalt.err (!%p3210_p4)
}
 0x3b4   :  { %s3225_s23 = smov 128   ;;  %s3226_s24 = smov 8  }
 0x3b5   :  { %2643 = dma.vmem_to_hbm [thread:$0]  %s2638_s19, 512, %s4146_s7, [#allocation3], %s3225_s23, %s3225_s23, %s3226_s24  }
 0x3b6   :  { %3222 = dma.done.wait [#allocation3], 512  }
 0x3b7   :  { %3223 = vsyncadd [#allocation3], 4294966784 }
 0x3b8   :  { %2647 = vsyncpa [#allocation3], 1 }

</bundles_post_ra>
